<compile_context>
chip_gen: v6e
topology: v6e:2x2x1
jax: 0.10.0
libtpu: 0.0.40
codegen_flags: <defaults>
</compile_context>

<pallas_src>
import functools

import jax
import jax.numpy as jnp
from jax import lax
from jax.experimental import pallas as pl
from jax.experimental.pallas import tpu as pltpu


def _round_up(n, m):
    return ((n + m - 1) // m) * m


# ----------------------------------------------------------------------------
# Fused Pallas kernel: whole TCN stack for one block of Bb batch rows
# ----------------------------------------------------------------------------
def _make_tcn_kernel(Bb, T, Cp, CoutP, K, num_layers, PAD, Tp,
                     has_downsample, mxu_dtype):
    def kernel(*refs):
        it = iter(refs)
        x_ref = next(it)        # (Bb, T, Cp)
        w1s_ref = next(it)      # (L, K*Cp, Cp)
        b1s_ref = next(it)      # (L, 1, Cp)
        a1s_ref = next(it)      # (L, 1, Cp)   PReLU slope broadcast over C
        w2s_ref = next(it)      # (L, K*Cp, Cp)
        b2s_ref = next(it)      # (L, 1, Cp)
        a2s_ref = next(it)      # (L, 1, Cp)
        if has_downsample:
            wd_ref = next(it)   # (Cp, Cp)
            bd_ref = next(it)   # (1, Cp)
        wout_ref = next(it)     # (Cp, CoutP)
        bout_ref = next(it)     # (1, CoutP)
        o_ref = next(it)        # (Bb, T, CoutP)
        xpad_ref = next(it)     # VMEM (Bb, Tp, Cp) scratch
        ypad_ref = next(it)     # VMEM (Bb, Tp, Cp) scratch

        # Zero ONLY the halo rows (centre rows [PAD, PAD+T) are fully
        # rewritten below).  Unconditional on purpose: scratch is per-core
        # and uninitialized, and under megacore grid splitting program_id==0
        # only runs on one core.
        hi = Tp - (PAD + T)
        for ref in (xpad_ref, ypad_ref):
            if PAD > 0:
                ref[:, :PAD, :] = jnp.zeros((Bb, PAD, Cp), jnp.float32)
            if hi > 0:
                ref[:, PAD + T:, :] = jnp.zeros((Bb, hi, Cp), jnp.float32)

        # Load the (already channel-padded, lane-dense) input block.
        xpad_ref[:, PAD:PAD + T, :] = x_ref[...].astype(jnp.float32)

        def dilated_conv(src_ref, w, d):
            # im2col LHS: (Bb*T, K*Cp) from K shifted views of the padded
            # activation; ONE MXU dot against (K*Cp, Cp) weights.
            off = PAD - d * (K - 1) // 2
            lhs = jnp.concatenate(
                [src_ref[:, off + k * d:off + k * d + T, :] for k in range(K)],
                axis=-1).reshape(Bb * T, K * Cp)
            return jnp.dot(lhs.astype(mxu_dtype), w,
                           preferred_element_type=jnp.float32
                           ).reshape(Bb, T, Cp)

        # Static unroll over layers (L is small here).  For deep stacks
        # (L > ~8) switch to lax.fori_loop indexing w1s_ref[l] dynamically.
        for l in range(num_layers):
            d = 2 ** l
            h = xpad_ref[:, PAD:PAD + T, :]          # current activation, f32
            # Residual path (read h before it gets overwritten).
            if l == 0 and has_downsample:
                res = (jnp.dot(h.reshape(Bb * T, Cp).astype(mxu_dtype),
                               wd_ref[...],
                               preferred_element_type=jnp.float32
                               ).reshape(Bb, T, Cp)
                       + bd_ref[...])
            else:
                res = h
            # conv1 -> PReLU
            y1 = dilated_conv(xpad_ref, w1s_ref[l], d) + b1s_ref[l]
            y1 = jnp.where(y1 > 0, y1, a1s_ref[l] * y1)
            ypad_ref[:, PAD:PAD + T, :] = y1
            # conv2 -> PReLU (activation BEFORE residual add, as in PyTorch).
            y2 = dilated_conv(ypad_ref, w2s_ref[l], d) + b2s_ref[l]
            y2 = jnp.where(y2 > 0, y2, a2s_ref[l] * y2)
            xpad_ref[:, PAD:PAD + T, :] = y2 + res

        # Final 1x1 projection, fused into the same kernel; lane-dense store.
        h = xpad_ref[:, PAD:PAD + T, :]
        out = (jnp.dot(h.reshape(Bb * T, Cp).astype(mxu_dtype), wout_ref[...],
                       preferred_element_type=jnp.float32
                       ).reshape(Bb, T, CoutP)
               + bout_ref[...])
        o_ref[...] = out.astype(o_ref.dtype)

    return kernel


# ----------------------------------------------------------------------------
# Wrapper: parameter packing + single pallas_call
# ----------------------------------------------------------------------------
def _pick_batch_block(B, T):
    # Aim for >= 256 rows in the matmul M dim (MXU-friendly on v6e/v7x),
    # while keeping Bb an exact divisor of B so every grid step is full.
    target = max(1, -(-256 // max(T, 1)))    # ceil(256 / T)
    bb = min(B, target)
    while B % bb:
        bb -= 1
    return bb


def tcn_forward(x, params, *, kernel_size, num_layers, n_hidden,
                mxu_dtype=jnp.float32):
    """x: (B, T, input_size) -> (B, T, output_size). One fused Pallas call."""
    B, T, input_size = x.shape
    K, L, C = kernel_size, num_layers, n_hidden
    Cp = _round_up(max(C, input_size), 128)          # lane-dense hidden dim
    Cout = params["w_out"].shape[-1]
    CoutP = _round_up(Cout, 128)                     # lane-dense output dim
    has_downsample = input_size != C

    pad_max = (2 ** (L - 1)) * (K - 1) // 2          # largest layer padding
    PAD = _round_up(max(pad_max, 1), 8)              # sublane-aligned centre
    Tp = _round_up(PAD + T + pad_max, 8)

    Bb = _pick_batch_block(B, T)
    n_steps = B // Bb
    # Note for v7x: when B allows, an even n_steps keeps both TensorCores
    # busy under dimension_semantics=("parallel",).

    # --- pack per-layer params: stacked, channel-padded, im2col form -------
    def pad_w(w):                                    # (K, cin, cout) -> (K*Cp, Cp)
        k, cin, cout = w.shape
        w = jnp.pad(w, ((0, 0), (0, Cp - cin), (0, Cp - cout)))
        return w.reshape(k * Cp, Cp)

    def pad_vec(v, n):                               # (c,) -> (1, n)
        return jnp.pad(v, (0, n - v.shape[0])).reshape(1, n)

    w1_l, b1_l, a1_l, w2_l, b2_l, a2_l = [], [], [], [], [], []
    for blk in params["blocks"]:
        w1_l.append(pad_w(blk["w1"]))
        w2_l.append(pad_w(blk["w2"]))
        b1_l.append(pad_vec(blk["b1"], Cp))
        b2_l.append(pad_vec(blk["b2"], Cp))
        a1_l.append(jnp.broadcast_to(blk["a1"].astype(jnp.float32), (1, Cp)))
        a2_l.append(jnp.broadcast_to(blk["a2"].astype(jnp.float32), (1, Cp)))
    w1s = jnp.stack(w1_l).astype(mxu_dtype)          # (L, K*Cp, Cp)
    w2s = jnp.stack(w2_l).astype(mxu_dtype)
    b1s = jnp.stack(b1_l).astype(jnp.float32)        # (L, 1, Cp)
    b2s = jnp.stack(b2_l).astype(jnp.float32)
    a1s = jnp.stack(a1_l)                            # (L, 1, Cp)
    a2s = jnp.stack(a2_l)

    # Input channels padded to Cp in the wrapper -> dense input DMA.
    xp = jnp.pad(x, ((0, 0), (0, 0), (0, Cp - input_size)))

    args = [xp, w1s, b1s, a1s, w2s, b2s, a2s]
    if has_downsample:
        wd = params["blocks"][0]["wd"][0]            # (Cin0, C)
        wd = jnp.pad(wd, ((0, Cp - wd.shape[0]), (0, Cp - wd.shape[1])))
        bd = pad_vec(params["blocks"][0]["bd"], Cp)
        args += [wd.astype(mxu_dtype), bd.astype(jnp.float32)]
    w_out = params["w_out"][0]                       # (C, Cout)
    w_out = jnp.pad(w_out, ((0, Cp - w_out.shape[0]), (0, CoutP - Cout)))
    b_out = pad_vec(params["b_out"], CoutP)
    args += [w_out.astype(mxu_dtype), b_out.astype(jnp.float32)]

    def _rep(arr):   # grid-invariant spec: full array, same block every step
        nd = arr.ndim
        return pl.BlockSpec(arr.shape, lambda g, _nd=nd: (0,) * _nd)

    in_specs = [pl.BlockSpec((Bb, T, Cp), lambda g: (g, 0, 0))]
    in_specs += [_rep(a) for a in args[1:]]

    kernel = _make_tcn_kernel(Bb, T, Cp, CoutP, K, L, PAD, Tp,
                              has_downsample, mxu_dtype)

    out = pl.pallas_call(
        kernel,
        out_shape=jax.ShapeDtypeStruct((B, T, CoutP), x.dtype),
        grid=(n_steps,),
        in_specs=in_specs,
        out_specs=pl.BlockSpec((Bb, T, CoutP), lambda g: (g, 0, 0)),
        scratch_shapes=[pltpu.VMEM((Bb, Tp, Cp), jnp.float32),
                        pltpu.VMEM((Bb, Tp, Cp), jnp.float32)],
        compiler_params=pltpu.CompilerParams(
            dimension_semantics=("parallel",),
            vmem_limit_bytes=32 * 1024 * 1024),
    )(*args)
    return out[..., :Cout]                           # drop lane padding


# ----------------------------------------------------------------------------
# Parameter init (deterministic, mirrors the PyTorch module's shapes).
# ----------------------------------------------------------------------------
def init_tcn_params(key, input_size, output_size, n_hidden, num_layers,
                    kernel_size):
    params = {"blocks": []}
    for i in range(num_layers):
        n_in = input_size if i == 0 else n_hidden
        key, k1, k2, k3, k4, k5, k6 = jax.random.split(key, 7)
        blk = {
            # weights stored as (K, Cin, Cout) == PyTorch (Cout, Cin, K).T
            "w1": 0.01 * jax.random.normal(k1, (kernel_size, n_in, n_hidden),
                                           jnp.float32),
            "b1": 0.01 * jax.random.normal(k2, (n_hidden,), jnp.float32),
            "a1": jnp.asarray(0.25, jnp.float32),   # PReLU default init
            "w2": 0.01 * jax.random.normal(k3, (kernel_size, n_hidden,
                                                n_hidden), jnp.float32),
            "b2": 0.01 * jax.random.normal(k4, (n_hidden,), jnp.float32),
            "a2": jnp.asarray(0.25, jnp.float32),
        }
        if n_in != n_hidden:  # downsample 1x1 conv
            blk["wd"] = 0.01 * jax.random.normal(k5, (1, n_in, n_hidden),
                                                 jnp.float32)
            blk["bd"] = 0.01 * jax.random.normal(k6, (n_hidden,), jnp.float32)
        params["blocks"].append(blk)
    key, k1, k2 = jax.random.split(key, 3)
    params["w_out"] = 0.01 * jax.random.normal(k1, (1, n_hidden, output_size),
                                               jnp.float32)
    params["b_out"] = 0.01 * jax.random.normal(k2, (output_size,), jnp.float32)
    return params


# ----------------------------------------------------------------------------
# Pure-JAX reference (same math, no Pallas) for correctness check
# ----------------------------------------------------------------------------
def _conv1d_ref(x, w, b, dilation, alpha=None, res=None):
    K = w.shape[0]
    pad = dilation * (K - 1) // 2
    xp = jnp.pad(x, ((0, 0), (pad, pad), (0, 0)))
    T = x.shape[1]
    acc = jnp.zeros((x.shape[0], T, w.shape[2]), jnp.float32)
    for k in range(K):
        acc = acc + jnp.einsum("btc,cd->btd",
                               xp[:, k * dilation:k * dilation + T, :], w[k],
                               precision=lax.Precision.HIGHEST)
    acc = acc + b
    if alpha is not None:
        acc = jnp.where(acc > 0, acc, alpha * acc)
    if res is not None:
        acc = acc + res
    return acc


def tcn_forward_ref(x, params):
    h = x
    for i, blk in enumerate(params["blocks"]):
        d = 2 ** i
        y1 = _conv1d_ref(h, blk["w1"], blk["b1"], d, alpha=blk["a1"])
        if "wd" in blk:
            res = _conv1d_ref(h, blk["wd"], blk["bd"], 1)
        else:
            res = h
        h = _conv1d_ref(y1, blk["w2"], blk["b2"], d, alpha=blk["a2"], res=res)
    return _conv1d_ref(h, params["w_out"], params["b_out"], 1)


# ----------------------------------------------------------------------------
if __name__ == "__main__":
    input_size, output_size = 4, 3
    n_hidden, num_layers, kernel_size = 32, 4, 3
    B, T = 2, 16

    key = jax.random.PRNGKey(0)
    kx, kp = jax.random.split(key)
    x = jax.random.normal(kx, (B, T, input_size), jnp.float32)
    params = init_tcn_params(kp, input_size, output_size, n_hidden,
                             num_layers, kernel_size)

    ref = tcn_forward_ref(x, params)

    # f32 MXU operands: strict check against the f32 reference.
    fwd = jax.jit(functools.partial(tcn_forward, kernel_size=kernel_size,
                                    num_layers=num_layers, n_hidden=n_hidden))
    out = jax.block_until_ready(fwd(x, params))
    assert out.shape == (B, T, output_size)
    err = float(jnp.max(jnp.abs(out - ref)))
    assert err < 1e-4, f"mismatch vs reference (f32): max abs err {err}"

    # bf16 MXU operands (v5e/v6e throughput path): f32 accumulation, looser tol.
    fwd_bf16 = jax.jit(functools.partial(tcn_forward, kernel_size=kernel_size,
                                         num_layers=num_layers,
                                         n_hidden=n_hidden,
                                         mxu_dtype=jnp.bfloat16))
    out_bf16 = jax.block_until_ready(fwd_bf16(x, params))
    err_bf16 = float(jnp.max(jnp.abs(out_bf16 - ref)))
    assert err_bf16 < 5e-3, f"mismatch vs reference (bf16): {err_bf16}"

    print("KERNEL_OK")
</pallas_src>

<mosaic_0001>
module attributes {stable_mosaic.version = 11 : i64} {
  func.func @kernel(%arg0: i32, %arg1: memref<2x16x128xf32, #tpu.memory_space<vmem>>, %arg2: memref<4x384x128xf32, #tpu.memory_space<vmem>>, %arg3: memref<4x1x128xf32, #tpu.memory_space<vmem>>, %arg4: memref<4x1x128xf32, #tpu.memory_space<vmem>>, %arg5: memref<4x384x128xf32, #tpu.memory_space<vmem>>, %arg6: memref<4x1x128xf32, #tpu.memory_space<vmem>>, %arg7: memref<4x1x128xf32, #tpu.memory_space<vmem>>, %arg8: memref<128x128xf32, #tpu.memory_space<vmem>>, %arg9: memref<1x128xf32, #tpu.memory_space<vmem>>, %arg10: memref<128x128xf32, #tpu.memory_space<vmem>>, %arg11: memref<1x128xf32, #tpu.memory_space<vmem>>, %arg12: memref<2x16x128xf32, #tpu.memory_space<vmem>>, %arg13: memref<2x32x128xf32, #tpu.memory_space<vmem>>, %arg14: memref<2x32x128xf32, #tpu.memory_space<vmem>>) attributes {dimension_semantics = [#tpu.dimension_semantics<parallel>], iteration_bounds = array<i64: 1>, scalar_prefetch = 0 : i64, scratch_operands = 2 : i64, tpu.core_type = #tpu.core_type<tc>, window_params = [{transform_indices = @transform_0, window_bounds = array<i64: 2, 16, 128>}, {pipeline_mode = #tpu.pipeline_mode<synchronous>, transform_indices = @transform_1, window_bounds = array<i64: 4, 384, 128>}, {pipeline_mode = #tpu.pipeline_mode<synchronous>, transform_indices = @transform_2, window_bounds = array<i64: 4, 1, 128>}, {pipeline_mode = #tpu.pipeline_mode<synchronous>, transform_indices = @transform_3, window_bounds = array<i64: 4, 1, 128>}, {pipeline_mode = #tpu.pipeline_mode<synchronous>, transform_indices = @transform_4, window_bounds = array<i64: 4, 384, 128>}, {pipeline_mode = #tpu.pipeline_mode<synchronous>, transform_indices = @transform_5, window_bounds = array<i64: 4, 1, 128>}, {pipeline_mode = #tpu.pipeline_mode<synchronous>, transform_indices = @transform_6, window_bounds = array<i64: 4, 1, 128>}, {pipeline_mode = #tpu.pipeline_mode<synchronous>, transform_indices = @transform_7, window_bounds = array<i64: 128, 128>}, {pipeline_mode = #tpu.pipeline_mode<synchronous>, transform_indices = @transform_8, window_bounds = array<i64: 1, 128>}, {pipeline_mode = #tpu.pipeline_mode<synchronous>, transform_indices = @transform_9, window_bounds = array<i64: 128, 128>}, {pipeline_mode = #tpu.pipeline_mode<synchronous>, transform_indices = @transform_10, window_bounds = array<i64: 1, 128>}, {transform_indices = @transform_11, window_bounds = array<i64: 2, 16, 128>}]} {
    %cst = arith.constant 0.000000e+00 : f32
    %0 = vector.broadcast %cst : f32 to vector<2x8x128xf32>
    %c0 = arith.constant 0 : index
    %c0_0 = arith.constant 0 : index
    %c0_1 = arith.constant 0 : index
    %1 = vector.load %arg13[%c0, %c0_0, %c0_1] : memref<2x32x128xf32, #tpu.memory_space<vmem>>, vector<2x8x128xf32>
    tpu.vector_store %arg13[%c0, %c0_0, %c0_1], %0 {strides = array<i32>} : memref<2x32x128xf32, #tpu.memory_space<vmem>>, vector<2x8x128xf32>,
    %cst_2 = arith.constant 0.000000e+00 : f32
    %2 = vector.broadcast %cst_2 : f32 to vector<2x8x128xf32>
    %c0_3 = arith.constant 0 : index
    %c24 = arith.constant 24 : index
    %c0_4 = arith.constant 0 : index
    %3 = vector.load %arg13[%c0_3, %c24, %c0_4] : memref<2x32x128xf32, #tpu.memory_space<vmem>>, vector<2x8x128xf32>
    tpu.vector_store %arg13[%c0_3, %c24, %c0_4], %2 {strides = array<i32>} : memref<2x32x128xf32, #tpu.memory_space<vmem>>, vector<2x8x128xf32>,
    %cst_5 = arith.constant 0.000000e+00 : f32
    %4 = vector.broadcast %cst_5 : f32 to vector<2x8x128xf32>
    %c0_6 = arith.constant 0 : index
    %c0_7 = arith.constant 0 : index
    %c0_8 = arith.constant 0 : index
    %5 = vector.load %arg14[%c0_6, %c0_7, %c0_8] : memref<2x32x128xf32, #tpu.memory_space<vmem>>, vector<2x8x128xf32>
    tpu.vector_store %arg14[%c0_6, %c0_7, %c0_8], %4 {strides = array<i32>} : memref<2x32x128xf32, #tpu.memory_space<vmem>>, vector<2x8x128xf32>,
    %cst_9 = arith.constant 0.000000e+00 : f32
    %6 = vector.broadcast %cst_9 : f32 to vector<2x8x128xf32>
    %c0_10 = arith.constant 0 : index
    %c24_11 = arith.constant 24 : index
    %c0_12 = arith.constant 0 : index
    %7 = vector.load %arg14[%c0_10, %c24_11, %c0_12] : memref<2x32x128xf32, #tpu.memory_space<vmem>>, vector<2x8x128xf32>
    tpu.vector_store %arg14[%c0_10, %c24_11, %c0_12], %6 {strides = array<i32>} : memref<2x32x128xf32, #tpu.memory_space<vmem>>, vector<2x8x128xf32>,
    %c0_13 = arith.constant 0 : index
    %c0_14 = arith.constant 0 : index
    %c0_15 = arith.constant 0 : index
    %8 = vector.load %arg1[%c0_13, %c0_14, %c0_15] : memref<2x16x128xf32, #tpu.memory_space<vmem>>, vector<2x16x128xf32>
    %c0_16 = arith.constant 0 : index
    %c8 = arith.constant 8 : index
    %c0_17 = arith.constant 0 : index
    %9 = vector.load %arg13[%c0_16, %c8, %c0_17] : memref<2x32x128xf32, #tpu.memory_space<vmem>>, vector<2x16x128xf32>
    tpu.vector_store %arg13[%c0_16, %c8, %c0_17], %8 {strides = array<i32>} : memref<2x32x128xf32, #tpu.memory_space<vmem>>, vector<2x16x128xf32>,
    %c0_18 = arith.constant 0 : index
    %c8_19 = arith.constant 8 : index
    %c0_20 = arith.constant 0 : index
    %10 = vector.load %arg13[%c0_18, %c8_19, %c0_20] : memref<2x32x128xf32, #tpu.memory_space<vmem>>, vector<2x16x128xf32>
    %11 = vector.shape_cast %10 : vector<2x16x128xf32> to vector<32x128xf32>
    %c0_21 = arith.constant 0 : index
    %c0_22 = arith.constant 0 : index
    %12 = vector.load %arg8[%c0_21, %c0_22] : memref<128x128xf32, #tpu.memory_space<vmem>>, vector<128x128xf32>
    %cst_23 = arith.constant dense<0.000000e+00> : vector<32x128xf32>
    %13 = tpu.matmul %11, %12, %cst_23 {dimension_numbers = #tpu.dot_dimension_numbers<[1], [0], [0], [1], [0, 0, 1, 1], [], []>} : vector<32x128xf32>, vector<128x128xf32>, vector<32x128xf32> -> vector<32x128xf32>
    %14 = vector.shape_cast %13 : vector<32x128xf32> to vector<2x16x128xf32>
    %c0_24 = arith.constant 0 : index
    %c0_25 = arith.constant 0 : index
    %15 = vector.load %arg9[%c0_24, %c0_25] : memref<1x128xf32, #tpu.memory_space<vmem>>, vector<1x128xf32>
    %16 = vector.shape_cast %15 : vector<1x128xf32> to vector<1x1x128xf32>
    %17 = vector.broadcast %16 : vector<1x1x128xf32> to vector<2x16x128xf32>
    %18 = arith.addf %14, %17 : vector<2x16x128xf32>
    %c0_26 = arith.constant 0 : index
    %c0_27 = arith.constant 0 : index
    %c0_28 = arith.constant 0 : index
    %19 = vector.load %arg2[%c0_26, %c0_27, %c0_28] : memref<4x384x128xf32, #tpu.memory_space<vmem>>, vector<1x384x128xf32>
    %20 = vector.shape_cast %19 : vector<1x384x128xf32> to vector<384x128xf32>
    %c0_29 = arith.constant 0 : index
    %c7 = arith.constant 7 : index
    %c0_30 = arith.constant 0 : index
    %21 = vector.load %arg13[%c0_29, %c7, %c0_30] : memref<2x32x128xf32, #tpu.memory_space<vmem>>, vector<2x16x128xf32>
    %c0_31 = arith.constant 0 : index
    %c8_32 = arith.constant 8 : index
    %c0_33 = arith.constant 0 : index
    %22 = vector.load %arg13[%c0_31, %c8_32, %c0_33] : memref<2x32x128xf32, #tpu.memory_space<vmem>>, vector<2x16x128xf32>
    %c0_34 = arith.constant 0 : index
    %c9 = arith.constant 9 : index
    %c0_35 = arith.constant 0 : index
    %23 = vector.load %arg13[%c0_34, %c9, %c0_35] : memref<2x32x128xf32, #tpu.memory_space<vmem>>, vector<2x16x128xf32>
    %24 = tpu.concatenate %21, %22, %23 in 2 : vector<2x16x128xf32>, vector<2x16x128xf32>, vector<2x16x128xf32> -> vector<2x16x384xf32>
    %25 = vector.shape_cast %24 : vector<2x16x384xf32> to vector<32x384xf32>
    %cst_36 = arith.constant dense<0.000000e+00> : vector<32x128xf32>
    %26 = tpu.matmul %25, %20, %cst_36 {dimension_numbers = #tpu.dot_dimension_numbers<[1], [0], [0], [1], [0, 0, 1, 1], [], []>} : vector<32x384xf32>, vector<384x128xf32>, vector<32x128xf32> -> vector<32x128xf32>
    %27 = vector.shape_cast %26 : vector<32x128xf32> to vector<2x16x128xf32>
    %c0_37 = arith.constant 0 : index
    %c0_38 = arith.constant 0 : index
    %c0_39 = arith.constant 0 : index
    %28 = vector.load %arg3[%c0_37, %c0_38, %c0_39] : memref<4x1x128xf32, #tpu.memory_space<vmem>>, vector<1x1x128xf32>
    %29 = vector.shape_cast %28 : vector<1x1x128xf32> to vector<1x128xf32>
    %30 = vector.shape_cast %29 : vector<1x128xf32> to vector<1x1x128xf32>
    %31 = vector.broadcast %30 : vector<1x1x128xf32> to vector<2x16x128xf32>
    %32 = arith.addf %27, %31 : vector<2x16x128xf32>
    %cst_40 = arith.constant 0.000000e+00 : f32
    %33 = vector.broadcast %cst_40 : f32 to vector<2x16x128xf32>
    %34 = arith.cmpf ogt, %32, %33 : vector<2x16x128xf32>
    %c0_41 = arith.constant 0 : index
    %c0_42 = arith.constant 0 : index
    %c0_43 = arith.constant 0 : index
    %35 = vector.load %arg4[%c0_41, %c0_42, %c0_43] : memref<4x1x128xf32, #tpu.memory_space<vmem>>, vector<1x1x128xf32>
    %36 = vector.shape_cast %35 : vector<1x1x128xf32> to vector<1x128xf32>
    %37 = vector.shape_cast %36 : vector<1x128xf32> to vector<1x1x128xf32>
    %38 = vector.broadcast %37 : vector<1x1x128xf32> to vector<2x16x128xf32>
    %39 = arith.mulf %38, %32 : vector<2x16x128xf32>
    %40 = arith.select %34, %32, %39 : vector<2x16x128xi1>, vector<2x16x128xf32>
    %c0_44 = arith.constant 0 : index
    %c8_45 = arith.constant 8 : index
    %c0_46 = arith.constant 0 : index
    %41 = vector.load %arg14[%c0_44, %c8_45, %c0_46] : memref<2x32x128xf32, #tpu.memory_space<vmem>>, vector<2x16x128xf32>
    tpu.vector_store %arg14[%c0_44, %c8_45, %c0_46], %40 {strides = array<i32>} : memref<2x32x128xf32, #tpu.memory_space<vmem>>, vector<2x16x128xf32>,
    %c0_47 = arith.constant 0 : index
    %c0_48 = arith.constant 0 : index
    %c0_49 = arith.constant 0 : index
    %42 = vector.load %arg5[%c0_47, %c0_48, %c0_49] : memref<4x384x128xf32, #tpu.memory_space<vmem>>, vector<1x384x128xf32>
    %43 = vector.shape_cast %42 : vector<1x384x128xf32> to vector<384x128xf32>
    %c0_50 = arith.constant 0 : index
    %c7_51 = arith.constant 7 : index
    %c0_52 = arith.constant 0 : index
    %44 = vector.load %arg14[%c0_50, %c7_51, %c0_52] : memref<2x32x128xf32, #tpu.memory_space<vmem>>, vector<2x16x128xf32>
    %c0_53 = arith.constant 0 : index
    %c8_54 = arith.constant 8 : index
    %c0_55 = arith.constant 0 : index
    %45 = vector.load %arg14[%c0_53, %c8_54, %c0_55] : memref<2x32x128xf32, #tpu.memory_space<vmem>>, vector<2x16x128xf32>
    %c0_56 = arith.constant 0 : index
    %c9_57 = arith.constant 9 : index
    %c0_58 = arith.constant 0 : index
    %46 = vector.load %arg14[%c0_56, %c9_57, %c0_58] : memref<2x32x128xf32, #tpu.memory_space<vmem>>, vector<2x16x128xf32>
    %47 = tpu.concatenate %44, %45, %46 in 2 : vector<2x16x128xf32>, vector<2x16x128xf32>, vector<2x16x128xf32> -> vector<2x16x384xf32>
    %48 = vector.shape_cast %47 : vector<2x16x384xf32> to vector<32x384xf32>
    %cst_59 = arith.constant dense<0.000000e+00> : vector<32x128xf32>
    %49 = tpu.matmul %48, %43, %cst_59 {dimension_numbers = #tpu.dot_dimension_numbers<[1], [0], [0], [1], [0, 0, 1, 1], [], []>} : vector<32x384xf32>, vector<384x128xf32>, vector<32x128xf32> -> vector<32x128xf32>
    %50 = vector.shape_cast %49 : vector<32x128xf32> to vector<2x16x128xf32>
    %c0_60 = arith.constant 0 : index
    %c0_61 = arith.constant 0 : index
    %c0_62 = arith.constant 0 : index
    %51 = vector.load %arg6[%c0_60, %c0_61, %c0_62] : memref<4x1x128xf32, #tpu.memory_space<vmem>>, vector<1x1x128xf32>
    %52 = vector.shape_cast %51 : vector<1x1x128xf32> to vector<1x128xf32>
    %53 = vector.shape_cast %52 : vector<1x128xf32> to vector<1x1x128xf32>
    %54 = vector.broadcast %53 : vector<1x1x128xf32> to vector<2x16x128xf32>
    %55 = arith.addf %50, %54 : vector<2x16x128xf32>
    %cst_63 = arith.constant 0.000000e+00 : f32
    %56 = vector.broadcast %cst_63 : f32 to vector<2x16x128xf32>
    %57 = arith.cmpf ogt, %55, %56 : vector<2x16x128xf32>
    %c0_64 = arith.constant 0 : index
    %c0_65 = arith.constant 0 : index
    %c0_66 = arith.constant 0 : index
    %58 = vector.load %arg7[%c0_64, %c0_65, %c0_66] : memref<4x1x128xf32, #tpu.memory_space<vmem>>, vector<1x1x128xf32>
    %59 = vector.shape_cast %58 : vector<1x1x128xf32> to vector<1x128xf32>
    %60 = vector.shape_cast %59 : vector<1x128xf32> to vector<1x1x128xf32>
    %61 = vector.broadcast %60 : vector<1x1x128xf32> to vector<2x16x128xf32>
    %62 = arith.mulf %61, %55 : vector<2x16x128xf32>
    %63 = arith.select %57, %55, %62 : vector<2x16x128xi1>, vector<2x16x128xf32>
    %64 = arith.addf %63, %18 : vector<2x16x128xf32>
    %c0_67 = arith.constant 0 : index
    %c8_68 = arith.constant 8 : index
    %c0_69 = arith.constant 0 : index
    %65 = vector.load %arg13[%c0_67, %c8_68, %c0_69] : memref<2x32x128xf32, #tpu.memory_space<vmem>>, vector<2x16x128xf32>
    tpu.vector_store %arg13[%c0_67, %c8_68, %c0_69], %64 {strides = array<i32>} : memref<2x32x128xf32, #tpu.memory_space<vmem>>, vector<2x16x128xf32>,
    %c0_70 = arith.constant 0 : index
    %c8_71 = arith.constant 8 : index
    %c0_72 = arith.constant 0 : index
    %66 = vector.load %arg13[%c0_70, %c8_71, %c0_72] : memref<2x32x128xf32, #tpu.memory_space<vmem>>, vector<2x16x128xf32>
    %c1 = arith.constant 1 : index
    %c0_73 = arith.constant 0 : index
    %c0_74 = arith.constant 0 : index
    %67 = vector.load %arg2[%c1, %c0_73, %c0_74] : memref<4x384x128xf32, #tpu.memory_space<vmem>>, vector<1x384x128xf32>
    %68 = vector.shape_cast %67 : vector<1x384x128xf32> to vector<384x128xf32>
    %c0_75 = arith.constant 0 : index
    %c6 = arith.constant 6 : index
    %c0_76 = arith.constant 0 : index
    %69 = vector.load %arg13[%c0_75, %c6, %c0_76] : memref<2x32x128xf32, #tpu.memory_space<vmem>>, vector<2x16x128xf32>
    %c0_77 = arith.constant 0 : index
    %c8_78 = arith.constant 8 : index
    %c0_79 = arith.constant 0 : index
    %70 = vector.load %arg13[%c0_77, %c8_78, %c0_79] : memref<2x32x128xf32, #tpu.memory_space<vmem>>, vector<2x16x128xf32>
    %c0_80 = arith.constant 0 : index
    %c10 = arith.constant 10 : index
    %c0_81 = arith.constant 0 : index
    %71 = vector.load %arg13[%c0_80, %c10, %c0_81] : memref<2x32x128xf32, #tpu.memory_space<vmem>>, vector<2x16x128xf32>
    %72 = tpu.concatenate %69, %70, %71 in 2 : vector<2x16x128xf32>, vector<2x16x128xf32>, vector<2x16x128xf32> -> vector<2x16x384xf32>
    %73 = vector.shape_cast %72 : vector<2x16x384xf32> to vector<32x384xf32>
    %cst_82 = arith.constant dense<0.000000e+00> : vector<32x128xf32>
    %74 = tpu.matmul %73, %68, %cst_82 {dimension_numbers = #tpu.dot_dimension_numbers<[1], [0], [0], [1], [0, 0, 1, 1], [], []>} : vector<32x384xf32>, vector<384x128xf32>, vector<32x128xf32> -> vector<32x128xf32>
    %75 = vector.shape_cast %74 : vector<32x128xf32> to vector<2x16x128xf32>
    %c1_83 = arith.constant 1 : index
    %c0_84 = arith.constant 0 : index
    %c0_85 = arith.constant 0 : index
    %76 = vector.load %arg3[%c1_83, %c0_84, %c0_85] : memref<4x1x128xf32, #tpu.memory_space<vmem>>, vector<1x1x128xf32>
    %77 = vector.shape_cast %76 : vector<1x1x128xf32> to vector<1x128xf32>
    %78 = vector.shape_cast %77 : vector<1x128xf32> to vector<1x1x128xf32>
    %79 = vector.broadcast %78 : vector<1x1x128xf32> to vector<2x16x128xf32>
    %80 = arith.addf %75, %79 : vector<2x16x128xf32>
    %cst_86 = arith.constant 0.000000e+00 : f32
    %81 = vector.broadcast %cst_86 : f32 to vector<2x16x128xf32>
    %82 = arith.cmpf ogt, %80, %81 : vector<2x16x128xf32>
    %c1_87 = arith.constant 1 : index
    %c0_88 = arith.constant 0 : index
    %c0_89 = arith.constant 0 : index
    %83 = vector.load %arg4[%c1_87, %c0_88, %c0_89] : memref<4x1x128xf32, #tpu.memory_space<vmem>>, vector<1x1x128xf32>
    %84 = vector.shape_cast %83 : vector<1x1x128xf32> to vector<1x128xf32>
    %85 = vector.shape_cast %84 : vector<1x128xf32> to vector<1x1x128xf32>
    %86 = vector.broadcast %85 : vector<1x1x128xf32> to vector<2x16x128xf32>
    %87 = arith.mulf %86, %80 : vector<2x16x128xf32>
    %88 = arith.select %82, %80, %87 : vector<2x16x128xi1>, vector<2x16x128xf32>
    %c0_90 = arith.constant 0 : index
    %c8_91 = arith.constant 8 : index
    %c0_92 = arith.constant 0 : index
    %89 = vector.load %arg14[%c0_90, %c8_91, %c0_92] : memref<2x32x128xf32, #tpu.memory_space<vmem>>, vector<2x16x128xf32>
    tpu.vector_store %arg14[%c0_90, %c8_91, %c0_92], %88 {strides = array<i32>} : memref<2x32x128xf32, #tpu.memory_space<vmem>>, vector<2x16x128xf32>,
    %c1_93 = arith.constant 1 : index
    %c0_94 = arith.constant 0 : index
    %c0_95 = arith.constant 0 : index
    %90 = vector.load %arg5[%c1_93, %c0_94, %c0_95] : memref<4x384x128xf32, #tpu.memory_space<vmem>>, vector<1x384x128xf32>
    %91 = vector.shape_cast %90 : vector<1x384x128xf32> to vector<384x128xf32>
    %c0_96 = arith.constant 0 : index
    %c6_97 = arith.constant 6 : index
    %c0_98 = arith.constant 0 : index
    %92 = vector.load %arg14[%c0_96, %c6_97, %c0_98] : memref<2x32x128xf32, #tpu.memory_space<vmem>>, vector<2x16x128xf32>
    %c0_99 = arith.constant 0 : index
    %c8_100 = arith.constant 8 : index
    %c0_101 = arith.constant 0 : index
    %93 = vector.load %arg14[%c0_99, %c8_100, %c0_101] : memref<2x32x128xf32, #tpu.memory_space<vmem>>, vector<2x16x128xf32>
    %c0_102 = arith.constant 0 : index
    %c10_103 = arith.constant 10 : index
    %c0_104 = arith.constant 0 : index
    %94 = vector.load %arg14[%c0_102, %c10_103, %c0_104] : memref<2x32x128xf32, #tpu.memory_space<vmem>>, vector<2x16x128xf32>
    %95 = tpu.concatenate %92, %93, %94 in 2 : vector<2x16x128xf32>, vector<2x16x128xf32>, vector<2x16x128xf32> -> vector<2x16x384xf32>
    %96 = vector.shape_cast %95 : vector<2x16x384xf32> to vector<32x384xf32>
    %cst_105 = arith.constant dense<0.000000e+00> : vector<32x128xf32>
    %97 = tpu.matmul %96, %91, %cst_105 {dimension_numbers = #tpu.dot_dimension_numbers<[1], [0], [0], [1], [0, 0, 1, 1], [], []>} : vector<32x384xf32>, vector<384x128xf32>, vector<32x128xf32> -> vector<32x128xf32>
    %98 = vector.shape_cast %97 : vector<32x128xf32> to vector<2x16x128xf32>
    %c1_106 = arith.constant 1 : index
    %c0_107 = arith.constant 0 : index
    %c0_108 = arith.constant 0 : index
    %99 = vector.load %arg6[%c1_106, %c0_107, %c0_108] : memref<4x1x128xf32, #tpu.memory_space<vmem>>, vector<1x1x128xf32>
    %100 = vector.shape_cast %99 : vector<1x1x128xf32> to vector<1x128xf32>
    %101 = vector.shape_cast %100 : vector<1x128xf32> to vector<1x1x128xf32>
    %102 = vector.broadcast %101 : vector<1x1x128xf32> to vector<2x16x128xf32>
    %103 = arith.addf %98, %102 : vector<2x16x128xf32>
    %cst_109 = arith.constant 0.000000e+00 : f32
    %104 = vector.broadcast %cst_109 : f32 to vector<2x16x128xf32>
    %105 = arith.cmpf ogt, %103, %104 : vector<2x16x128xf32>
    %c1_110 = arith.constant 1 : index
    %c0_111 = arith.constant 0 : index
    %c0_112 = arith.constant 0 : index
    %106 = vector.load %arg7[%c1_110, %c0_111, %c0_112] : memref<4x1x128xf32, #tpu.memory_space<vmem>>, vector<1x1x128xf32>
    %107 = vector.shape_cast %106 : vector<1x1x128xf32> to vector<1x128xf32>
    %108 = vector.shape_cast %107 : vector<1x128xf32> to vector<1x1x128xf32>
    %109 = vector.broadcast %108 : vector<1x1x128xf32> to vector<2x16x128xf32>
    %110 = arith.mulf %109, %103 : vector<2x16x128xf32>
    %111 = arith.select %105, %103, %110 : vector<2x16x128xi1>, vector<2x16x128xf32>
    %112 = arith.addf %111, %66 : vector<2x16x128xf32>
    %c0_113 = arith.constant 0 : index
    %c8_114 = arith.constant 8 : index
    %c0_115 = arith.constant 0 : index
    %113 = vector.load %arg13[%c0_113, %c8_114, %c0_115] : memref<2x32x128xf32, #tpu.memory_space<vmem>>, vector<2x16x128xf32>
    tpu.vector_store %arg13[%c0_113, %c8_114, %c0_115], %112 {strides = array<i32>} : memref<2x32x128xf32, #tpu.memory_space<vmem>>, vector<2x16x128xf32>,
    %c0_116 = arith.constant 0 : index
    %c8_117 = arith.constant 8 : index
    %c0_118 = arith.constant 0 : index
    %114 = vector.load %arg13[%c0_116, %c8_117, %c0_118] : memref<2x32x128xf32, #tpu.memory_space<vmem>>, vector<2x16x128xf32>
    %c2 = arith.constant 2 : index
    %c0_119 = arith.constant 0 : index
    %c0_120 = arith.constant 0 : index
    %115 = vector.load %arg2[%c2, %c0_119, %c0_120] : memref<4x384x128xf32, #tpu.memory_space<vmem>>, vector<1x384x128xf32>
    %116 = vector.shape_cast %115 : vector<1x384x128xf32> to vector<384x128xf32>
    %c0_121 = arith.constant 0 : index
    %c4 = arith.constant 4 : index
    %c0_122 = arith.constant 0 : index
    %117 = vector.load %arg13[%c0_121, %c4, %c0_122] : memref<2x32x128xf32, #tpu.memory_space<vmem>>, vector<2x16x128xf32>
    %c0_123 = arith.constant 0 : index
    %c8_124 = arith.constant 8 : index
    %c0_125 = arith.constant 0 : index
    %118 = vector.load %arg13[%c0_123, %c8_124, %c0_125] : memref<2x32x128xf32, #tpu.memory_space<vmem>>, vector<2x16x128xf32>
    %c0_126 = arith.constant 0 : index
    %c12 = arith.constant 12 : index
    %c0_127 = arith.constant 0 : index
    %119 = vector.load %arg13[%c0_126, %c12, %c0_127] : memref<2x32x128xf32, #tpu.memory_space<vmem>>, vector<2x16x128xf32>
    %120 = tpu.concatenate %117, %118, %119 in 2 : vector<2x16x128xf32>, vector<2x16x128xf32>, vector<2x16x128xf32> -> vector<2x16x384xf32>
    %121 = vector.shape_cast %120 : vector<2x16x384xf32> to vector<32x384xf32>
    %cst_128 = arith.constant dense<0.000000e+00> : vector<32x128xf32>
    %122 = tpu.matmul %121, %116, %cst_128 {dimension_numbers = #tpu.dot_dimension_numbers<[1], [0], [0], [1], [0, 0, 1, 1], [], []>} : vector<32x384xf32>, vector<384x128xf32>, vector<32x128xf32> -> vector<32x128xf32>
    %123 = vector.shape_cast %122 : vector<32x128xf32> to vector<2x16x128xf32>
    %c2_129 = arith.constant 2 : index
    %c0_130 = arith.constant 0 : index
    %c0_131 = arith.constant 0 : index
    %124 = vector.load %arg3[%c2_129, %c0_130, %c0_131] : memref<4x1x128xf32, #tpu.memory_space<vmem>>, vector<1x1x128xf32>
    %125 = vector.shape_cast %124 : vector<1x1x128xf32> to vector<1x128xf32>
    %126 = vector.shape_cast %125 : vector<1x128xf32> to vector<1x1x128xf32>
    %127 = vector.broadcast %126 : vector<1x1x128xf32> to vector<2x16x128xf32>
    %128 = arith.addf %123, %127 : vector<2x16x128xf32>
    %cst_132 = arith.constant 0.000000e+00 : f32
    %129 = vector.broadcast %cst_132 : f32 to vector<2x16x128xf32>
    %130 = arith.cmpf ogt, %128, %129 : vector<2x16x128xf32>
    %c2_133 = arith.constant 2 : index
    %c0_134 = arith.constant 0 : index
    %c0_135 = arith.constant 0 : index
    %131 = vector.load %arg4[%c2_133, %c0_134, %c0_135] : memref<4x1x128xf32, #tpu.memory_space<vmem>>, vector<1x1x128xf32>
    %132 = vector.shape_cast %131 : vector<1x1x128xf32> to vector<1x128xf32>
    %133 = vector.shape_cast %132 : vector<1x128xf32> to vector<1x1x128xf32>
    %134 = vector.broadcast %133 : vector<1x1x128xf32> to vector<2x16x128xf32>
    %135 = arith.mulf %134, %128 : vector<2x16x128xf32>
    %136 = arith.select %130, %128, %135 : vector<2x16x128xi1>, vector<2x16x128xf32>
    %c0_136 = arith.constant 0 : index
    %c8_137 = arith.constant 8 : index
    %c0_138 = arith.constant 0 : index
    %137 = vector.load %arg14[%c0_136, %c8_137, %c0_138] : memref<2x32x128xf32, #tpu.memory_space<vmem>>, vector<2x16x128xf32>
    tpu.vector_store %arg14[%c0_136, %c8_137, %c0_138], %136 {strides = array<i32>} : memref<2x32x128xf32, #tpu.memory_space<vmem>>, vector<2x16x128xf32>,
    %c2_139 = arith.constant 2 : index
    %c0_140 = arith.constant 0 : index
    %c0_141 = arith.constant 0 : index
    %138 = vector.load %arg5[%c2_139, %c0_140, %c0_141] : memref<4x384x128xf32, #tpu.memory_space<vmem>>, vector<1x384x128xf32>
    %139 = vector.shape_cast %138 : vector<1x384x128xf32> to vector<384x128xf32>
    %c0_142 = arith.constant 0 : index
    %c4_143 = arith.constant 4 : index
    %c0_144 = arith.constant 0 : index
    %140 = vector.load %arg14[%c0_142, %c4_143, %c0_144] : memref<2x32x128xf32, #tpu.memory_space<vmem>>, vector<2x16x128xf32>
    %c0_145 = arith.constant 0 : index
    %c8_146 = arith.constant 8 : index
    %c0_147 = arith.constant 0 : index
    %141 = vector.load %arg14[%c0_145, %c8_146, %c0_147] : memref<2x32x128xf32, #tpu.memory_space<vmem>>, vector<2x16x128xf32>
    %c0_148 = arith.constant 0 : index
    %c12_149 = arith.constant 12 : index
    %c0_150 = arith.constant 0 : index
    %142 = vector.load %arg14[%c0_148, %c12_149, %c0_150] : memref<2x32x128xf32, #tpu.memory_space<vmem>>, vector<2x16x128xf32>
    %143 = tpu.concatenate %140, %141, %142 in 2 : vector<2x16x128xf32>, vector<2x16x128xf32>, vector<2x16x128xf32> -> vector<2x16x384xf32>
    %144 = vector.shape_cast %143 : vector<2x16x384xf32> to vector<32x384xf32>
    %cst_151 = arith.constant dense<0.000000e+00> : vector<32x128xf32>
    %145 = tpu.matmul %144, %139, %cst_151 {dimension_numbers = #tpu.dot_dimension_numbers<[1], [0], [0], [1], [0, 0, 1, 1], [], []>} : vector<32x384xf32>, vector<384x128xf32>, vector<32x128xf32> -> vector<32x128xf32>
    %146 = vector.shape_cast %145 : vector<32x128xf32> to vector<2x16x128xf32>
    %c2_152 = arith.constant 2 : index
    %c0_153 = arith.constant 0 : index
    %c0_154 = arith.constant 0 : index
    %147 = vector.load %arg6[%c2_152, %c0_153, %c0_154] : memref<4x1x128xf32, #tpu.memory_space<vmem>>, vector<1x1x128xf32>
    %148 = vector.shape_cast %147 : vector<1x1x128xf32> to vector<1x128xf32>
    %149 = vector.shape_cast %148 : vector<1x128xf32> to vector<1x1x128xf32>
    %150 = vector.broadcast %149 : vector<1x1x128xf32> to vector<2x16x128xf32>
    %151 = arith.addf %146, %150 : vector<2x16x128xf32>
    %cst_155 = arith.constant 0.000000e+00 : f32
    %152 = vector.broadcast %cst_155 : f32 to vector<2x16x128xf32>
    %153 = arith.cmpf ogt, %151, %152 : vector<2x16x128xf32>
    %c2_156 = arith.constant 2 : index
    %c0_157 = arith.constant 0 : index
    %c0_158 = arith.constant 0 : index
    %154 = vector.load %arg7[%c2_156, %c0_157, %c0_158] : memref<4x1x128xf32, #tpu.memory_space<vmem>>, vector<1x1x128xf32>
    %155 = vector.shape_cast %154 : vector<1x1x128xf32> to vector<1x128xf32>
    %156 = vector.shape_cast %155 : vector<1x128xf32> to vector<1x1x128xf32>
    %157 = vector.broadcast %156 : vector<1x1x128xf32> to vector<2x16x128xf32>
    %158 = arith.mulf %157, %151 : vector<2x16x128xf32>
    %159 = arith.select %153, %151, %158 : vector<2x16x128xi1>, vector<2x16x128xf32>
    %160 = arith.addf %159, %114 : vector<2x16x128xf32>
    %c0_159 = arith.constant 0 : index
    %c8_160 = arith.constant 8 : index
    %c0_161 = arith.constant 0 : index
    %161 = vector.load %arg13[%c0_159, %c8_160, %c0_161] : memref<2x32x128xf32, #tpu.memory_space<vmem>>, vector<2x16x128xf32>
    tpu.vector_store %arg13[%c0_159, %c8_160, %c0_161], %160 {strides = array<i32>} : memref<2x32x128xf32, #tpu.memory_space<vmem>>, vector<2x16x128xf32>,
    %c0_162 = arith.constant 0 : index
    %c8_163 = arith.constant 8 : index
    %c0_164 = arith.constant 0 : index
    %162 = vector.load %arg13[%c0_162, %c8_163, %c0_164] : memref<2x32x128xf32, #tpu.memory_space<vmem>>, vector<2x16x128xf32>
    %c3 = arith.constant 3 : index
    %c0_165 = arith.constant 0 : index
    %c0_166 = arith.constant 0 : index
    %163 = vector.load %arg2[%c3, %c0_165, %c0_166] : memref<4x384x128xf32, #tpu.memory_space<vmem>>, vector<1x384x128xf32>
    %164 = vector.shape_cast %163 : vector<1x384x128xf32> to vector<384x128xf32>
    %c0_167 = arith.constant 0 : index
    %c0_168 = arith.constant 0 : index
    %c0_169 = arith.constant 0 : index
    %165 = vector.load %arg13[%c0_167, %c0_168, %c0_169] : memref<2x32x128xf32, #tpu.memory_space<vmem>>, vector<2x16x128xf32>
    %c0_170 = arith.constant 0 : index
    %c8_171 = arith.constant 8 : index
    %c0_172 = arith.constant 0 : index
    %166 = vector.load %arg13[%c0_170, %c8_171, %c0_172] : memref<2x32x128xf32, #tpu.memory_space<vmem>>, vector<2x16x128xf32>
    %c0_173 = arith.constant 0 : index
    %c16 = arith.constant 16 : index
    %c0_174 = arith.constant 0 : index
    %167 = vector.load %arg13[%c0_173, %c16, %c0_174] : memref<2x32x128xf32, #tpu.memory_space<vmem>>, vector<2x16x128xf32>
    %168 = tpu.concatenate %165, %166, %167 in 2 : vector<2x16x128xf32>, vector<2x16x128xf32>, vector<2x16x128xf32> -> vector<2x16x384xf32>
    %169 = vector.shape_cast %168 : vector<2x16x384xf32> to vector<32x384xf32>
    %cst_175 = arith.constant dense<0.000000e+00> : vector<32x128xf32>
    %170 = tpu.matmul %169, %164, %cst_175 {dimension_numbers = #tpu.dot_dimension_numbers<[1], [0], [0], [1], [0, 0, 1, 1], [], []>} : vector<32x384xf32>, vector<384x128xf32>, vector<32x128xf32> -> vector<32x128xf32>
    %171 = vector.shape_cast %170 : vector<32x128xf32> to vector<2x16x128xf32>
    %c3_176 = arith.constant 3 : index
    %c0_177 = arith.constant 0 : index
    %c0_178 = arith.constant 0 : index
    %172 = vector.load %arg3[%c3_176, %c0_177, %c0_178] : memref<4x1x128xf32, #tpu.memory_space<vmem>>, vector<1x1x128xf32>
    %173 = vector.shape_cast %172 : vector<1x1x128xf32> to vector<1x128xf32>
    %174 = vector.shape_cast %173 : vector<1x128xf32> to vector<1x1x128xf32>
    %175 = vector.broadcast %174 : vector<1x1x128xf32> to vector<2x16x128xf32>
    %176 = arith.addf %171, %175 : vector<2x16x128xf32>
    %cst_179 = arith.constant 0.000000e+00 : f32
    %177 = vector.broadcast %cst_179 : f32 to vector<2x16x128xf32>
    %178 = arith.cmpf ogt, %176, %177 : vector<2x16x128xf32>
    %c3_180 = arith.constant 3 : index
    %c0_181 = arith.constant 0 : index
    %c0_182 = arith.constant 0 : index
    %179 = vector.load %arg4[%c3_180, %c0_181, %c0_182] : memref<4x1x128xf32, #tpu.memory_space<vmem>>, vector<1x1x128xf32>
    %180 = vector.shape_cast %179 : vector<1x1x128xf32> to vector<1x128xf32>
    %181 = vector.shape_cast %180 : vector<1x128xf32> to vector<1x1x128xf32>
    %182 = vector.broadcast %181 : vector<1x1x128xf32> to vector<2x16x128xf32>
    %183 = arith.mulf %182, %176 : vector<2x16x128xf32>
    %184 = arith.select %178, %176, %183 : vector<2x16x128xi1>, vector<2x16x128xf32>
    %c0_183 = arith.constant 0 : index
    %c8_184 = arith.constant 8 : index
    %c0_185 = arith.constant 0 : index
    %185 = vector.load %arg14[%c0_183, %c8_184, %c0_185] : memref<2x32x128xf32, #tpu.memory_space<vmem>>, vector<2x16x128xf32>
    tpu.vector_store %arg14[%c0_183, %c8_184, %c0_185], %184 {strides = array<i32>} : memref<2x32x128xf32, #tpu.memory_space<vmem>>, vector<2x16x128xf32>,
    %c3_186 = arith.constant 3 : index
    %c0_187 = arith.constant 0 : index
    %c0_188 = arith.constant 0 : index
    %186 = vector.load %arg5[%c3_186, %c0_187, %c0_188] : memref<4x384x128xf32, #tpu.memory_space<vmem>>, vector<1x384x128xf32>
    %187 = vector.shape_cast %186 : vector<1x384x128xf32> to vector<384x128xf32>
    %c0_189 = arith.constant 0 : index
    %c0_190 = arith.constant 0 : index
    %c0_191 = arith.constant 0 : index
    %188 = vector.load %arg14[%c0_189, %c0_190, %c0_191] : memref<2x32x128xf32, #tpu.memory_space<vmem>>, vector<2x16x128xf32>
    %c0_192 = arith.constant 0 : index
    %c8_193 = arith.constant 8 : index
    %c0_194 = arith.constant 0 : index
    %189 = vector.load %arg14[%c0_192, %c8_193, %c0_194] : memref<2x32x128xf32, #tpu.memory_space<vmem>>, vector<2x16x128xf32>
    %c0_195 = arith.constant 0 : index
    %c16_196 = arith.constant 16 : index
    %c0_197 = arith.constant 0 : index
    %190 = vector.load %arg14[%c0_195, %c16_196, %c0_197] : memref<2x32x128xf32, #tpu.memory_space<vmem>>, vector<2x16x128xf32>
    %191 = tpu.concatenate %188, %189, %190 in 2 : vector<2x16x128xf32>, vector<2x16x128xf32>, vector<2x16x128xf32> -> vector<2x16x384xf32>
    %192 = vector.shape_cast %191 : vector<2x16x384xf32> to vector<32x384xf32>
    %cst_198 = arith.constant dense<0.000000e+00> : vector<32x128xf32>
    %193 = tpu.matmul %192, %187, %cst_198 {dimension_numbers = #tpu.dot_dimension_numbers<[1], [0], [0], [1], [0, 0, 1, 1], [], []>} : vector<32x384xf32>, vector<384x128xf32>, vector<32x128xf32> -> vector<32x128xf32>
    %194 = vector.shape_cast %193 : vector<32x128xf32> to vector<2x16x128xf32>
    %c3_199 = arith.constant 3 : index
    %c0_200 = arith.constant 0 : index
    %c0_201 = arith.constant 0 : index
    %195 = vector.load %arg6[%c3_199, %c0_200, %c0_201] : memref<4x1x128xf32, #tpu.memory_space<vmem>>, vector<1x1x128xf32>
    %196 = vector.shape_cast %195 : vector<1x1x128xf32> to vector<1x128xf32>
    %197 = vector.shape_cast %196 : vector<1x128xf32> to vector<1x1x128xf32>
    %198 = vector.broadcast %197 : vector<1x1x128xf32> to vector<2x16x128xf32>
    %199 = arith.addf %194, %198 : vector<2x16x128xf32>
    %cst_202 = arith.constant 0.000000e+00 : f32
    %200 = vector.broadcast %cst_202 : f32 to vector<2x16x128xf32>
    %201 = arith.cmpf ogt, %199, %200 : vector<2x16x128xf32>
    %c3_203 = arith.constant 3 : index
    %c0_204 = arith.constant 0 : index
    %c0_205 = arith.constant 0 : index
    %202 = vector.load %arg7[%c3_203, %c0_204, %c0_205] : memref<4x1x128xf32, #tpu.memory_space<vmem>>, vector<1x1x128xf32>
    %203 = vector.shape_cast %202 : vector<1x1x128xf32> to vector<1x128xf32>
    %204 = vector.shape_cast %203 : vector<1x128xf32> to vector<1x1x128xf32>
    %205 = vector.broadcast %204 : vector<1x1x128xf32> to vector<2x16x128xf32>
    %206 = arith.mulf %205, %199 : vector<2x16x128xf32>
    %207 = arith.select %201, %199, %206 : vector<2x16x128xi1>, vector<2x16x128xf32>
    %208 = arith.addf %207, %162 : vector<2x16x128xf32>
    %c0_206 = arith.constant 0 : index
    %c8_207 = arith.constant 8 : index
    %c0_208 = arith.constant 0 : index
    %209 = vector.load %arg13[%c0_206, %c8_207, %c0_208] : memref<2x32x128xf32, #tpu.memory_space<vmem>>, vector<2x16x128xf32>
    tpu.vector_store %arg13[%c0_206, %c8_207, %c0_208], %208 {strides = array<i32>} : memref<2x32x128xf32, #tpu.memory_space<vmem>>, vector<2x16x128xf32>,
    %c0_209 = arith.constant 0 : index
    %c8_210 = arith.constant 8 : index
    %c0_211 = arith.constant 0 : index
    %210 = vector.load %arg13[%c0_209, %c8_210, %c0_211] : memref<2x32x128xf32, #tpu.memory_space<vmem>>, vector<2x16x128xf32>
    %211 = vector.shape_cast %210 : vector<2x16x128xf32> to vector<32x128xf32>
    %c0_212 = arith.constant 0 : index
    %c0_213 = arith.constant 0 : index
    %212 = vector.load %arg10[%c0_212, %c0_213] : memref<128x128xf32, #tpu.memory_space<vmem>>, vector<128x128xf32>
    %cst_214 = arith.constant dense<0.000000e+00> : vector<32x128xf32>
    %213 = tpu.matmul %211, %212, %cst_214 {dimension_numbers = #tpu.dot_dimension_numbers<[1], [0], [0], [1], [0, 0, 1, 1], [], []>} : vector<32x128xf32>, vector<128x128xf32>, vector<32x128xf32> -> vector<32x128xf32>
    %214 = vector.shape_cast %213 : vector<32x128xf32> to vector<2x16x128xf32>
    %c0_215 = arith.constant 0 : index
    %c0_216 = arith.constant 0 : index
    %215 = vector.load %arg11[%c0_215, %c0_216] : memref<1x128xf32, #tpu.memory_space<vmem>>, vector<1x128xf32>
    %216 = vector.shape_cast %215 : vector<1x128xf32> to vector<1x1x128xf32>
    %217 = vector.broadcast %216 : vector<1x1x128xf32> to vector<2x16x128xf32>
    %218 = arith.addf %214, %217 : vector<2x16x128xf32>
    %c0_217 = arith.constant 0 : index
    %c0_218 = arith.constant 0 : index
    %c0_219 = arith.constant 0 : index
    %219 = vector.load %arg12[%c0_217, %c0_218, %c0_219] : memref<2x16x128xf32, #tpu.memory_space<vmem>>, vector<2x16x128xf32>
    tpu.vector_store %arg12[%c0_217, %c0_218, %c0_219], %218 {strides = array<i32>} : memref<2x16x128xf32, #tpu.memory_space<vmem>>, vector<2x16x128xf32>,
    return
  }
  func.func @transform_0(%arg0: i32) -> (i32, i32, i32) {
    %c0_i32 = arith.constant 0 : i32
    %c0_i32_0 = arith.constant 0 : i32
    %c0_i32_1 = arith.constant 0 : i32
    return %arg0, %c0_i32, %c0_i32_0 : i32, i32, i32
  }
  func.func @transform_1(%arg0: i32) -> (i32, i32, i32) {
    %c0_i32 = arith.constant 0 : i32
    %c0_i32_0 = arith.constant 0 : i32
    %c0_i32_1 = arith.constant 0 : i32
    %c0_i32_2 = arith.constant 0 : i32
    return %c0_i32, %c0_i32_0, %c0_i32_1 : i32, i32, i32
  }
  func.func @transform_2(%arg0: i32) -> (i32, i32, i32) {
    %c0_i32 = arith.constant 0 : i32
    %c0_i32_0 = arith.constant 0 : i32
    %c0_i32_1 = arith.constant 0 : i32
    %c0_i32_2 = arith.constant 0 : i32
    return %c0_i32, %c0_i32_0, %c0_i32_1 : i32, i32, i32
  }
  func.func @transform_3(%arg0: i32) -> (i32, i32, i32) {
    %c0_i32 = arith.constant 0 : i32
    %c0_i32_0 = arith.constant 0 : i32
    %c0_i32_1 = arith.constant 0 : i32
    %c0_i32_2 = arith.constant 0 : i32
    return %c0_i32, %c0_i32_0, %c0_i32_1 : i32, i32, i32
  }
  func.func @transform_4(%arg0: i32) -> (i32, i32, i32) {
    %c0_i32 = arith.constant 0 : i32
    %c0_i32_0 = arith.constant 0 : i32
    %c0_i32_1 = arith.constant 0 : i32
    %c0_i32_2 = arith.constant 0 : i32
    return %c0_i32, %c0_i32_0, %c0_i32_1 : i32, i32, i32
  }
  func.func @transform_5(%arg0: i32) -> (i32, i32, i32) {
    %c0_i32 = arith.constant 0 : i32
    %c0_i32_0 = arith.constant 0 : i32
    %c0_i32_1 = arith.constant 0 : i32
    %c0_i32_2 = arith.constant 0 : i32
    return %c0_i32, %c0_i32_0, %c0_i32_1 : i32, i32, i32
  }
  func.func @transform_6(%arg0: i32) -> (i32, i32, i32) {
    %c0_i32 = arith.constant 0 : i32
    %c0_i32_0 = arith.constant 0 : i32
    %c0_i32_1 = arith.constant 0 : i32
    %c0_i32_2 = arith.constant 0 : i32
    return %c0_i32, %c0_i32_0, %c0_i32_1 : i32, i32, i32
  }
  func.func @transform_7(%arg0: i32) -> (i32, i32) {
    %c0_i32 = arith.constant 0 : i32
    %c0_i32_0 = arith.constant 0 : i32
    %c0_i32_1 = arith.constant 0 : i32
    return %c0_i32, %c0_i32_0 : i32, i32
  }
  func.func @transform_8(%arg0: i32) -> (i32, i32) {
    %c0_i32 = arith.constant 0 : i32
    %c0_i32_0 = arith.constant 0 : i32
    %c0_i32_1 = arith.constant 0 : i32
    return %c0_i32, %c0_i32_0 : i32, i32
  }
  func.func @transform_9(%arg0: i32) -> (i32, i32) {
    %c0_i32 = arith.constant 0 : i32
    %c0_i32_0 = arith.constant 0 : i32
    %c0_i32_1 = arith.constant 0 : i32
    return %c0_i32, %c0_i32_0 : i32, i32
  }
  func.func @transform_10(%arg0: i32) -> (i32, i32) {
    %c0_i32 = arith.constant 0 : i32
    %c0_i32_0 = arith.constant 0 : i32
    %c0_i32_1 = arith.constant 0 : i32
    return %c0_i32, %c0_i32_0 : i32, i32
  }
  func.func @transform_11(%arg0: i32) -> (i32, i32, i32) {
    %c0_i32 = arith.constant 0 : i32
    %c0_i32_0 = arith.constant 0 : i32
    %c0_i32_1 = arith.constant 0 : i32
    return %arg0, %c0_i32, %c0_i32_0 : i32, i32, i32
  }
}

</mosaic_0001>

<bundles_post_ra>
// kernel: tcn_forward.1
= control target key start
LH: loop header
LB: loop body
LE: loop exit
PB: predicated region body
PF: predicated region fallthrough
CT: control target
= control target key end

     0   :  { %v3680_v2 = vmov 0.0   ;;  %s5177_s7 = inlined_call_operand.vmem [shape: f32[128,128], index: 7, kind: input, shape index: {}]   ;;  %s5178_s1 = inlined_call_operand.vmem [shape: f32[4,384,128], index: 1, kind: input, shape index: {}]   ;;  %s5179_s0 = inlined_call_operand.vmem [shape: f32[2,16,128], index: 0, kind: input, shape index: {}]   ;;  %s5180_s4 = inlined_call_operand.vmem [shape: f32[4,384,128], index: 4, kind: input, shape index: {}]   ;;  %s5181_s2 = inlined_call_operand.vmem [shape: f32[4,1,128], index: 2, kind: input, shape index: {}]   ;;  %s5182_s3 = inlined_call_operand.vmem [shape: f32[4,1,128], index: 3, kind: input, shape index: {}]   ;;  %s5183_s5 = inlined_call_operand.vmem [shape: f32[4,1,128], index: 5, kind: input, shape index: {}]   ;;  %s5184_s6 = inlined_call_operand.vmem [shape: f32[4,1,128], index: 6, kind: input, shape index: {}]   ;;  %s5185_s8 = inlined_call_operand.vmem [shape: f32[1,128], index: 8, kind: input, shape index: {}]   ;;  %s5186_s9 = inlined_call_operand.vmem [shape: f32[128,128], index: 9, kind: input, shape index: {}]   ;;  %s5187_s10 = inlined_call_operand.vmem [shape: f32[1,128], index: 10, kind: input, shape index: {}]   ;;  %s5188_s11 = inlined_call_operand.vmem [shape: f32[2,16,128], index: 11, kind: output, shape index: {}]  }
   0x1   :  { %v73_v0 = vld [vmem:[%s5177_s7 + $0x78] sm:$0xff]  ;;  %v72_v1 = vld [vmem:[%s5177_s7 + $0x70] sm:$0xff]  ;;  %38 = vst [vmem:[#allocation2] sm:$0xff] %v3680_v2  ;;  %39 = vst [vmem:[#allocation2 + $0x20] sm:$0xff] %v3680_v2 }
   0x2   :  { %40 = vst [vmem:[#allocation2 + $0x18] sm:$0xff] %v3680_v2  ;;  %41 = vst [vmem:[#allocation2 + $0x38] sm:$0xff] %v3680_v2  ;;  %3298 = vmatprep.subr.mxu0 %v73_v0  ;;  %v71_v3 = vld [vmem:[%s5177_s7 + $0x68] sm:$0xff]  ;;  %v70_v4 = vld [vmem:[%s5177_s7 + $0x60] sm:$0xff] }
   0x3   :  { %42 = vst [vmem:[#allocation3] sm:$0xff] %v3680_v2  ;;  %43 = vst [vmem:[#allocation3 + $0x20] sm:$0xff] %v3680_v2  ;;  %3299 = vmatpush3.msra.mxu0 %v73_v0  ;;  %v201_v5 = vld [vmem:[%s5178_s1 + $0xf8] sm:$0xff]  ;;  %v200_v7 = vld [vmem:[%s5178_s1 + $0xf0] sm:$0xff] }
   0x4   :  { %44 = vst [vmem:[#allocation3 + $0x18] sm:$0xff] %v3680_v2  ;;  %45 = vst [vmem:[#allocation3 + $0x38] sm:$0xff] %v3680_v2  ;;  %3300 = vmatprep.subr.mxu0 %v72_v1  ;;  %v185_v6 = vld [vmem:[%s5178_s1 + $0x78] sm:$0xff]  ;;  %2766 = vmatprep.subr.mxu1 %v201_v5  ;;  %v184_v8 = vld [vmem:[%s5178_s1 + $0x70] sm:$0xff] }
   0x5   :  { %3301 = vmatpush3.msra.mxu0 %v72_v1  ;;  %v69_v9 = vld [vmem:[%s5177_s7 + $0x58] sm:$0xff]  ;;  %2767 = vmatpush3.msra.mxu1 %v185_v6  ;;  %v199_v10 = vld [vmem:[%s5178_s1 + $0xe8] sm:$0xff]  ;;  %v68_v12 = vld [vmem:[%s5177_s7 + $0x50] sm:$0xff] }
   0x6   :  { %3302 = vmatprep.subr.mxu0 %v71_v3  ;;  %2768 = vmatprep.subr.mxu1 %v200_v7  ;;  %v183_v11 = vld [vmem:[%s5178_s1 + $0x68] sm:$0xff]  ;;  %v198_v13 = vld [vmem:[%s5178_s1 + $0xe0] sm:$0xff]  ;;  %v197_v18 = vld [vmem:[%s5178_s1 + $0xd8] sm:$0xff] }
   0x7   :  { %3303 = vmatpush3.msra.mxu0 %v71_v3  ;;  %2769 = vmatpush3.msra.mxu1 %v184_v8  ;;  %v3783_v14 = vld [vmem:[%s5179_s0] sm:$0xff]  ;;  %v3792_v16 = vld [vmem:[%s5179_s0 + $0x8] sm:$0xff]  ;;  %v181_v20 = vld [vmem:[%s5178_s1 + $0x58] sm:$0xff] }
   0x8   :  { %3304 = vmatprep.subr.mxu0 %v70_v4  ;;  %2770 = vmatprep.subr.mxu1 %v199_v10  ;;  %v182_v15 = vld [vmem:[%s5178_s1 + $0x60] sm:$0xff]  ;;  %50 = vst [vmem:[#allocation2 + $0x8] sm:$0xff] %v3783_v14  ;;  %v67_v17 = vld [vmem:[%s5177_s7 + $0x48] sm:$0xff]  ;;  %51 = vst [vmem:[#allocation2 + $0x10] sm:$0xff] %v3792_v16 }
   0x9   :  { %3305 = vmatpush3.msra.mxu0 %v70_v4  ;;  %2771 = vmatpush3.msra.mxu1 %v183_v11  ;;  %v66_v19 = vld [vmem:[%s5177_s7 + $0x40] sm:$0xff]  ;;  %v196_v21 = vld [vmem:[%s5178_s1 + $0xd0] sm:$0xff]  ;;  %v65_v22 = vld [vmem:[%s5177_s7 + $0x38] sm:$0xff] }
   0xa   :  { %3306 = vmatprep.subr.mxu0 %v69_v9  ;;  %2772 = vmatprep.subr.mxu1 %v198_v13  ;;  %v180_v23 = vld [vmem:[%s5178_s1 + $0x50] sm:$0xff]  ;;  %v195_v24 = vld [vmem:[%s5178_s1 + $0xc8] sm:$0xff]  ;;  %v194_v27 = vld [vmem:[%s5178_s1 + $0xc0] sm:$0xff] }
   0xb   :  { %3307 = vmatpush3.msra.mxu0 %v69_v9  ;;  %2773 = vmatpush3.msra.mxu1 %v182_v15  ;;  %v64_v25 = vld [vmem:[%s5177_s7 + $0x30] sm:$0xff]  ;;  %v179_v26 = vld [vmem:[%s5178_s1 + $0x48] sm:$0xff]  ;;  %v178_v29 = vld [vmem:[%s5178_s1 + $0x40] sm:$0xff] }
   0xc   :  { %3308 = vmatprep.subr.mxu0 %v68_v12  ;;  %2774 = vmatprep.subr.mxu1 %v197_v18  ;;  %v63_v28 = vld [vmem:[%s5177_s7 + $0x28] sm:$0xff]  ;;  %v193_v30 = vld [vmem:[%s5178_s1 + $0xb8] sm:$0xff]  ;;  %v62_v31 = vld [vmem:[%s5177_s7 + $0x20] sm:$0xff] }
   0xd   :  { %3309 = vmatpush3.msra.mxu0 %v68_v12  ;;  %3330 = vmatprep.mubr.f32.mxu0 %v3783_v14  ;;  %v177_v32 = vld [vmem:[%s5178_s1 + $0x38] sm:$0xff]  ;;  %v192_v33 = vld [vmem:[%s5178_s1 + $0xb0] sm:$0xff]  ;;  %v191_v38 = vld [vmem:[%s5178_s1 + $0xa8] sm:$0xff] }
   0xe   :  { %3310 = vmatprep.subr.mxu0 %v67_v17  ;;  %2775 = vmatpush3.msra.mxu1 %v181_v20  ;;  %v3850_v34 = vld [vmem:[%s5179_s0 + $0x10] sm:$0xff]  ;;  %v3855_v35 = vld [vmem:[%s5179_s0 + $0x18] sm:$0xff]  ;;  %v175_v40 = vld [vmem:[%s5178_s1 + $0x28] sm:$0xff] }
   0xf   :  { %3311 = vmatpush3.msra.mxu0 %v67_v17  ;;  %2776 = vmatprep.subr.mxu1 %v196_v21  ;;  %v61_v36 = vld [vmem:[%s5177_s7 + $0x18] sm:$0xff]  ;;  %v176_v37 = vld [vmem:[%s5178_s1 + $0x30] sm:$0xff]  ;;  %52 = vst [vmem:[#allocation2 + $0x28] sm:$0xff] %v3850_v34  ;;  %53 = vst [vmem:[#allocation2 + $0x30] sm:$0xff] %v3855_v35 }
  0x10   :  { %3312 = vmatprep.subr.mxu0 %v66_v19  ;;  %2777 = vmatpush3.msra.mxu1 %v180_v23  ;;  %v60_v39 = vld [vmem:[%s5177_s7 + $0x10] sm:$0xff]  ;;  %v190_v41 = vld [vmem:[%s5178_s1 + $0xa0] sm:$0xff]  ;;  %v59_v42 = vld [vmem:[%s5177_s7 + $0x8] sm:$0xff] }
  0x11   :  { %3313 = vmatpush3.msra.mxu0 %v66_v19  ;;  %2778 = vmatprep.subr.mxu1 %v195_v24  ;;  %v174_v43 = vld [vmem:[%s5178_s1 + $0x20] sm:$0xff]  ;;  %v189_v44 = vld [vmem:[%s5178_s1 + $0x98] sm:$0xff]  ;;  %v188_v47 = vld [vmem:[%s5178_s1 + $0x90] sm:$0xff] }
  0x12   :  { %3314 = vmatprep.subr.mxu0 %v65_v22  ;;  %2779 = vmatpush3.msra.mxu1 %v179_v26  ;;  %v58_v45 = vld [vmem:[%s5177_s7] sm:$0xff]  ;;  %v173_v46 = vld [vmem:[%s5178_s1 + $0x18] sm:$0xff]  ;;  %v172_v49 = vld [vmem:[%s5178_s1 + $0x10] sm:$0xff] }
  0x13   :  { %3315 = vmatpush3.msra.mxu0 %v65_v22  ;;  %2780 = vmatprep.subr.mxu1 %v194_v27  ;;  %v217_v48 = vld [vmem:[%s5178_s1 + $0x178] sm:$0xff]  ;;  %v216_v50 = vld [vmem:[%s5178_s1 + $0x170] sm:$0xff]  ;;  %v187_v51 = vld [vmem:[%s5178_s1 + $0x88] sm:$0xff] }
  0x14   :  { %3316 = vmatprep.subr.mxu0 %v64_v25  ;;  %2781 = vmatpush3.msra.mxu1 %v178_v29  ;;  %v171_v52 = vld [vmem:[%s5178_s1 + $0x8] sm:$0xff]  ;;  %v186_v54 = vld [vmem:[%s5178_s1 + $0x80] sm:$0xff]  ;;  %v213_v58 = vld [vmem:[%s5178_s1 + $0x158] sm:$0xff] }
  0x15   :  { %3317 = vmatpush3.msra.mxu0 %v64_v25  ;;  %2782 = vmatprep.subr.mxu1 %v193_v30  ;;  %v215_v53 = vld [vmem:[%s5178_s1 + $0x168] sm:$0xff]  ;;  %v170_v55 = vld [vmem:[%s5178_s1] sm:$0xff]  ;;  %v212_v59 = vld [vmem:[%s5178_s1 + $0x150] sm:$0xff] }
  0x16   :  { %3318 = vmatprep.subr.mxu0 %v63_v28  ;;  %2783 = vmatpush3.msra.mxu1 %v177_v32  ;;  %v214_v56 = vld [vmem:[%s5178_s1 + $0x160] sm:$0xff]  ;;  %v219_v60 = vld [vmem:[#allocation2 + $0xf] sm:$0xff]  ;;  %v209_v1 = vld [vmem:[%s5178_s1 + $0x138] sm:$0xff] }
  0x17   :  { %3319 = vmatpush3.msra.mxu0 %v63_v28  ;;  %2784 = vmatprep.subr.mxu1 %v192_v33  ;;  %v218_v57 = vld [vmem:[#allocation2 + $0x7] sm:$0xff]  ;;  %v208_v2 = vld [vmem:[%s5178_s1 + $0x130] sm:$0xff]  ;;  %v205_v6 = vld [vmem:[%s5178_s1 + $0x118] sm:$0xff] }
  0x18   :  { %3320 = vmatprep.subr.mxu0 %v62_v31  ;;  %2785 = vmatpush3.msra.mxu1 %v176_v37  ;;  %v211_v61 = vld [vmem:[%s5178_s1 + $0x148] sm:$0xff]  ;;  %v210_v63 = vld [vmem:[%s5178_s1 + $0x140] sm:$0xff]  ;;  %v204_v7 = vld [vmem:[%s5178_s1 + $0x110] sm:$0xff] }
  0x19   :  { %3321 = vmatpush3.msra.mxu0 %v62_v31  ;;  %2786 = vmatprep.subr.mxu1 %v191_v38  ;;  %v222_v62 = vld [vmem:[#allocation2 + $0x9] sm:$0xff]  ;;  %v206_v5 = vld [vmem:[%s5178_s1 + $0x120] sm:$0xff]  ;;  %v223_v10 = vld [vmem:[#allocation2 + $0x11] sm:$0xff] }
  0x1a   :  { %3322 = vmatprep.subr.mxu0 %v61_v36  ;;  %2787 = vmatpush3.msra.mxu1 %v175_v40  ;;  %v220_v0 = vld [vmem:[#allocation2 + $0x27] sm:$0xff]  ;;  %v221_v3 = vld [vmem:[#allocation2 + $0x2f] sm:$0xff]  ;;  %v461_v13 = vld [vmem:[%s5180_s4 + $0xf8] sm:$0xff] }
  0x1b   :  { %3323 = vmatpush3.msra.mxu0 %v61_v36  ;;  %2788 = vmatprep.subr.mxu1 %v190_v41  ;;  %v207_v4 = vld [vmem:[%s5178_s1 + $0x128] sm:$0xff]  ;;  %v202_v9 = vld [vmem:[%s5178_s1 + $0x100] sm:$0xff]  ;;  %v225_v12 = vld [vmem:[#allocation2 + $0x31] sm:$0xff] }
  0x1c   :  { %3324 = vmatprep.subr.mxu0 %v60_v39  ;;  %2789 = vmatpush3.msra.mxu1 %v174_v43  ;;  %v203_v8 = vld [vmem:[%s5178_s1 + $0x108] sm:$0xff]  ;;  %v445_v15 = vld [vmem:[%s5180_s4 + $0x78] sm:$0xff]  ;;  %v476_v17 = vld [vmem:[%s5180_s4 + $0x170] sm:$0xff] }
  0x1d   :  { %3325 = vmatpush3.msra.mxu0 %v60_v39  ;;  %2790 = vmatprep.subr.mxu1 %v189_v44  ;;  %v224_v11 = vld [vmem:[#allocation2 + $0x29] sm:$0xff]  ;;  %v458_v22 = vld [vmem:[%s5180_s4 + $0xe0] sm:$0xff]  ;;  %v457_v25 = vld [vmem:[%s5180_s4 + $0xd8] sm:$0xff] }
  0x1e   :  { %3326 = vmatprep.subr.mxu0 %v59_v42  ;;  %2791 = vmatpush3.msra.mxu1 %v173_v46  ;;  %v444_v18 = vld [vmem:[%s5180_s4 + $0x70] sm:$0xff]  ;;  %v459_v19 = vld [vmem:[%s5180_s4 + $0xe8] sm:$0xff]  ;;  %v474_v23 = vld [vmem:[%s5180_s4 + $0x160] sm:$0xff] }
  0x1f   :  { %3327 = vmatpush3.msra.mxu0 %v59_v42  ;;  %2792 = vmatprep.subr.mxu1 %v188_v47  ;;  %v475_v20 = vld [vmem:[%s5180_s4 + $0x168] sm:$0xff]  ;;  %v442_v24 = vld [vmem:[%s5180_s4 + $0x60] sm:$0xff]  ;;  %v473_v26 = vld [vmem:[%s5180_s4 + $0x158] sm:$0xff] }
  0x20   :  { %3328 = vmatprep.subr.mxu0 %v58_v45  ;;  %2793 = vmatpush3.msra.mxu1 %v172_v49  ;;  %v443_v21 = vld [vmem:[%s5180_s4 + $0x68] sm:$0xff]  ;;  %v441_v27 = vld [vmem:[%s5180_s4 + $0x58] sm:$0xff]  ;;  %v456_v28 = vld [vmem:[%s5180_s4 + $0xd0] sm:$0xff] }
  0x21   :  { %3329 = vmatpush3.msra.mxu0 %v58_v45  ;;  %2794 = vmatprep.subr.mxu1 %v187_v51  ;;  %v472_v29 = vld [vmem:[%s5180_s4 + $0x150] sm:$0xff]  ;;  %v455_v31 = vld [vmem:[%s5180_s4 + $0xc8] sm:$0xff]  ;;  %v438_v36 = vld [vmem:[%s5180_s4 + $0x40] sm:$0xff] }
  0x22   :  { %3331 = vmatmul.mubr.f32.vlgmr.msra.gmra.mxu0 %v3792_v16  ;;  %3336 = vmatprep.subr.mxu0 %v217_v48  ;;  %v440_v30 = vld [vmem:[%s5180_s4 + $0x50] sm:$0xff]  ;;  %v471_v32 = vld [vmem:[%s5180_s4 + $0x148] sm:$0xff]  ;;  %v453_v37 = vld [vmem:[%s5180_s4 + $0xb8] sm:$0xff] }
  0x23   :  { %3337 = vmatpush3.msra.mxu0 %v217_v48  ;;  %2795 = vmatpush3.msra.mxu1 %v171_v52  ;;  %v439_v33 = vld [vmem:[%s5180_s4 + $0x48] sm:$0xff]  ;;  %v469_v38 = vld [vmem:[%s5180_s4 + $0x138] sm:$0xff]  ;;  %v452_v40 = vld [vmem:[%s5180_s4 + $0xb0] sm:$0xff] }
  0x24   :  { %3338 = vmatprep.subr.mxu0 %v216_v50  ;;  %2796 = vmatprep.subr.mxu1 %v186_v54  ;;  %v437_v39 = vld [vmem:[%s5180_s4 + $0x38] sm:$0xff]  ;;  %v468_v41 = vld [vmem:[%s5180_s4 + $0x130] sm:$0xff]  ;;  %v451_v43 = vld [vmem:[%s5180_s4 + $0xa8] sm:$0xff] }
  0x25   :  { %3339 = vmatpush3.msra.mxu0 %v216_v50  ;;  %2797 = vmatpush3.msra.mxu1 %v170_v55  ;;  %v436_v42 = vld [vmem:[%s5180_s4 + $0x30] sm:$0xff]  ;;  %v467_v44 = vld [vmem:[%s5180_s4 + $0x128] sm:$0xff]  ;;  %v450_v46 = vld [vmem:[%s5180_s4 + $0xa0] sm:$0xff] }
  0x26   :  { %3340 = vmatprep.subr.mxu0 %v215_v53  ;;  %290 = vmatprep.mubr.f32.mxu1 %v3783_v14  ;;  %v477_v14 = vld [vmem:[%s5180_s4 + $0x178] sm:$0xff]  ;;  %v435_v45 = vld [vmem:[%s5180_s4 + $0x28] sm:$0xff]  ;;  %v466_v47 = vld [vmem:[%s5180_s4 + $0x120] sm:$0xff] }
  0x27   :  { %3341 = vmatpush3.msra.mxu0 %v215_v53  ;;  %291 = vmatmul.mubr.f32.vlgmr.msra.gmra.mxu1 %v218_v57  ;;  %v434_v48 = vld [vmem:[%s5180_s4 + $0x20] sm:$0xff]  ;;  %v449_v49 = vld [vmem:[%s5180_s4 + $0x98] sm:$0xff]  ;;  %v448_v52 = vld [vmem:[%s5180_s4 + $0x90] sm:$0xff] }
  0x28   :  { %3342 = vmatprep.subr.mxu0 %v214_v56  ;;  %3333 = vmatprep.mubr.f32.mxu0 %v3850_v34  ;;  %v465_v50 = vld [vmem:[%s5180_s4 + $0x118] sm:$0xff]  ;;  %v464_v53 = vld [vmem:[%s5180_s4 + $0x110] sm:$0xff]  ;;  %v447_v55 = vld [vmem:[%s5180_s4 + $0x88] sm:$0xff] }
  0x29   :  { %3343 = vmatpush3.msra.mxu0 %v214_v56  ;;  %295 = vmatprep.mubr.f32.mxu1 %v3792_v16  ;;  %v460_v16 = vld [vmem:[%s5180_s4 + $0xf0] sm:$0xff]  ;;  %v433_v51 = vld [vmem:[%s5180_s4 + $0x18] sm:$0xff]  ;;  %v463_v56 = vld [vmem:[%s5180_s4 + $0x108] sm:$0xff] }
  0x2a   :  { %3344 = vmatprep.subr.mxu0 %v213_v58  ;;  %3334 = vmatmul.mubr.f32.gmra.mxu0 %v3855_v35  ;;  %v432_v54 = vld [vmem:[%s5180_s4 + $0x10] sm:$0xff]  ;;  %v431_v57 = vld [vmem:[%s5180_s4 + $0x8] sm:$0xff] }
  0x2b   :  { %3345 = vmatpush3.msra.mxu0 %v213_v58  ;;  %296 = vmatmul.mubr.f32.gmra.mxu1 %v219_v60  ;;  %v446_v58 = vld [vmem:[%s5180_s4 + $0x80] sm:$0xff] }
  0x2c   :  { %3346 = vmatprep.subr.mxu0 %v212_v59  ;;  %300 = vmatprep.mubr.f32.mxu1 %v3850_v34  ;;  %v454_v34 = vld [vmem:[%s5180_s4 + $0xc0] sm:$0xff] }
  0x2d   :  { %3347 = vmatpush3.msra.mxu0 %v212_v59  ;;  %3368 = vmatprep.mubr.f32.mxu0 %v222_v62  ;;  %v462_v59 = vld [vmem:[%s5180_s4 + $0x100] sm:$0xff]  ;;  %v2480_v62 = vld [vmem:[%s5178_s1 + $0x2f8] sm:$0xff] }
  0x2e   :  { %3348 = vmatprep.subr.mxu0 %v211_v61  ;;  %2830 = vmatprep.subr.mxu1 %v461_v13  ;;  %v430_v60 = vld [vmem:[%s5180_s4] sm:$0xff] }
  0x2f   :  { %3349 = vmatpush3.msra.mxu0 %v211_v61  ;;  %301 = vmatmul.mubr.f32.gmra.mxu1 %v220_v0  ;;  %v2464_v61 = vld [vmem:[%s5178_s1 + $0x278] sm:$0xff]  ;;  %v2429_v13 = vld [vmem:[%s5181_s2] ss:$0 sm:$0xff] }
  0x30   :  { %3350 = vmatprep.subr.mxu0 %v210_v63  ;;  %305 = vmatprep.mubr.f32.mxu1 %v3855_v35  ;;  %v470_v35 = vld [vmem:[%s5180_s4 + $0x140] sm:$0xff] }
  0x31   :  { %3351 = vmatpush3.msra.mxu0 %v210_v63  ;;  %2831 = vmatpush3.msra.mxu1 %v445_v15 }
  0x32   :  { %3352 = vmatprep.subr.mxu0 %v209_v1  ;;  %2832 = vmatprep.subr.mxu1 %v460_v16 }
  0x33   :  { %3353 = vmatpush3.msra.mxu0 %v209_v1  ;;  %306 = vmatmul.mubr.f32.gmra.mxu1 %v221_v3 }
  0x34   :  { %3354 = vmatprep.subr.mxu0 %v208_v2  ;;  %2833 = vmatpush3.msra.mxu1 %v444_v18 }
  0x35   :  { %3355 = vmatpush3.msra.mxu0 %v208_v2  ;;  %2834 = vmatprep.subr.mxu1 %v459_v19 }
  0x36   :  { %3356 = vmatprep.subr.mxu0 %v207_v4  ;;  %2835 = vmatpush3.msra.mxu1 %v443_v21 }
  0x37   :  { %3357 = vmatpush3.msra.mxu0 %v207_v4  ;;  %2836 = vmatprep.subr.mxu1 %v458_v22 }
  0x38   :  { %3358 = vmatprep.subr.mxu0 %v206_v5  ;;  %2837 = vmatpush3.msra.mxu1 %v442_v24 }
  0x39   :  { %3359 = vmatpush3.msra.mxu0 %v206_v5  ;;  %2838 = vmatprep.subr.mxu1 %v457_v25 }
  0x3a   :  { %3360 = vmatprep.subr.mxu0 %v205_v6  ;;  %2839 = vmatpush3.msra.mxu1 %v441_v27 }
  0x3b   :  { %3361 = vmatpush3.msra.mxu0 %v205_v6  ;;  %2840 = vmatprep.subr.mxu1 %v456_v28 }
  0x3c   :  { %3362 = vmatprep.subr.mxu0 %v204_v7  ;;  %2841 = vmatpush3.msra.mxu1 %v440_v30 }
  0x3d   :  { %3363 = vmatpush3.msra.mxu0 %v204_v7  ;;  %2842 = vmatprep.subr.mxu1 %v455_v31 }
  0x3e   :  { %3364 = vmatprep.subr.mxu0 %v203_v8  ;;  %2843 = vmatpush3.msra.mxu1 %v439_v33 }
  0x3f   :  { %3365 = vmatpush3.msra.mxu0 %v203_v8  ;;  %2844 = vmatprep.subr.mxu1 %v454_v34 }
  0x40   :  { %3366 = vmatprep.subr.mxu0 %v202_v9  ;;  %2845 = vmatpush3.msra.mxu1 %v438_v36 }
  0x41   :  { %3367 = vmatpush3.msra.mxu0 %v202_v9  ;;  %2846 = vmatprep.subr.mxu1 %v453_v37 }
  0x42   :  { %3369 = vmatmul.mubr.f32.vlgmr.msra.gmra.mxu0 %v223_v10  ;;  %3374 = vmatprep.subr.mxu0 %v477_v14 }
  0x43   :  { %3371 = vmatprep.mubr.f32.mxu0 %v224_v11  ;;  %3375 = vmatpush3.msra.mxu0 %v477_v14 }
  0x44   :  { %3376 = vmatprep.subr.mxu0 %v476_v17  ;;  %2847 = vmatpush3.msra.mxu1 %v437_v39  ;;  %v2448_v39 = vld [vmem:[%s5178_s1 + $0x1f8] sm:$0xff] }
  0x45   :  { %3377 = vmatpush3.msra.mxu0 %v476_v17  ;;  %2848 = vmatprep.subr.mxu1 %v452_v40  ;;  %v2430_v17 = vld [vmem:[%s5182_s3] ss:$0 sm:$0xff] }
  0x46   :  { %3372 = vmatmul.mubr.f32.gmra.mxu0 %v225_v12  ;;  %3378 = vmatprep.subr.mxu0 %v475_v20 }
  0x47   :  { %3379 = vmatpush3.msra.mxu0 %v475_v20  ;;  %2849 = vmatpush3.msra.mxu1 %v436_v42  ;;  %v2479_v42 = vld [vmem:[%s5178_s1 + $0x2f0] sm:$0xff] }
  0x48   :  { %3380 = vmatprep.subr.mxu0 %v474_v23  ;;  %2850 = vmatprep.subr.mxu1 %v451_v43 }
  0x49   :  { %3381 = vmatpush3.msra.mxu0 %v474_v23  ;;  %2851 = vmatpush3.msra.mxu1 %v435_v45  ;;  %v2447_v45 = vld [vmem:[%s5178_s1 + $0x1f0] sm:$0xff] }
  0x4a   :  { %3382 = vmatprep.subr.mxu0 %v473_v26  ;;  %2852 = vmatprep.subr.mxu1 %v450_v46 }
  0x4b   :  { %3383 = vmatpush3.msra.mxu0 %v473_v26  ;;  %2853 = vmatpush3.msra.mxu1 %v434_v48  ;;  %v2478_v48 = vld [vmem:[%s5178_s1 + $0x2e8] sm:$0xff] }
  0x4c   :  { %3384 = vmatprep.subr.mxu0 %v472_v29  ;;  %2854 = vmatprep.subr.mxu1 %v449_v49  ;;  %v2446_v49 = vld [vmem:[%s5178_s1 + $0x1e8] sm:$0xff] }
  0x4d   :  { %3385 = vmatpush3.msra.mxu0 %v472_v29  ;;  %2855 = vmatpush3.msra.mxu1 %v433_v51  ;;  %v2461_v51 = vld [vmem:[%s5178_s1 + $0x260] sm:$0xff] }
  0x4e   :  { %3386 = vmatprep.subr.mxu0 %v471_v32  ;;  %2856 = vmatprep.subr.mxu1 %v448_v52  ;;  %v2445_v52 = vld [vmem:[%s5178_s1 + $0x1e0] sm:$0xff] }
  0x4f   :  { %3387 = vmatpush3.msra.mxu0 %v471_v32  ;;  %2857 = vmatpush3.msra.mxu1 %v432_v54 }
  0x50   :  { %3388 = vmatprep.subr.mxu0 %v470_v35  ;;  %2858 = vmatprep.subr.mxu1 %v447_v55  ;;  %v2444_v55 = vld [vmem:[%s5178_s1 + $0x1d8] sm:$0xff] }
  0x51   :  { %3389 = vmatpush3.msra.mxu0 %v470_v35  ;;  %2859 = vmatpush3.msra.mxu1 %v431_v57  ;;  %v2477_v57 = vld [vmem:[%s5178_s1 + $0x2e0] sm:$0xff] }
  0x52   :  { %3390 = vmatprep.subr.mxu0 %v469_v38  ;;  %2860 = vmatprep.subr.mxu1 %v446_v58  ;;  %v2443_v58 = vld [vmem:[%s5178_s1 + $0x1d0] sm:$0xff] }
  0x53   :  { %3391 = vmatpush3.msra.mxu0 %v469_v38  ;;  %2861 = vmatpush3.msra.mxu1 %v430_v60  ;;  %v2476_v60 = vld [vmem:[%s5178_s1 + $0x2d8] sm:$0xff] }
  0x54   :  { %3392 = vmatprep.subr.mxu0 %v468_v41  ;;  %2894 = vmatprep.subr.mxu1 %v2464_v61  ;;  %v2442_v61 = vld [vmem:[%s5178_s1 + $0x1c8] sm:$0xff] }
  0x55   :  { %3393 = vmatpush3.msra.mxu0 %v468_v41  ;;  %v2463_v41 = vld [vmem:[%s5178_s1 + $0x270] sm:$0xff] }
  0x56   :  { %3394 = vmatprep.subr.mxu0 %v467_v44 }
  0x57   :  { %3395 = vmatpush3.msra.mxu0 %v467_v44 }
  0x58   :  { %3396 = vmatprep.subr.mxu0 %v466_v47 }
  0x59   :  { %3397 = vmatpush3.msra.mxu0 %v466_v47  ;;  %v2462_v47 = vld [vmem:[%s5178_s1 + $0x268] sm:$0xff] }
  0x5a   :  { %3398 = vmatprep.subr.mxu0 %v465_v50 }
  0x5b   :  { %3399 = vmatpush3.msra.mxu0 %v465_v50 }
  0x5c   :  { %3400 = vmatprep.subr.mxu0 %v464_v53 }
  0x5d   :  { %3401 = vmatpush3.msra.mxu0 %v464_v53  ;;  %v2460_v53 = vld [vmem:[%s5178_s1 + $0x258] sm:$0xff] }
  0x5e   :  { %3402 = vmatprep.subr.mxu0 %v463_v56 }
  0x5f   :  { %3403 = vmatpush3.msra.mxu0 %v463_v56  ;;  %v2459_v56 = vld [vmem:[%s5178_s1 + $0x250] sm:$0xff] }
  0x60   :  { %3404 = vmatprep.subr.mxu0 %v462_v59 }
  0x61   :  { %3405 = vmatpush3.msra.mxu0 %v462_v59  ;;  %v2458_v59 = vld [vmem:[%s5178_s1 + $0x248] sm:$0xff] }
  0x62   :  { %3412 = vmatprep.subr.mxu0 %v2480_v62 }
  0xe2   :  { %v4115_v4 = vpop.f32.mrf.mxu0 }
  0xe4   :  { %v4117_v6 = vpop.f32.mrf.mxu0 }
  0xe7   :  { %v2798_v63 = vpop.f32.mrf.mxu1 }
  0xe9   :  { %v2799_v0 = vpop.f32.mrf.mxu1 }
  0xea   :  { %v4119_v7 = vpop.f32.mrf.mxu0  ;;  %v2800_v14 = vadd.f32 %v2799_v0, %v2798_v63  ;;  %v2475_v63 = vld [vmem:[%s5178_s1 + $0x2d0] sm:$0xff]  ;;  %v2441_v0 = vld [vmem:[%s5178_s1 + $0x1c0] sm:$0xff] }
  0xeb   :  { %v2801_v1 = vpop.f32.mrf.mxu1 }
  0xec   :  { %v4121_v10 = vpop.f32.mrf.mxu0 }
  0xed   :  { %v2802_v2 = vpop.f32.mrf.mxu1 }
  0xee   :  { %v2803_v9 = vadd.f32 %v2802_v2, %v2801_v1  ;;  %v2456_v1 = vld [vmem:[%s5178_s1 + $0x238] sm:$0xff]  ;;  %v2474_v2 = vld [vmem:[%s5178_s1 + $0x2c8] sm:$0xff] }
  0xef   :  { %v2804_v3 = vpop.f32.mrf.mxu1 }
  0xf1   :  { %v2805_v5 = vpop.f32.mrf.mxu1 }
  0xf2   :  { %v2806_v21 = vadd.f32 %v2805_v5, %v2804_v3  ;;  %v2440_v3 = vld [vmem:[%s5178_s1 + $0x1b8] sm:$0xff]  ;;  %v2455_v5 = vld [vmem:[%s5178_s1 + $0x230] sm:$0xff] }
  0xf3   :  { %v2807_v8 = vpop.f32.mrf.mxu1 }
  0xf5   :  { %v2808_v11 = vpop.f32.mrf.mxu1 }
  0xf6   :  { %v2809_v16 = vadd.f32 %v2808_v11, %v2807_v8  ;;  %v2473_v8 = vld [vmem:[%s5178_s1 + $0x2c0] sm:$0xff]  ;;  %v2454_v11 = vld [vmem:[%s5178_s1 + $0x228] sm:$0xff] }
 0x102   :  { %v3370_v12 = vpop.f32.mrf.mxu0 }
 0x103   :  { %v383_v15 = vadd.f32 %v3370_v12, %v2803_v9  ;;  %v2439_v9 = vld [vmem:[%s5178_s1 + $0x1b0] sm:$0xff]  ;;  %v2472_v12 = vld [vmem:[%s5178_s1 + $0x2b8] sm:$0xff] }
 0x104   :  { %v377_v18 = vpop.f32.mrf.mxu0 }
 0x105   :  { %v404_v19 = vadd.f32 %v2429_v13, %v383_v15  ;;  %v378_v20 = vadd.f32 %v2800_v14, %v377_v18  ;;  %v2453_v14 = vld [vmem:[%s5178_s1 + $0x220] sm:$0xff]  ;;  %v2471_v15 = vld [vmem:[%s5178_s1 + $0x2b0] sm:$0xff]  ;;  %v2470_v18 = vld [vmem:[%s5178_s1 + $0x2a8] sm:$0xff] }
 0x106   :  { %v3373_v22 = vpop.f32.mrf.mxu0 }
 0x107   :  { %vm408_vm0 = vcmp.gt.f32.partialorder %v404_v19, 0.0  ;;  %v419_v23 = vmul.f32 %v2430_v17, %v404_v19  ;;  %v403_v24 = vadd.f32 %v2429_v13, %v378_v20  ;;  %v393_v25 = vadd.f32 %v3373_v22, %v2809_v16  ;;  %v2437_v16 = vld [vmem:[%s5178_s1 + $0x1a0] sm:$0xff]  ;;  %v2451_v20 = vld [vmem:[%s5178_s1 + $0x210] sm:$0xff] }
 0x108   :  { %v387_v26 = vpop.f32.mrf.mxu0  ;;  %v2435_v22 = vld [vmem:[%s5178_s1 + $0x190] sm:$0xff] }
 0x109   :  { %v423_v27 = vsel %vm408_vm0, %v404_v19, %v419_v23  ;;  %vm407_vm1 = vcmp.gt.f32.partialorder %v403_v24, 0.0  ;;  %v418_v28 = vmul.f32 %v2430_v17, %v403_v24  ;;  %v406_v29 = vadd.f32 %v2429_v13, %v393_v25  ;;  %v2436_v19 = vld [vmem:[%s5178_s1 + $0x198] sm:$0xff]  ;;  %v2450_v23 = vld [vmem:[%s5178_s1 + $0x208] sm:$0xff] }
 0x10a   :  { %427 = vst [vmem:[#allocation3 + $0x10] sm:$0xff] %v423_v27  ;;  %v388_v30 = vadd.f32 %v2806_v21, %v387_v26  ;;  %v2469_v21 = vld [vmem:[%s5178_s1 + $0x2a0] sm:$0xff]  ;;  %v2434_v25 = vld [vmem:[%s5178_s1 + $0x188] sm:$0xff] }
 0x10b   :  { %v422_v31 = vsel %vm407_vm1, %v403_v24, %v418_v28  ;;  %vm410_vm2 = vcmp.gt.f32.partialorder %v406_v29, 0.0  ;;  %v421_v32 = vmul.f32 %v2430_v17, %v406_v29  ;;  %v2468_v24 = vld [vmem:[%s5178_s1 + $0x298] sm:$0xff]  ;;  %v2449_v26 = vld [vmem:[%s5178_s1 + $0x200] sm:$0xff] }
 0x10c   :  { %426 = vst [vmem:[#allocation3 + $0x8] sm:$0xff] %v422_v31  ;;  %v405_v33 = vadd.f32 %v2429_v13, %v388_v30  ;;  %554 = vmatprep.mubr.f32.mxu1 %v422_v31  ;;  %v2438_v13 = vld [vmem:[%s5178_s1 + $0x1a8] sm:$0xff]  ;;  %v2433_v28 = vld [vmem:[%s5178_s1 + $0x180] sm:$0xff]  ;;  %v2516_v31 = vld [vmem:[%s5180_s4 + $0x278] sm:$0xff] }
 0x10d   :  { %v425_v34 = vsel %vm410_vm2, %v406_v29, %v421_v32  ;;  %v2466_v29 = vld [vmem:[%s5178_s1 + $0x288] sm:$0xff]  ;;  %v2465_v30 = vld [vmem:[%s5178_s1 + $0x280] sm:$0xff]  ;;  %v4273_v32 = vld [vmem:[%s5180_s4 + $0x2f8] sm:$0xff] }
 0x10e   :  { %429 = vst [vmem:[#allocation3 + $0x30] sm:$0xff] %v425_v34  ;;  %vm409_vm3 = vcmp.gt.f32.partialorder %v405_v33, 0.0  ;;  %v420_v35 = vmul.f32 %v2430_v17, %v405_v33  ;;  %v2452_v17 = vld [vmem:[%s5178_s1 + $0x218] sm:$0xff] }
 0x110   :  { %v424_v36 = vsel %vm409_vm3, %v405_v33, %v420_v35 }
 0x111   :  { %428 = vst [vmem:[#allocation3 + $0x28] sm:$0xff] %v424_v36  ;;  %v487_v40 = vld [vmem:[#allocation3 + $0x11] sm:$0xff] }
 0x113   :  { %v486_v37 = vld [vmem:[#allocation3 + $0x9] sm:$0xff] }
 0x114   :  { %v478_v38 = vld [vmem:[#allocation3 + $0x7] sm:$0xff]  ;;  %3406 = vmatprep.mubr.f32.mxu0 %v486_v37  ;;  %v479_v43 = vld [vmem:[#allocation3 + $0xf] sm:$0xff] }
 0x115   :  { %555 = vmatmul.mubr.f32.vlgmr.msra.gmra.mxu1 %v478_v38  ;;  %3407 = vmatmul.mubr.f32.vlgmr.msra.gmra.mxu0 %v487_v40  ;;  %v489_v44 = vld [vmem:[#allocation3 + $0x31] sm:$0xff]  ;;  %v2431_v38 = vld [vmem:[%s5183_s5] ss:$0 sm:$0xff] }
 0x116   :  { %559 = vmatprep.mubr.f32.mxu1 %v423_v27  ;;  %2895 = vmatpush3.msra.mxu1 %v2448_v39  ;;  %v2467_v27 = vld [vmem:[%s5178_s1 + $0x290] sm:$0xff] }
 0x117   :  { %3413 = vmatpush3.msra.mxu0 %v2480_v62  ;;  %2896 = vmatprep.subr.mxu1 %v2463_v41  ;;  %v2457_v62 = vld [vmem:[%s5178_s1 + $0x240] sm:$0xff] }
 0x118   :  { %3414 = vmatprep.subr.mxu0 %v2479_v42  ;;  %v488_v46 = vld [vmem:[#allocation3 + $0x29] sm:$0xff]  ;;  %2897 = vmatpush3.msra.mxu1 %v2447_v45  ;;  %v2432_v41 = vld [vmem:[%s5184_s6] ss:$0 sm:$0xff] }
 0x119   :  { %560 = vmatmul.mubr.f32.gmra.mxu1 %v479_v43  ;;  %3415 = vmatpush3.msra.mxu0 %v2479_v42  ;;  %v480_v50 = vld [vmem:[#allocation3 + $0x27] sm:$0xff]  ;;  %v481_v54 = vld [vmem:[#allocation3 + $0x2f] sm:$0xff]  ;;  %v2428_v43 = vld [vmem:[%s5185_s8] ss:$0 sm:$0xff] }
 0x11a   :  { %3409 = vmatprep.mubr.f32.mxu0 %v488_v46  ;;  %564 = vmatprep.mubr.f32.mxu1 %v424_v36 }
 0x11b   :  { %3410 = vmatmul.mubr.f32.gmra.mxu0 %v489_v44  ;;  %2898 = vmatprep.subr.mxu1 %v2462_v47 }
 0x11c   :  { %3416 = vmatprep.subr.mxu0 %v2478_v48  ;;  %2899 = vmatpush3.msra.mxu1 %v2446_v49 }
 0x11d   :  { %565 = vmatmul.mubr.f32.gmra.mxu1 %v480_v50  ;;  %3417 = vmatpush3.msra.mxu0 %v2478_v48  ;;  %v166_v50 = vadd.f32 %v2428_v43, %v4117_v6 }
 0x11e   :  { %569 = vmatprep.mubr.f32.mxu1 %v425_v34  ;;  %2900 = vmatprep.subr.mxu1 %v2461_v51 }
 0x11f   :  { %2901 = vmatpush3.msra.mxu1 %v2445_v52  ;;  %3418 = vmatprep.subr.mxu0 %v2477_v57 }
 0x120   :  { %2902 = vmatprep.subr.mxu1 %v2460_v53  ;;  %3419 = vmatpush3.msra.mxu0 %v2477_v57 }
 0x121   :  { %570 = vmatmul.mubr.f32.gmra.mxu1 %v481_v54  ;;  %3420 = vmatprep.subr.mxu0 %v2476_v60 }
 0x122   :  { %2903 = vmatpush3.msra.mxu1 %v2444_v55  ;;  %3421 = vmatpush3.msra.mxu0 %v2476_v60  ;;  %v167_v60 = vadd.f32 %v4115_v4, %v2428_v43 }
 0x123   :  { %2904 = vmatprep.subr.mxu1 %v2459_v56  ;;  %3422 = vmatprep.subr.mxu0 %v2475_v63 }
 0x124   :  { %2905 = vmatpush3.msra.mxu1 %v2443_v58  ;;  %3423 = vmatpush3.msra.mxu0 %v2475_v63 }
 0x125   :  { %2906 = vmatprep.subr.mxu1 %v2458_v59  ;;  %3424 = vmatprep.subr.mxu0 %v2474_v2 }
 0x126   :  { %2907 = vmatpush3.msra.mxu1 %v2442_v61  ;;  %3425 = vmatpush3.msra.mxu0 %v2474_v2 }
 0x127   :  { %2908 = vmatprep.subr.mxu1 %v2457_v62  ;;  %3426 = vmatprep.subr.mxu0 %v2473_v8 }
 0x128   :  { %2909 = vmatpush3.msra.mxu1 %v2441_v0  ;;  %3427 = vmatpush3.msra.mxu0 %v2473_v8 }
 0x129   :  { %2910 = vmatprep.subr.mxu1 %v2456_v1  ;;  %3428 = vmatprep.subr.mxu0 %v2472_v12 }
 0x12a   :  { %2911 = vmatpush3.msra.mxu1 %v2440_v3  ;;  %3429 = vmatpush3.msra.mxu0 %v2472_v12  ;;  %v168_v3 = vadd.f32 %v2428_v43, %v4121_v10  ;;  %v2499_v10 = vld [vmem:[%s5180_s4 + $0x1f0] sm:$0xff] }
 0x12b   :  { %2912 = vmatprep.subr.mxu1 %v2455_v5  ;;  %3430 = vmatprep.subr.mxu0 %v2471_v15 }
 0x12c   :  { %2913 = vmatpush3.msra.mxu1 %v2439_v9  ;;  %3431 = vmatpush3.msra.mxu0 %v2471_v15  ;;  %v2500_v9 = vld [vmem:[%s5180_s4 + $0x1f8] sm:$0xff] }
 0x12d   :  { %2914 = vmatprep.subr.mxu1 %v2454_v11  ;;  %3432 = vmatprep.subr.mxu0 %v2470_v18 }
 0x12e   :  { %2915 = vmatpush3.msra.mxu1 %v2438_v13  ;;  %3433 = vmatpush3.msra.mxu0 %v2470_v18  ;;  %v2515_v13 = vld [vmem:[%s5180_s4 + $0x270] sm:$0xff] }
 0x12f   :  { %2916 = vmatprep.subr.mxu1 %v2453_v14  ;;  %3434 = vmatprep.subr.mxu0 %v2469_v21  ;;  %v169_v14 = vadd.f32 %v4119_v7, %v2428_v43  ;;  %v2492_v43 = vld [vmem:[%s5180_s4 + $0x1b8] sm:$0xff] }
 0x130   :  { %2917 = vmatpush3.msra.mxu1 %v2437_v16  ;;  %3435 = vmatpush3.msra.mxu0 %v2469_v21  ;;  %v2498_v21 = vld [vmem:[%s5180_s4 + $0x1e8] sm:$0xff] }
 0x131   :  { %2918 = vmatprep.subr.mxu1 %v2452_v17  ;;  %3436 = vmatprep.subr.mxu0 %v2468_v24  ;;  %v2514_v17 = vld [vmem:[%s5180_s4 + $0x268] sm:$0xff] }
 0x132   :  { %2919 = vmatpush3.msra.mxu1 %v2436_v19  ;;  %3437 = vmatpush3.msra.mxu0 %v2468_v24  ;;  %v2530_v24 = vld [vmem:[%s5180_s4 + $0x2e8] sm:$0xff] }
 0x133   :  { %2920 = vmatprep.subr.mxu1 %v2451_v20  ;;  %3438 = vmatprep.subr.mxu0 %v2467_v27  ;;  %v2531_v20 = vld [vmem:[%s5180_s4 + $0x2f0] sm:$0xff] }
 0x134   :  { %2921 = vmatpush3.msra.mxu1 %v2435_v22  ;;  %3439 = vmatpush3.msra.mxu0 %v2467_v27  ;;  %v2513_v22 = vld [vmem:[%s5180_s4 + $0x260] sm:$0xff] }
 0x135   :  { %2922 = vmatprep.subr.mxu1 %v2450_v23  ;;  %3440 = vmatprep.subr.mxu0 %v2466_v29  ;;  %v2529_v27 = vld [vmem:[%s5180_s4 + $0x2e0] sm:$0xff] }
 0x136   :  { %2923 = vmatpush3.msra.mxu1 %v2434_v25  ;;  %3441 = vmatpush3.msra.mxu0 %v2466_v29  ;;  %v2497_v25 = vld [vmem:[%s5180_s4 + $0x1e0] sm:$0xff] }
 0x137   :  { %2924 = vmatprep.subr.mxu1 %v2449_v26  ;;  %3442 = vmatprep.subr.mxu0 %v2465_v30  ;;  %v2512_v26 = vld [vmem:[%s5180_s4 + $0x258] sm:$0xff] }
 0x138   :  { %2925 = vmatpush3.msra.mxu1 %v2433_v28  ;;  %3443 = vmatpush3.msra.mxu0 %v2465_v30 }
 0x139   :  { %2958 = vmatprep.subr.mxu1 %v2516_v31  ;;  %3450 = vmatprep.subr.mxu0 %v4273_v32  ;;  %v2496_v31 = vld [vmem:[%s5180_s4 + $0x1d8] sm:$0xff] }
 0x1d5   :  { %v2862_v33 = vpop.f32.mrf.mxu1  ;;  %v3408_v34 = vpop.f32.mrf.mxu0 }
 0x1d7   :  { %v2863_v35 = vpop.f32.mrf.mxu1  ;;  %v641_v37 = vpop.f32.mrf.mxu0 }
 0x1d8   :  { %v2864_v36 = vadd.f32 %v2863_v35, %v2862_v33  ;;  %v2528_v33 = vld [vmem:[%s5180_s4 + $0x2d8] sm:$0xff]  ;;  %v2510_v35 = vld [vmem:[%s5180_s4 + $0x248] sm:$0xff] }
 0x1d9   :  { %v2865_v39 = vpop.f32.mrf.mxu1 }
 0x1da   :  { %v642_v40 = vadd.f32 %v2864_v36, %v641_v37  ;;  %v2527_v36 = vld [vmem:[%s5180_s4 + $0x2d0] sm:$0xff]  ;;  %v2494_v37 = vld [vmem:[%s5180_s4 + $0x1c8] sm:$0xff] }
 0x1db   :  { %v2866_v42 = vpop.f32.mrf.mxu1  ;;  %v3411_v46 = vpop.f32.mrf.mxu0 }
 0x1dc   :  { %v667_v44 = vadd.f32 %v2431_v38, %v642_v40  ;;  %v2867_v45 = vadd.f32 %v2866_v42, %v2865_v39  ;;  %v2526_v39 = vld [vmem:[%s5180_s4 + $0x2c8] sm:$0xff]  ;;  %v2493_v40 = vld [vmem:[%s5180_s4 + $0x1c0] sm:$0xff] }
 0x1dd   :  { %v2868_v47 = vpop.f32.mrf.mxu1  ;;  %v651_v56 = vpop.f32.mrf.mxu0  ;;  %v2525_v42 = vld [vmem:[%s5180_s4 + $0x2c0] sm:$0xff] }
 0x1de   :  { %vm671_vm4 = vcmp.gt.f32.partialorder %v667_v44, 0.0  ;;  %v682_v48 = vmul.f32 %v2432_v41, %v667_v44  ;;  %v647_v49 = vadd.f32 %v3408_v34, %v2867_v45  ;;  %v2495_v34 = vld [vmem:[%s5180_s4 + $0x1d0] sm:$0xff]  ;;  %v2524_v45 = vld [vmem:[%s5180_s4 + $0x2b8] sm:$0xff] }
 0x1df   :  { %v2869_v51 = vpop.f32.mrf.mxu1 }
 0x1e0   :  { %v686_v52 = vsel %vm671_vm4, %v667_v44, %v682_v48  ;;  %v668_v53 = vadd.f32 %v2431_v38, %v647_v49  ;;  %v2870_v54 = vadd.f32 %v2869_v51, %v2868_v47  ;;  %v2507_v44 = vld [vmem:[%s5180_s4 + $0x230] sm:$0xff]  ;;  %v2506_v47 = vld [vmem:[%s5180_s4 + $0x228] sm:$0xff] }
 0x1e1   :  { %v4286_v55 = vadd.f32 %v686_v52, %v166_v50  ;;  %v2871_v57 = vpop.f32.mrf.mxu1  ;;  %v2523_v48 = vld [vmem:[%s5180_s4 + $0x2b0] sm:$0xff]  ;;  %v2490_v49 = vld [vmem:[%s5180_s4 + $0x1a8] sm:$0xff]  ;;  %v2505_v50 = vld [vmem:[%s5180_s4 + $0x220] sm:$0xff] }
 0x1e2   :  { %vm672_vm5 = vcmp.gt.f32.partialorder %v668_v53, 0.0  ;;  %v683_v58 = vmul.f32 %v2432_v41, %v668_v53  ;;  %v652_v59 = vadd.f32 %v2870_v54, %v651_v56  ;;  %v2522_v51 = vld [vmem:[%s5180_s4 + $0x2a8] sm:$0xff]  ;;  %v2489_v52 = vld [vmem:[%s5180_s4 + $0x1a0] sm:$0xff]  ;;  %v2488_v56 = vld [vmem:[%s5180_s4 + $0x198] sm:$0xff] }
 0x1e3   :  { %694 = vst [vmem:[#allocation2 + $0x8] sm:$0xff] %v4286_v55  ;;  %v2872_v61 = vpop.f32.mrf.mxu1  ;;  %823 = vmatprep.mubr.f32.mxu1 %v4286_v55  ;;  %v2521_v54 = vld [vmem:[%s5180_s4 + $0x2a0] sm:$0xff] }
 0x1e4   :  { %v687_v62 = vsel %vm672_vm5, %v668_v53, %v683_v58  ;;  %v669_v6 = vadd.f32 %v2431_v38, %v652_v59  ;;  %v2873_v63 = vadd.f32 %v2872_v61, %v2871_v57  ;;  %v2504_v53 = vld [vmem:[%s5180_s4 + $0x218] sm:$0xff]  ;;  %v2503_v57 = vld [vmem:[%s5180_s4 + $0x210] sm:$0xff] }
 0x1e5   :  { %v4291_v0 = vadd.f32 %v687_v62, %v167_v60  ;;  %v2520_v58 = vld [vmem:[%s5180_s4 + $0x298] sm:$0xff]  ;;  %v2487_v59 = vld [vmem:[%s5180_s4 + $0x190] sm:$0xff]  ;;  %v2502_v60 = vld [vmem:[%s5180_s4 + $0x208] sm:$0xff] }
 0x1e6   :  { %vm673_vm6 = vcmp.gt.f32.partialorder %v669_v6, 0.0  ;;  %v684_v1 = vmul.f32 %v2432_v41, %v669_v6  ;;  %v657_v2 = vadd.f32 %v3411_v46, %v2873_v63  ;;  %v2491_v46 = vld [vmem:[%s5180_s4 + $0x1b0] sm:$0xff]  ;;  %v2486_v62 = vld [vmem:[%s5180_s4 + $0x188] sm:$0xff] }
 0x1e7   :  { %695 = vst [vmem:[#allocation2 + $0x10] sm:$0xff] %v4291_v0  ;;  %v2519_v61 = vld [vmem:[%s5180_s4 + $0x290] sm:$0xff]  ;;  %v2518_v63 = vld [vmem:[%s5180_s4 + $0x288] sm:$0xff] }
 0x1e8   :  { %v688_v5 = vsel %vm673_vm6, %v669_v6, %v684_v1  ;;  %v670_v8 = vadd.f32 %v2431_v38, %v657_v2  ;;  %v2509_v38 = vld [vmem:[%s5180_s4 + $0x240] sm:$0xff] }
 0x1e9   :  { %v4295_v4 = vadd.f32 %v688_v5, %v168_v3  ;;  %v2501_v6 = vld [vmem:[%s5180_s4 + $0x200] sm:$0xff]  ;;  %v2568_v3 = vld [vmem:[%s5178_s1 + $0x3f8] sm:$0xff] }
 0x1ea   :  { %vm674_vm7 = vcmp.gt.f32.partialorder %v670_v8, 0.0  ;;  %v685_v11 = vmul.f32 %v2432_v41, %v670_v8  ;;  %v751_v12 = vld [vmem:[#allocation2 + $0x6] sm:$0xff]  ;;  %v2508_v41 = vld [vmem:[%s5180_s4 + $0x238] sm:$0xff] }
 0x1eb   :  { %696 = vst [vmem:[#allocation2 + $0x28] sm:$0xff] %v4295_v4  ;;  %824 = vmatmul.mubr.f32.vlgmr.msra.gmra.mxu1 %v751_v12  ;;  %v2485_v1 = vld [vmem:[%s5180_s4 + $0x180] sm:$0xff]  ;;  %v2584_v5 = vld [vmem:[%s5178_s1 + $0x478] sm:$0xff] }
 0x1ec   :  { %v689_v15 = vsel %vm674_vm7, %v670_v8, %v685_v11  ;;  %828 = vmatprep.mubr.f32.mxu1 %v4291_v0  ;;  %2959 = vmatpush3.msra.mxu1 %v2500_v9  ;;  %v2517_v2 = vld [vmem:[%s5180_s4 + $0x280] sm:$0xff] }
 0x1ed   :  { %v4309_v16 = vadd.f32 %v689_v15, %v169_v14  ;;  %2960 = vmatprep.subr.mxu1 %v2515_v13  ;;  %v2482_v15 = vld [vmem:[%s5181_s2 + $0x1] ss:$0 sm:$0xff] }
 0x1ee   :  { %v755_v18 = vld [vmem:[#allocation2 + $0xa] sm:$0xff]  ;;  %v756_v19 = vld [vmem:[#allocation2 + $0x12] sm:$0xff]  ;;  %2961 = vmatpush3.msra.mxu1 %v2499_v10 }
 0x1ef   :  { %v752_v7 = vld [vmem:[#allocation2 + $0xe] sm:$0xff]  ;;  %697 = vst [vmem:[#allocation2 + $0x30] sm:$0xff] %v4309_v16  ;;  %3444 = vmatprep.mubr.f32.mxu0 %v755_v18  ;;  %2962 = vmatprep.subr.mxu1 %v2514_v17 }
 0x1f0   :  { %829 = vmatmul.mubr.f32.gmra.mxu1 %v752_v7  ;;  %3445 = vmatmul.mubr.f32.vlgmr.msra.gmra.mxu0 %v756_v19 }
 0x1f1   :  { %833 = vmatprep.mubr.f32.mxu1 %v4295_v4  ;;  %3451 = vmatpush3.msra.mxu0 %v4273_v32  ;;  %v2511_v32 = vld [vmem:[%s5180_s4 + $0x250] sm:$0xff] }
 0x1f2   :  { %v753_v23 = vld [vmem:[#allocation2 + $0x26] sm:$0xff]  ;;  %3452 = vmatprep.subr.mxu0 %v2531_v20  ;;  %2963 = vmatpush3.msra.mxu1 %v2498_v21 }
 0x1f3   :  { %3453 = vmatpush3.msra.mxu0 %v2531_v20  ;;  %2964 = vmatprep.subr.mxu1 %v2513_v22  ;;  %v2484_v20 = vld [vmem:[%s5182_s3 + $0x1] ss:$0 sm:$0xff] }
 0x1f4   :  { %834 = vmatmul.mubr.f32.gmra.mxu1 %v753_v23  ;;  %3454 = vmatprep.subr.mxu0 %v2530_v24 }
 0x1f5   :  { %838 = vmatprep.mubr.f32.mxu1 %v4309_v16  ;;  %2965 = vmatpush3.msra.mxu1 %v2497_v25 }
 0x1f6   :  { %v757_v28 = vld [vmem:[#allocation2 + $0x2a] sm:$0xff]  ;;  %v758_v30 = vld [vmem:[#allocation2 + $0x32] sm:$0xff]  ;;  %3455 = vmatpush3.msra.mxu0 %v2530_v24  ;;  %2966 = vmatprep.subr.mxu1 %v2512_v26 }
 0x1f7   :  { %v754_v29 = vld [vmem:[#allocation2 + $0x2e] sm:$0xff]  ;;  %3447 = vmatprep.mubr.f32.mxu0 %v757_v28  ;;  %3456 = vmatprep.subr.mxu0 %v2529_v27 }
 0x1f8   :  { %839 = vmatmul.mubr.f32.gmra.mxu1 %v754_v29  ;;  %3448 = vmatmul.mubr.f32.gmra.mxu0 %v758_v30 }
 0x1f9   :  { %3457 = vmatpush3.msra.mxu0 %v2529_v27  ;;  %2967 = vmatpush3.msra.mxu1 %v2496_v31 }
 0x1fa   :  { %3458 = vmatprep.subr.mxu0 %v2528_v33  ;;  %2968 = vmatprep.subr.mxu1 %v2511_v32 }
 0x1fb   :  { %3459 = vmatpush3.msra.mxu0 %v2528_v33  ;;  %2969 = vmatpush3.msra.mxu1 %v2495_v34 }
 0x1fc   :  { %2970 = vmatprep.subr.mxu1 %v2510_v35  ;;  %3460 = vmatprep.subr.mxu0 %v2527_v36 }
 0x1fd   :  { %2971 = vmatpush3.msra.mxu1 %v2494_v37  ;;  %3461 = vmatpush3.msra.mxu0 %v2527_v36 }
 0x1fe   :  { %2972 = vmatprep.subr.mxu1 %v2509_v38  ;;  %3462 = vmatprep.subr.mxu0 %v2526_v39 }
 0x1ff   :  { %2973 = vmatpush3.msra.mxu1 %v2493_v40  ;;  %3463 = vmatpush3.msra.mxu0 %v2526_v39 }
 0x200   :  { %2974 = vmatprep.subr.mxu1 %v2508_v41  ;;  %3464 = vmatprep.subr.mxu0 %v2525_v42 }
 0x201   :  { %2975 = vmatpush3.msra.mxu1 %v2492_v43  ;;  %3465 = vmatpush3.msra.mxu0 %v2525_v42  ;;  %v2552_v42 = vld [vmem:[%s5178_s1 + $0x378] sm:$0xff] }
 0x202   :  { %2976 = vmatprep.subr.mxu1 %v2507_v44  ;;  %3466 = vmatprep.subr.mxu0 %v2524_v45 }
 0x203   :  { %2977 = vmatpush3.msra.mxu1 %v2491_v46  ;;  %3467 = vmatpush3.msra.mxu0 %v2524_v45  ;;  %v2567_v46 = vld [vmem:[%s5178_s1 + $0x3f0] sm:$0xff] }
 0x204   :  { %2978 = vmatprep.subr.mxu1 %v2506_v47  ;;  %3468 = vmatprep.subr.mxu0 %v2523_v48  ;;  %v2583_v47 = vld [vmem:[%s5178_s1 + $0x470] sm:$0xff] }
 0x205   :  { %2979 = vmatpush3.msra.mxu1 %v2490_v49  ;;  %3469 = vmatpush3.msra.mxu0 %v2523_v48  ;;  %v2551_v48 = vld [vmem:[%s5178_s1 + $0x370] sm:$0xff] }
 0x206   :  { %2980 = vmatprep.subr.mxu1 %v2505_v50  ;;  %3470 = vmatprep.subr.mxu0 %v2522_v51  ;;  %v2566_v50 = vld [vmem:[%s5178_s1 + $0x3e8] sm:$0xff] }
 0x207   :  { %2981 = vmatpush3.msra.mxu1 %v2489_v52  ;;  %3471 = vmatpush3.msra.mxu0 %v2522_v51  ;;  %v2550_v51 = vld [vmem:[%s5178_s1 + $0x368] sm:$0xff] }
 0x208   :  { %2982 = vmatprep.subr.mxu1 %v2504_v53  ;;  %3472 = vmatprep.subr.mxu0 %v2521_v54  ;;  %v2582_v52 = vld [vmem:[%s5178_s1 + $0x468] sm:$0xff]  ;;  %v2565_v53 = vld [vmem:[%s5178_s1 + $0x3e0] sm:$0xff] }
 0x209   :  { %2983 = vmatpush3.msra.mxu1 %v2488_v56  ;;  %3473 = vmatpush3.msra.mxu0 %v2521_v54  ;;  %v2549_v56 = vld [vmem:[%s5178_s1 + $0x360] sm:$0xff] }
 0x20a   :  { %2984 = vmatprep.subr.mxu1 %v2503_v57  ;;  %3474 = vmatprep.subr.mxu0 %v2520_v58 }
 0x20b   :  { %2985 = vmatpush3.msra.mxu1 %v2487_v59  ;;  %3475 = vmatpush3.msra.mxu0 %v2520_v58  ;;  %v2564_v59 = vld [vmem:[%s5178_s1 + $0x3d8] sm:$0xff] }
 0x20c   :  { %2986 = vmatprep.subr.mxu1 %v2502_v60  ;;  %3476 = vmatprep.subr.mxu0 %v2519_v61 }
 0x20d   :  { %2987 = vmatpush3.msra.mxu1 %v2486_v62  ;;  %3477 = vmatpush3.msra.mxu0 %v2519_v61  ;;  %v2548_v61 = vld [vmem:[%s5178_s1 + $0x358] sm:$0xff]  ;;  %v2563_v62 = vld [vmem:[%s5178_s1 + $0x3d0] sm:$0xff] }
 0x20e   :  { %2988 = vmatprep.subr.mxu1 %v2501_v6  ;;  %3478 = vmatprep.subr.mxu0 %v2518_v63  ;;  %v2581_v6 = vld [vmem:[%s5178_s1 + $0x460] sm:$0xff] }
 0x20f   :  { %2989 = vmatpush3.msra.mxu1 %v2485_v1  ;;  %3479 = vmatpush3.msra.mxu0 %v2518_v63  ;;  %v2547_v63 = vld [vmem:[%s5178_s1 + $0x350] sm:$0xff]  ;;  %v2562_v1 = vld [vmem:[%s5178_s1 + $0x3c8] sm:$0xff] }
 0x210   :  { %3480 = vmatprep.subr.mxu0 %v2517_v2  ;;  %3022 = vmatprep.subr.mxu1 %v2568_v3  ;;  %v2546_v3 = vld [vmem:[%s5178_s1 + $0x348] sm:$0xff] }
 0x211   :  { %3481 = vmatpush3.msra.mxu0 %v2517_v2  ;;  %v2580_v2 = vld [vmem:[%s5178_s1 + $0x458] sm:$0xff] }
 0x212   :  { %3488 = vmatprep.subr.mxu0 %v2584_v5 }
 0x2ab   :  { %v2926_v8 = vpop.f32.mrf.mxu1 }
 0x2ad   :  { %v2927_v9 = vpop.f32.mrf.mxu1 }
 0x2ae   :  { %v2928_v13 = vadd.f32 %v2927_v9, %v2926_v8  ;;  %v2579_v8 = vld [vmem:[%s5178_s1 + $0x450] sm:$0xff]  ;;  %v2545_v9 = vld [vmem:[%s5178_s1 + $0x340] sm:$0xff] }
 0x2b0   :  { %v2929_v11 = vpop.f32.mrf.mxu1  ;;  %v3446_v12 = vpop.f32.mrf.mxu0 }
 0x2b2   :  { %v2930_v14 = vpop.f32.mrf.mxu1  ;;  %v910_v17 = vpop.f32.mrf.mxu0 }
 0x2b3   :  { %v2931_v10 = vadd.f32 %v2930_v14, %v2929_v11  ;;  %v911_v18 = vadd.f32 %v2928_v13, %v910_v17  ;;  %v2560_v11 = vld [vmem:[%s5178_s1 + $0x3b8] sm:$0xff]  ;;  %v2559_v14 = vld [vmem:[%s5178_s1 + $0x3b0] sm:$0xff]  ;;  %v2558_v17 = vld [vmem:[%s5178_s1 + $0x3a8] sm:$0xff] }
 0x2b4   :  { %v2932_v7 = vpop.f32.mrf.mxu1  ;;  %v2544_v13 = vld [vmem:[%s5178_s1 + $0x338] sm:$0xff] }
 0x2b5   :  { %v916_v19 = vadd.f32 %v3446_v12, %v2931_v10  ;;  %v937_v21 = vadd.f32 %v2482_v15, %v911_v18  ;;  %v2578_v12 = vld [vmem:[%s5178_s1 + $0x448] sm:$0xff]  ;;  %v2577_v10 = vld [vmem:[%s5178_s1 + $0x440] sm:$0xff]  ;;  %v2576_v18 = vld [vmem:[%s5178_s1 + $0x438] sm:$0xff] }
 0x2b6   :  { %v2933_v22 = vpop.f32.mrf.mxu1 }
 0x2b7   :  { %v938_v23 = vadd.f32 %v2482_v15, %v916_v19  ;;  %vm941_vm8 = vcmp.gt.f32.partialorder %v937_v21, 0.0  ;;  %v953_v24 = vmul.f32 %v2484_v20, %v937_v21  ;;  %v2934_v29 = vadd.f32 %v2933_v22, %v2932_v7  ;;  %v2542_v7 = vld [vmem:[%s5178_s1 + $0x328] sm:$0xff]  ;;  %v2557_v19 = vld [vmem:[%s5178_s1 + $0x3a0] sm:$0xff]  ;;  %v2556_v22 = vld [vmem:[%s5178_s1 + $0x398] sm:$0xff] }
 0x2b8   :  { %v2935_v25 = vpop.f32.mrf.mxu1  ;;  %v3449_v27 = vpop.f32.mrf.mxu0 }
 0x2b9   :  { %vm942_vm9 = vcmp.gt.f32.partialorder %v938_v23, 0.0  ;;  %v954_v26 = vmul.f32 %v2484_v20, %v938_v23  ;;  %v957_v28 = vsel %vm941_vm8, %v937_v21, %v953_v24  ;;  %v2541_v21 = vld [vmem:[%s5178_s1 + $0x320] sm:$0xff]  ;;  %v2540_v24 = vld [vmem:[%s5178_s1 + $0x318] sm:$0xff] }
 0x2ba   :  { %v2936_v30 = vpop.f32.mrf.mxu1  ;;  %961 = vst [vmem:[#allocation3 + $0x8] sm:$0xff] %v957_v28  ;;  %v920_v33 = vpop.f32.mrf.mxu0  ;;  %1090 = vmatprep.mubr.f32.mxu1 %v957_v28  ;;  %v2554_v28 = vld [vmem:[%s5178_s1 + $0x388] sm:$0xff] }
 0x2bb   :  { %v958_v31 = vsel %vm942_vm9, %v938_v23, %v954_v26  ;;  %v2937_v32 = vadd.f32 %v2936_v30, %v2935_v25  ;;  %v921_v34 = vadd.f32 %v2934_v29, %v920_v33  ;;  %v2574_v23 = vld [vmem:[%s5178_s1 + $0x428] sm:$0xff]  ;;  %v2555_v25 = vld [vmem:[%s5178_s1 + $0x390] sm:$0xff]  ;;  %v2573_v26 = vld [vmem:[%s5178_s1 + $0x420] sm:$0xff] }
 0x2bc   :  { %962 = vst [vmem:[#allocation3 + $0x10] sm:$0xff] %v958_v31  ;;  %v2572_v29 = vld [vmem:[%s5178_s1 + $0x418] sm:$0xff]  ;;  %v2538_v30 = vld [vmem:[%s5178_s1 + $0x308] sm:$0xff]  ;;  %v2537_v33 = vld [vmem:[%s5178_s1 + $0x300] sm:$0xff] }
 0x2bd   :  { %v926_v35 = vadd.f32 %v3449_v27, %v2937_v32  ;;  %v939_v36 = vadd.f32 %v2482_v15, %v921_v34  ;;  %v2539_v27 = vld [vmem:[%s5178_s1 + $0x310] sm:$0xff]  ;;  %v2570_v34 = vld [vmem:[%s5178_s1 + $0x408] sm:$0xff] }
 0x2be   :  { %v2571_v32 = vld [vmem:[%s5178_s1 + $0x410] sm:$0xff] }
 0x2bf   :  { %v940_v37 = vadd.f32 %v2482_v15, %v926_v35  ;;  %vm943_vm10 = vcmp.gt.f32.partialorder %v939_v36, 0.0  ;;  %v955_v38 = vmul.f32 %v2484_v20, %v939_v36  ;;  %v2543_v15 = vld [vmem:[%s5178_s1 + $0x330] sm:$0xff]  ;;  %v2569_v35 = vld [vmem:[%s5178_s1 + $0x400] sm:$0xff] }
 0x2c1   :  { %vm944_vm11 = vcmp.gt.f32.partialorder %v940_v37, 0.0  ;;  %v956_v39 = vmul.f32 %v2484_v20, %v940_v37  ;;  %v959_v40 = vsel %vm943_vm10, %v939_v36, %v955_v38  ;;  %v1014_v41 = vld [vmem:[#allocation3 + $0x6] sm:$0xff]  ;;  %v2575_v20 = vld [vmem:[%s5178_s1 + $0x430] sm:$0xff]  ;;  %v2620_v36 = vld [vmem:[%s5180_s4 + $0x3f8] sm:$0xff] }
 0x2c2   :  { %963 = vst [vmem:[#allocation3 + $0x28] sm:$0xff] %v959_v40  ;;  %1091 = vmatmul.mubr.f32.vlgmr.msra.gmra.mxu1 %v1014_v41 }
 0x2c3   :  { %v960_v43 = vsel %vm944_vm11, %v940_v37, %v956_v39  ;;  %v1022_v44 = vld [vmem:[#allocation3 + $0xa] sm:$0xff]  ;;  %v1023_v45 = vld [vmem:[#allocation3 + $0x12] sm:$0xff]  ;;  %1095 = vmatprep.mubr.f32.mxu1 %v958_v31  ;;  %3023 = vmatpush3.msra.mxu1 %v2552_v42  ;;  %v2553_v31 = vld [vmem:[%s5178_s1 + $0x380] sm:$0xff] }
 0x2c4   :  { %964 = vst [vmem:[#allocation3 + $0x30] sm:$0xff] %v960_v43  ;;  %3482 = vmatprep.mubr.f32.mxu0 %v1022_v44  ;;  %v1015_v49 = vld [vmem:[#allocation3 + $0xe] sm:$0xff]  ;;  %3024 = vmatprep.subr.mxu1 %v2567_v46  ;;  %v4600_v37 = vld [vmem:[%s5180_s4 + $0x478] sm:$0xff]  ;;  %v2534_v44 = vld [vmem:[%s5183_s5 + $0x1] ss:$0 sm:$0xff] }
 0x2c5   :  { %3483 = vmatmul.mubr.f32.vlgmr.msra.gmra.mxu0 %v1023_v45  ;;  %3025 = vmatpush3.msra.mxu1 %v2551_v48  ;;  %v2536_v46 = vld [vmem:[%s5184_s6 + $0x1] ss:$0 sm:$0xff] }
 0x2c6   :  { %3489 = vmatpush3.msra.mxu0 %v2584_v5  ;;  %1096 = vmatmul.mubr.f32.gmra.mxu1 %v1015_v49  ;;  %v2561_v5 = vld [vmem:[%s5178_s1 + $0x3c0] sm:$0xff] }
 0x2c7   :  { %3490 = vmatprep.subr.mxu0 %v2583_v47  ;;  %1100 = vmatprep.mubr.f32.mxu1 %v959_v40 }
 0x2c8   :  { %3026 = vmatprep.subr.mxu1 %v2566_v50  ;;  %3491 = vmatpush3.msra.mxu0 %v2583_v47 }
 0x2c9   :  { %v1016_v54 = vld [vmem:[#allocation3 + $0x26] sm:$0xff]  ;;  %3027 = vmatpush3.msra.mxu1 %v2550_v51  ;;  %3492 = vmatprep.subr.mxu0 %v2582_v52 }
 0x2ca   :  { %1101 = vmatmul.mubr.f32.gmra.mxu1 %v1016_v54  ;;  %3028 = vmatprep.subr.mxu1 %v2565_v53 }
 0x2cb   :  { %v1024_v57 = vld [vmem:[#allocation3 + $0x2a] sm:$0xff]  ;;  %v1025_v58 = vld [vmem:[#allocation3 + $0x32] sm:$0xff]  ;;  %1105 = vmatprep.mubr.f32.mxu1 %v960_v43  ;;  %3029 = vmatpush3.msra.mxu1 %v2549_v56 }
 0x2cc   :  { %3485 = vmatprep.mubr.f32.mxu0 %v1024_v57  ;;  %v1017_v60 = vld [vmem:[#allocation3 + $0x2e] sm:$0xff]  ;;  %3030 = vmatprep.subr.mxu1 %v2564_v59 }
 0x2cd   :  { %3486 = vmatmul.mubr.f32.gmra.mxu0 %v1025_v58  ;;  %3031 = vmatpush3.msra.mxu1 %v2548_v61 }
 0x2ce   :  { %3493 = vmatpush3.msra.mxu0 %v2582_v52  ;;  %1106 = vmatmul.mubr.f32.gmra.mxu1 %v1017_v60 }
 0x2cf   :  { %3032 = vmatprep.subr.mxu1 %v2563_v62  ;;  %3494 = vmatprep.subr.mxu0 %v2581_v6 }
 0x2d0   :  { %3033 = vmatpush3.msra.mxu1 %v2547_v63  ;;  %3495 = vmatpush3.msra.mxu0 %v2581_v6 }
 0x2d1   :  { %3034 = vmatprep.subr.mxu1 %v2562_v1  ;;  %3496 = vmatprep.subr.mxu0 %v2580_v2 }
 0x2d2   :  { %3035 = vmatpush3.msra.mxu1 %v2546_v3  ;;  %3497 = vmatpush3.msra.mxu0 %v2580_v2 }
 0x2d3   :  { %3036 = vmatprep.subr.mxu1 %v2561_v5  ;;  %3498 = vmatprep.subr.mxu0 %v2579_v8 }
 0x2d4   :  { %3037 = vmatpush3.msra.mxu1 %v2545_v9  ;;  %3499 = vmatpush3.msra.mxu0 %v2579_v8 }
 0x2d5   :  { %3038 = vmatprep.subr.mxu1 %v2560_v11  ;;  %3500 = vmatprep.subr.mxu0 %v2578_v12 }
 0x2d6   :  { %3039 = vmatpush3.msra.mxu1 %v2544_v13  ;;  %3501 = vmatpush3.msra.mxu0 %v2578_v12  ;;  %v2604_v13 = vld [vmem:[%s5180_s4 + $0x378] sm:$0xff] }
 0x2d7   :  { %3040 = vmatprep.subr.mxu1 %v2559_v14  ;;  %3502 = vmatprep.subr.mxu0 %v2577_v10 }
 0x2d8   :  { %3041 = vmatpush3.msra.mxu1 %v2543_v15  ;;  %3503 = vmatpush3.msra.mxu0 %v2577_v10  ;;  %v2603_v15 = vld [vmem:[%s5180_s4 + $0x370] sm:$0xff] }
 0x2d9   :  { %3042 = vmatprep.subr.mxu1 %v2558_v17  ;;  %3504 = vmatprep.subr.mxu0 %v2576_v18 }
 0x2da   :  { %3043 = vmatpush3.msra.mxu1 %v2542_v7  ;;  %3505 = vmatpush3.msra.mxu0 %v2576_v18 }
 0x2db   :  { %3044 = vmatprep.subr.mxu1 %v2557_v19  ;;  %3506 = vmatprep.subr.mxu0 %v2575_v20  ;;  %v2618_v19 = vld [vmem:[%s5180_s4 + $0x3e8] sm:$0xff] }
 0x2dc   :  { %3045 = vmatpush3.msra.mxu1 %v2541_v21  ;;  %3507 = vmatpush3.msra.mxu0 %v2575_v20  ;;  %v2635_v20 = vld [vmem:[%s5180_s4 + $0x470] sm:$0xff]  ;;  %v2617_v21 = vld [vmem:[%s5180_s4 + $0x3e0] sm:$0xff] }
 0x2dd   :  { %3046 = vmatprep.subr.mxu1 %v2556_v22  ;;  %3508 = vmatprep.subr.mxu0 %v2574_v23 }
 0x2de   :  { %3047 = vmatpush3.msra.mxu1 %v2540_v24  ;;  %3509 = vmatpush3.msra.mxu0 %v2574_v23  ;;  %v2634_v23 = vld [vmem:[%s5180_s4 + $0x468] sm:$0xff]  ;;  %v2601_v24 = vld [vmem:[%s5180_s4 + $0x360] sm:$0xff] }
 0x2df   :  { %3048 = vmatprep.subr.mxu1 %v2555_v25  ;;  %3510 = vmatprep.subr.mxu0 %v2573_v26  ;;  %v2616_v25 = vld [vmem:[%s5180_s4 + $0x3d8] sm:$0xff] }
 0x2e0   :  { %3049 = vmatpush3.msra.mxu1 %v2539_v27  ;;  %3511 = vmatpush3.msra.mxu0 %v2573_v26  ;;  %v2633_v26 = vld [vmem:[%s5180_s4 + $0x460] sm:$0xff] }
 0x2e1   :  { %3050 = vmatprep.subr.mxu1 %v2554_v28  ;;  %3512 = vmatprep.subr.mxu0 %v2572_v29 }
 0x2e2   :  { %3051 = vmatpush3.msra.mxu1 %v2538_v30  ;;  %3513 = vmatpush3.msra.mxu0 %v2572_v29  ;;  %v2600_v29 = vld [vmem:[%s5180_s4 + $0x358] sm:$0xff]  ;;  %v2615_v30 = vld [vmem:[%s5180_s4 + $0x3d0] sm:$0xff] }
 0x2e3   :  { %3052 = vmatprep.subr.mxu1 %v2553_v31  ;;  %3514 = vmatprep.subr.mxu0 %v2571_v32  ;;  %v2632_v31 = vld [vmem:[%s5180_s4 + $0x458] sm:$0xff] }
 0x2e4   :  { %3053 = vmatpush3.msra.mxu1 %v2537_v33  ;;  %3515 = vmatpush3.msra.mxu0 %v2571_v32  ;;  %v2599_v32 = vld [vmem:[%s5180_s4 + $0x350] sm:$0xff]  ;;  %v2614_v33 = vld [vmem:[%s5180_s4 + $0x3c8] sm:$0xff] }
 0x2e5   :  { %3516 = vmatprep.subr.mxu0 %v2570_v34  ;;  %3086 = vmatprep.subr.mxu1 %v2620_v36  ;;  %v2613_v36 = vld [vmem:[%s5180_s4 + $0x3c0] sm:$0xff] }
 0x2e6   :  { %3517 = vmatpush3.msra.mxu0 %v2570_v34  ;;  %v2631_v34 = vld [vmem:[%s5180_s4 + $0x450] sm:$0xff] }
 0x2e7   :  { %3518 = vmatprep.subr.mxu0 %v2569_v35 }
 0x2e8   :  { %3519 = vmatpush3.msra.mxu0 %v2569_v35  ;;  %v2598_v35 = vld [vmem:[%s5180_s4 + $0x348] sm:$0xff] }
 0x2e9   :  { %3526 = vmatprep.subr.mxu0 %v4600_v37 }
 0x382   :  { %v2990_v38 = vpop.f32.mrf.mxu1 }
 0x384   :  { %v2991_v39 = vpop.f32.mrf.mxu1 }
 0x385   :  { %v3484_v40 = vpop.f32.mrf.mxu0  ;;  %v2992_v41 = vadd.f32 %v2991_v39, %v2990_v38  ;;  %v2597_v38 = vld [vmem:[%s5180_s4 + $0x340] sm:$0xff]  ;;  %v2612_v39 = vld [vmem:[%s5180_s4 + $0x3b8] sm:$0xff] }
 0x386   :  { %v2993_v42 = vpop.f32.mrf.mxu1 }
 0x387   :  { %v1177_v43 = vpop.f32.mrf.mxu0 }
 0x388   :  { %v1178_v45 = vadd.f32 %v2992_v41, %v1177_v43  ;;  %v2994_v47 = vpop.f32.mrf.mxu1  ;;  %v2596_v41 = vld [vmem:[%s5180_s4 + $0x338] sm:$0xff] }
 0x389   :  { %v2995_v49 = vadd.f32 %v2994_v47, %v2993_v42  ;;  %v2611_v42 = vld [vmem:[%s5180_s4 + $0x3b0] sm:$0xff]  ;;  %v2628_v43 = vld [vmem:[%s5180_s4 + $0x438] sm:$0xff]  ;;  %v2594_v47 = vld [vmem:[%s5180_s4 + $0x328] sm:$0xff] }
 0x38a   :  { %v1204_v48 = vadd.f32 %v2534_v44, %v1178_v45  ;;  %v2996_v50 = vpop.f32.mrf.mxu1  ;;  %v2610_v45 = vld [vmem:[%s5180_s4 + $0x3a8] sm:$0xff] }
 0x38b   :  { %v1183_v52 = vadd.f32 %v3484_v40, %v2995_v49  ;;  %v2629_v40 = vld [vmem:[%s5180_s4 + $0x440] sm:$0xff]  ;;  %v2626_v49 = vld [vmem:[%s5180_s4 + $0x428] sm:$0xff] }
 0x38c   :  { %vm1208_vm12 = vcmp.gt.f32.partialorder %v1204_v48, 0.0  ;;  %v1220_v51 = vmul.f32 %v2536_v46, %v1204_v48  ;;  %v2997_v53 = vpop.f32.mrf.mxu1 }
 0x38d   :  { %v3487_v54 = vpop.f32.mrf.mxu0  ;;  %v1205_v57 = vadd.f32 %v2534_v44, %v1183_v52  ;;  %v2998_v58 = vadd.f32 %v2997_v53, %v2996_v50  ;;  %v2593_v50 = vld [vmem:[%s5180_s4 + $0x320] sm:$0xff]  ;;  %v2592_v53 = vld [vmem:[%s5180_s4 + $0x318] sm:$0xff] }
 0x38e   :  { %v1224_v56 = vsel %vm1208_vm12, %v1204_v48, %v1220_v51  ;;  %v2999_v60 = vpop.f32.mrf.mxu1  ;;  %v2609_v48 = vld [vmem:[%s5180_s4 + $0x3a0] sm:$0xff]  ;;  %v2608_v51 = vld [vmem:[%s5180_s4 + $0x398] sm:$0xff] }
 0x38f   :  { %v4610_v59 = vadd.f32 %v1224_v56, %v4286_v55  ;;  %v1187_v61 = vpop.f32.mrf.mxu0  ;;  %vm1209_vm13 = vcmp.gt.f32.partialorder %v1205_v57, 0.0  ;;  %v1221_v62 = vmul.f32 %v2536_v46, %v1205_v57  ;;  %v2625_v52 = vld [vmem:[%s5180_s4 + $0x420] sm:$0xff]  ;;  %v2624_v56 = vld [vmem:[%s5180_s4 + $0x418] sm:$0xff] }
 0x390   :  { %v1188_v6 = vadd.f32 %v2998_v58, %v1187_v61  ;;  %v3000_v63 = vpop.f32.mrf.mxu1  ;;  %v2606_v58 = vld [vmem:[%s5180_s4 + $0x388] sm:$0xff] }
 0x391   :  { %1232 = vst [vmem:[#allocation2 + $0x8] sm:$0xff] %v4610_v59  ;;  %1359 = vmatprep.mubr.f32.mxu1 %v4610_v59  ;;  %v1225_v1 = vsel %vm1209_vm13, %v1205_v57, %v1221_v62  ;;  %v3001_v3 = vadd.f32 %v3000_v63, %v2999_v60  ;;  %v2591_v57 = vld [vmem:[%s5180_s4 + $0x310] sm:$0xff]  ;;  %v2590_v61 = vld [vmem:[%s5180_s4 + $0x308] sm:$0xff]  ;;  %v2605_v62 = vld [vmem:[%s5180_s4 + $0x380] sm:$0xff] }
 0x392   :  { %v1206_v2 = vadd.f32 %v2534_v44, %v1188_v6  ;;  %v4615_v5 = vadd.f32 %v1225_v1, %v4291_v0  ;;  %v2619_v0 = vld [vmem:[%s5180_s4 + $0x3f0] sm:$0xff]  ;;  %v2622_v6 = vld [vmem:[%s5180_s4 + $0x408] sm:$0xff]  ;;  %v2589_v63 = vld [vmem:[%s5180_s4 + $0x300] sm:$0xff] }
 0x393   :  { %v1193_v55 = vadd.f32 %v3487_v54, %v3001_v3  ;;  %v2607_v54 = vld [vmem:[%s5180_s4 + $0x390] sm:$0xff]  ;;  %v2621_v1 = vld [vmem:[%s5180_s4 + $0x400] sm:$0xff]  ;;  %v2688_v3 = vld [vmem:[%s5178_s1 + $0x5f8] sm:$0xff] }
 0x394   :  { %vm1210_vm14 = vcmp.gt.f32.partialorder %v1206_v2, 0.0  ;;  %v1222_v8 = vmul.f32 %v2536_v46, %v1206_v2  ;;  %1233 = vst [vmem:[#allocation2 + $0x10] sm:$0xff] %v4615_v5  ;;  %v2623_v60 = vld [vmem:[%s5180_s4 + $0x410] sm:$0xff] }
 0x395   :  { %v1207_v11 = vadd.f32 %v2534_v44, %v1193_v55  ;;  %v2595_v44 = vld [vmem:[%s5180_s4 + $0x330] sm:$0xff] }
 0x396   :  { %v1226_v9 = vsel %vm1210_vm14, %v1206_v2, %v1222_v8  ;;  %v2672_v2 = vld [vmem:[%s5178_s1 + $0x578] sm:$0xff] }
 0x397   :  { %v4619_v12 = vadd.f32 %v1226_v9, %v4295_v4  ;;  %vm1211_vm15 = vcmp.gt.f32.partialorder %v1207_v11, 0.0  ;;  %v1223_v14 = vmul.f32 %v2536_v46, %v1207_v11  ;;  %v2627_v46 = vld [vmem:[%s5180_s4 + $0x430] sm:$0xff] }
 0x398   :  { %v1289_v10 = vld [vmem:[#allocation2 + $0x4] sm:$0xff] }
 0x399   :  { %1234 = vst [vmem:[#allocation2 + $0x28] sm:$0xff] %v4619_v12  ;;  %1360 = vmatmul.mubr.f32.vlgmr.msra.gmra.mxu1 %v1289_v10  ;;  %v1227_v4 = vsel %vm1211_vm15, %v1207_v11, %v1223_v14 }
 0x39a   :  { %1364 = vmatprep.mubr.f32.mxu1 %v4615_v5  ;;  %3087 = vmatpush3.msra.mxu1 %v2604_v13  ;;  %v4633_v17 = vadd.f32 %v1227_v4, %v4309_v16  ;;  %v2602_v16 = vld [vmem:[%s5180_s4 + $0x368] sm:$0xff] }
 0x39b   :  { %3088 = vmatprep.subr.mxu1 %v2619_v0  ;;  %v1290_v18 = vld [vmem:[#allocation2 + $0xc] sm:$0xff]  ;;  %v1293_v7 = vld [vmem:[#allocation2 + $0x14] sm:$0xff]  ;;  %v2586_v0 = vld [vmem:[%s5181_s2 + $0x2] ss:$0 sm:$0xff] }
 0x39c   :  { %3089 = vmatpush3.msra.mxu1 %v2603_v15  ;;  %1235 = vst [vmem:[#allocation2 + $0x30] sm:$0xff] %v4633_v17  ;;  %3520 = vmatprep.mubr.f32.mxu0 %v1290_v18 }
 0x39d   :  { %1365 = vmatmul.mubr.f32.gmra.mxu1 %v1290_v18  ;;  %3521 = vmatmul.mubr.f32.vlgmr.msra.gmra.mxu0 %v1293_v7 }
 0x39e   :  { %1369 = vmatprep.mubr.f32.mxu1 %v4619_v12  ;;  %3527 = vmatpush3.msra.mxu0 %v4600_v37  ;;  %v2630_v37 = vld [vmem:[%s5180_s4 + $0x448] sm:$0xff] }
 0x39f   :  { %3090 = vmatprep.subr.mxu1 %v2618_v19  ;;  %3528 = vmatprep.subr.mxu0 %v2635_v20  ;;  %v2588_v19 = vld [vmem:[%s5182_s3 + $0x2] ss:$0 sm:$0xff] }
 0x3a0   :  { %v1291_v22 = vld [vmem:[#allocation2 + $0x24] sm:$0xff]  ;;  %3091 = vmatpush3.msra.mxu1 %v2602_v16  ;;  %3529 = vmatpush3.msra.mxu0 %v2635_v20 }
 0x3a1   :  { %1370 = vmatmul.mubr.f32.gmra.mxu1 %v1291_v22  ;;  %3092 = vmatprep.subr.mxu1 %v2617_v21 }
 0x3a2   :  { %1374 = vmatprep.mubr.f32.mxu1 %v4633_v17  ;;  %3530 = vmatprep.subr.mxu0 %v2634_v23 }
 0x3a3   :  { %3093 = vmatpush3.msra.mxu1 %v2601_v24  ;;  %v1292_v27 = vld [vmem:[#allocation2 + $0x2c] sm:$0xff]  ;;  %v1294_v28 = vld [vmem:[#allocation2 + $0x34] sm:$0xff]  ;;  %3531 = vmatpush3.msra.mxu0 %v2634_v23 }
 0x3a4   :  { %3094 = vmatprep.subr.mxu1 %v2616_v25  ;;  %3523 = vmatprep.mubr.f32.mxu0 %v1292_v27 }
 0x3a5   :  { %1375 = vmatmul.mubr.f32.gmra.mxu1 %v1292_v27  ;;  %3524 = vmatmul.mubr.f32.gmra.mxu0 %v1294_v28 }
 0x3a6   :  { %3532 = vmatprep.subr.mxu0 %v2633_v26  ;;  %3095 = vmatpush3.msra.mxu1 %v2600_v29 }
 0x3a7   :  { %3533 = vmatpush3.msra.mxu0 %v2633_v26  ;;  %3096 = vmatprep.subr.mxu1 %v2615_v30 }
 0x3a8   :  { %3534 = vmatprep.subr.mxu0 %v2632_v31  ;;  %3097 = vmatpush3.msra.mxu1 %v2599_v32 }
 0x3a9   :  { %3535 = vmatpush3.msra.mxu0 %v2632_v31  ;;  %3098 = vmatprep.subr.mxu1 %v2614_v33 }
 0x3aa   :  { %3536 = vmatprep.subr.mxu0 %v2631_v34  ;;  %3099 = vmatpush3.msra.mxu1 %v2598_v35 }
 0x3ab   :  { %3537 = vmatpush3.msra.mxu0 %v2631_v34  ;;  %3100 = vmatprep.subr.mxu1 %v2613_v36 }
 0x3ac   :  { %3538 = vmatprep.subr.mxu0 %v2630_v37  ;;  %3101 = vmatpush3.msra.mxu1 %v2597_v38 }
 0x3ad   :  { %3539 = vmatpush3.msra.mxu0 %v2630_v37  ;;  %3102 = vmatprep.subr.mxu1 %v2612_v39 }
 0x3ae   :  { %3540 = vmatprep.subr.mxu0 %v2629_v40  ;;  %3103 = vmatpush3.msra.mxu1 %v2596_v41 }
 0x3af   :  { %3541 = vmatpush3.msra.mxu0 %v2629_v40  ;;  %3104 = vmatprep.subr.mxu1 %v2611_v42  ;;  %v2656_v40 = vld [vmem:[%s5178_s1 + $0x4f8] sm:$0xff] }
 0x3b0   :  { %3542 = vmatprep.subr.mxu0 %v2628_v43  ;;  %3105 = vmatpush3.msra.mxu1 %v2595_v44  ;;  %v2671_v44 = vld [vmem:[%s5178_s1 + $0x570] sm:$0xff] }
 0x3b1   :  { %3543 = vmatpush3.msra.mxu0 %v2628_v43  ;;  %3106 = vmatprep.subr.mxu1 %v2610_v45  ;;  %v2687_v45 = vld [vmem:[%s5178_s1 + $0x5f0] sm:$0xff] }
 0x3b2   :  { %3544 = vmatprep.subr.mxu0 %v2627_v46  ;;  %3107 = vmatpush3.msra.mxu1 %v2594_v47  ;;  %v2670_v47 = vld [vmem:[%s5178_s1 + $0x568] sm:$0xff] }
 0x3b3   :  { %3545 = vmatpush3.msra.mxu0 %v2627_v46  ;;  %3108 = vmatprep.subr.mxu1 %v2609_v48  ;;  %v2655_v46 = vld [vmem:[%s5178_s1 + $0x4f0] sm:$0xff]  ;;  %v2654_v48 = vld [vmem:[%s5178_s1 + $0x4e8] sm:$0xff] }
 0x3b4   :  { %3546 = vmatprep.subr.mxu0 %v2626_v49  ;;  %3109 = vmatpush3.msra.mxu1 %v2593_v50  ;;  %v2669_v50 = vld [vmem:[%s5178_s1 + $0x560] sm:$0xff] }
 0x3b5   :  { %3547 = vmatpush3.msra.mxu0 %v2626_v49  ;;  %3110 = vmatprep.subr.mxu1 %v2608_v51  ;;  %v2686_v49 = vld [vmem:[%s5178_s1 + $0x5e8] sm:$0xff] }
 0x3b6   :  { %3548 = vmatprep.subr.mxu0 %v2625_v52  ;;  %3111 = vmatpush3.msra.mxu1 %v2592_v53 }
 0x3b7   :  { %3549 = vmatpush3.msra.mxu0 %v2625_v52  ;;  %3112 = vmatprep.subr.mxu1 %v2607_v54  ;;  %v2653_v52 = vld [vmem:[%s5178_s1 + $0x4e0] sm:$0xff] }
 0x3b8   :  { %3550 = vmatprep.subr.mxu0 %v2624_v56  ;;  %3113 = vmatpush3.msra.mxu1 %v2591_v57  ;;  %v2652_v57 = vld [vmem:[%s5178_s1 + $0x4d8] sm:$0xff] }
 0x3b9   :  { %3551 = vmatpush3.msra.mxu0 %v2624_v56  ;;  %3114 = vmatprep.subr.mxu1 %v2606_v58  ;;  %v2668_v56 = vld [vmem:[%s5178_s1 + $0x558] sm:$0xff]  ;;  %v2667_v58 = vld [vmem:[%s5178_s1 + $0x550] sm:$0xff] }
 0x3ba   :  { %3552 = vmatprep.subr.mxu0 %v2623_v60  ;;  %3115 = vmatpush3.msra.mxu1 %v2590_v61  ;;  %v2651_v61 = vld [vmem:[%s5178_s1 + $0x4d0] sm:$0xff] }
 0x3bb   :  { %3553 = vmatpush3.msra.mxu0 %v2623_v60  ;;  %3116 = vmatprep.subr.mxu1 %v2605_v62  ;;  %v2685_v60 = vld [vmem:[%s5178_s1 + $0x5e0] sm:$0xff]  ;;  %v2666_v62 = vld [vmem:[%s5178_s1 + $0x548] sm:$0xff] }
 0x3bc   :  { %3554 = vmatprep.subr.mxu0 %v2622_v6  ;;  %3117 = vmatpush3.msra.mxu1 %v2589_v63  ;;  %v2650_v63 = vld [vmem:[%s5178_s1 + $0x4c8] sm:$0xff] }
 0x3bd   :  { %3555 = vmatpush3.msra.mxu0 %v2622_v6  ;;  %3150 = vmatprep.subr.mxu1 %v2672_v2  ;;  %v2684_v6 = vld [vmem:[%s5178_s1 + $0x5d8] sm:$0xff]  ;;  %v2683_v2 = vld [vmem:[%s5178_s1 + $0x5d0] sm:$0xff] }
 0x3be   :  { %3556 = vmatprep.subr.mxu0 %v2621_v1 }
 0x3bf   :  { %3557 = vmatpush3.msra.mxu0 %v2621_v1  ;;  %v2665_v1 = vld [vmem:[%s5178_s1 + $0x540] sm:$0xff] }
 0x3c0   :  { %3564 = vmatprep.subr.mxu0 %v2688_v3 }
 0x459   :  { %v3054_v8 = vpop.f32.mrf.mxu1 }
 0x45b   :  { %v3055_v55 = vpop.f32.mrf.mxu1 }
 0x45c   :  { %v3056_v13 = vadd.f32 %v3055_v55, %v3054_v8  ;;  %v2664_v8 = vld [vmem:[%s5178_s1 + $0x538] sm:$0xff]  ;;  %v2682_v55 = vld [vmem:[%s5178_s1 + $0x5c8] sm:$0xff] }
 0x45d   :  { %v3057_v9 = vpop.f32.mrf.mxu1  ;;  %v3522_v11 = vpop.f32.mrf.mxu0 }
 0x45f   :  { %v3058_v14 = vpop.f32.mrf.mxu1  ;;  %v1446_v15 = vpop.f32.mrf.mxu0 }
 0x460   :  { %v3059_v10 = vadd.f32 %v3058_v14, %v3057_v9  ;;  %v1447_v4 = vadd.f32 %v3056_v13, %v1446_v15  ;;  %v2648_v9 = vld [vmem:[%s5178_s1 + $0x4b8] sm:$0xff]  ;;  %v2681_v13 = vld [vmem:[%s5178_s1 + $0x5c0] sm:$0xff]  ;;  %v2647_v14 = vld [vmem:[%s5178_s1 + $0x4b0] sm:$0xff] }
 0x461   :  { %v3060_v18 = vpop.f32.mrf.mxu1  ;;  %v2646_v15 = vld [vmem:[%s5178_s1 + $0x4a8] sm:$0xff] }
 0x462   :  { %v1452_v7 = vadd.f32 %v3522_v11, %v3059_v10  ;;  %v1473_v20 = vadd.f32 %v2586_v0, %v1447_v4  ;;  %v2663_v11 = vld [vmem:[%s5178_s1 + $0x530] sm:$0xff]  ;;  %v2662_v10 = vld [vmem:[%s5178_s1 + $0x528] sm:$0xff]  ;;  %v2661_v4 = vld [vmem:[%s5178_s1 + $0x520] sm:$0xff] }
 0x463   :  { %v3061_v16 = vpop.f32.mrf.mxu1 }
 0x464   :  { %v1474_v21 = vadd.f32 %v2586_v0, %v1452_v7  ;;  %vm1477_vm0 = vcmp.gt.f32.partialorder %v1473_v20, 0.0  ;;  %v1489_v22 = vmul.f32 %v2588_v19, %v1473_v20  ;;  %v3062_v27 = vadd.f32 %v3061_v16, %v3060_v18  ;;  %v2679_v18 = vld [vmem:[%s5178_s1 + $0x5b0] sm:$0xff]  ;;  %v2645_v7 = vld [vmem:[%s5178_s1 + $0x4a0] sm:$0xff]  ;;  %v2644_v16 = vld [vmem:[%s5178_s1 + $0x498] sm:$0xff] }
 0x465   :  { %v3063_v23 = vpop.f32.mrf.mxu1  ;;  %v3525_v25 = vpop.f32.mrf.mxu0 }
 0x466   :  { %vm1478_vm1 = vcmp.gt.f32.partialorder %v1474_v21, 0.0  ;;  %v1490_v24 = vmul.f32 %v2588_v19, %v1474_v21  ;;  %v1493_v26 = vsel %vm1477_vm0, %v1473_v20, %v1489_v22  ;;  %v2678_v20 = vld [vmem:[%s5178_s1 + $0x5a8] sm:$0xff]  ;;  %v2677_v22 = vld [vmem:[%s5178_s1 + $0x5a0] sm:$0xff] }
 0x467   :  { %v3064_v28 = vpop.f32.mrf.mxu1  ;;  %1497 = vst [vmem:[#allocation3 + $0x8] sm:$0xff] %v1493_v26  ;;  %v1456_v31 = vpop.f32.mrf.mxu0  ;;  %1624 = vmatprep.mubr.f32.mxu1 %v1493_v26  ;;  %v2642_v26 = vld [vmem:[%s5178_s1 + $0x488] sm:$0xff] }
 0x468   :  { %v1494_v29 = vsel %vm1478_vm1, %v1474_v21, %v1490_v24  ;;  %v3065_v30 = vadd.f32 %v3064_v28, %v3063_v23  ;;  %v1457_v32 = vadd.f32 %v3062_v27, %v1456_v31  ;;  %v2659_v21 = vld [vmem:[%s5178_s1 + $0x510] sm:$0xff]  ;;  %v2658_v24 = vld [vmem:[%s5178_s1 + $0x508] sm:$0xff]  ;;  %v2657_v27 = vld [vmem:[%s5178_s1 + $0x500] sm:$0xff] }
 0x469   :  { %1498 = vst [vmem:[#allocation3 + $0x10] sm:$0xff] %v1494_v29  ;;  %v2643_v23 = vld [vmem:[%s5178_s1 + $0x490] sm:$0xff]  ;;  %v2673_v31 = vld [vmem:[%s5178_s1 + $0x580] sm:$0xff] }
 0x46a   :  { %v1462_v33 = vadd.f32 %v3525_v25, %v3065_v30  ;;  %v1475_v34 = vadd.f32 %v2586_v0, %v1457_v32  ;;  %v2676_v25 = vld [vmem:[%s5178_s1 + $0x598] sm:$0xff]  ;;  %v2675_v28 = vld [vmem:[%s5178_s1 + $0x590] sm:$0xff]  ;;  %v2674_v30 = vld [vmem:[%s5178_s1 + $0x588] sm:$0xff] }
 0x46b   :  { %v2724_v32 = vld [vmem:[%s5180_s4 + $0x578] sm:$0xff] }
 0x46c   :  { %v1476_v35 = vadd.f32 %v2586_v0, %v1462_v33  ;;  %vm1479_vm2 = vcmp.gt.f32.partialorder %v1475_v34, 0.0  ;;  %v1491_v36 = vmul.f32 %v2588_v19, %v1475_v34  ;;  %v2680_v0 = vld [vmem:[%s5178_s1 + $0x5b8] sm:$0xff] }
 0x46d   :  { %v2740_v33 = vld [vmem:[%s5180_s4 + $0x5f8] sm:$0xff] }
 0x46e   :  { %vm1480_vm3 = vcmp.gt.f32.partialorder %v1476_v35, 0.0  ;;  %v1492_v37 = vmul.f32 %v2588_v19, %v1476_v35  ;;  %v1495_v38 = vsel %vm1479_vm2, %v1475_v34, %v1491_v36  ;;  %v1550_v39 = vld [vmem:[#allocation3 + $0x4] sm:$0xff]  ;;  %v2660_v19 = vld [vmem:[%s5178_s1 + $0x518] sm:$0xff] }
 0x46f   :  { %1499 = vst [vmem:[#allocation3 + $0x28] sm:$0xff] %v1495_v38  ;;  %1625 = vmatmul.mubr.f32.vlgmr.msra.gmra.mxu1 %v1550_v39 }
 0x470   :  { %v1496_v41 = vsel %vm1480_vm3, %v1476_v35, %v1492_v37  ;;  %v1551_v42 = vld [vmem:[#allocation3 + $0xc] sm:$0xff]  ;;  %v1558_v43 = vld [vmem:[#allocation3 + $0x14] sm:$0xff]  ;;  %1629 = vmatprep.mubr.f32.mxu1 %v1494_v29  ;;  %3151 = vmatpush3.msra.mxu1 %v2656_v40  ;;  %v2641_v29 = vld [vmem:[%s5178_s1 + $0x480] sm:$0xff] }
 0x471   :  { %1500 = vst [vmem:[#allocation3 + $0x30] sm:$0xff] %v1496_v41  ;;  %3558 = vmatprep.mubr.f32.mxu0 %v1551_v42  ;;  %3152 = vmatprep.subr.mxu1 %v2671_v44  ;;  %v2638_v40 = vld [vmem:[%s5183_s5 + $0x2] ss:$0 sm:$0xff] }
 0x472   :  { %3559 = vmatmul.mubr.f32.vlgmr.msra.gmra.mxu0 %v1558_v43  ;;  %3153 = vmatpush3.msra.mxu1 %v2655_v46 }
 0x473   :  { %3565 = vmatpush3.msra.mxu0 %v2688_v3  ;;  %1630 = vmatmul.mubr.f32.gmra.mxu1 %v1551_v42  ;;  %v2649_v3 = vld [vmem:[%s5178_s1 + $0x4c0] sm:$0xff] }
 0x474   :  { %3566 = vmatprep.subr.mxu0 %v2687_v45  ;;  %1634 = vmatprep.mubr.f32.mxu1 %v1495_v38  ;;  %v2640_v42 = vld [vmem:[%s5184_s6 + $0x2] ss:$0 sm:$0xff] }
 0x475   :  { %3154 = vmatprep.subr.mxu1 %v2670_v47  ;;  %3567 = vmatpush3.msra.mxu0 %v2687_v45 }
 0x476   :  { %v1552_v51 = vld [vmem:[#allocation3 + $0x24] sm:$0xff]  ;;  %3155 = vmatpush3.msra.mxu1 %v2654_v48  ;;  %3568 = vmatprep.subr.mxu0 %v2686_v49 }
 0x477   :  { %1635 = vmatmul.mubr.f32.gmra.mxu1 %v1552_v51  ;;  %3156 = vmatprep.subr.mxu1 %v2669_v50 }
 0x478   :  { %v1553_v53 = vld [vmem:[#allocation3 + $0x2c] sm:$0xff]  ;;  %v1559_v54 = vld [vmem:[#allocation3 + $0x34] sm:$0xff]  ;;  %1639 = vmatprep.mubr.f32.mxu1 %v1496_v41  ;;  %3157 = vmatpush3.msra.mxu1 %v2653_v52 }
 0x479   :  { %3561 = vmatprep.mubr.f32.mxu0 %v1553_v53  ;;  %3158 = vmatprep.subr.mxu1 %v2668_v56 }
 0x47a   :  { %3562 = vmatmul.mubr.f32.gmra.mxu0 %v1559_v54  ;;  %3159 = vmatpush3.msra.mxu1 %v2652_v57 }
 0x47b   :  { %3569 = vmatpush3.msra.mxu0 %v2686_v49  ;;  %1640 = vmatmul.mubr.f32.gmra.mxu1 %v1553_v53 }
 0x47c   :  { %3160 = vmatprep.subr.mxu1 %v2667_v58  ;;  %3570 = vmatprep.subr.mxu0 %v2685_v60 }
 0x47d   :  { %3161 = vmatpush3.msra.mxu1 %v2651_v61  ;;  %3571 = vmatpush3.msra.mxu0 %v2685_v60  ;;  %v2708_v61 = vld [vmem:[%s5180_s4 + $0x4f8] sm:$0xff] }
 0x47e   :  { %3162 = vmatprep.subr.mxu1 %v2666_v62  ;;  %3572 = vmatprep.subr.mxu0 %v2684_v6 }
 0x47f   :  { %3163 = vmatpush3.msra.mxu1 %v2650_v63  ;;  %3573 = vmatpush3.msra.mxu0 %v2684_v6  ;;  %v2723_v6 = vld [vmem:[%s5180_s4 + $0x570] sm:$0xff] }
 0x480   :  { %3164 = vmatprep.subr.mxu1 %v2665_v1  ;;  %3574 = vmatprep.subr.mxu0 %v2683_v2 }
 0x481   :  { %3165 = vmatpush3.msra.mxu1 %v2649_v3  ;;  %3575 = vmatpush3.msra.mxu0 %v2683_v2  ;;  %v4940_v2 = vld [vmem:[#allocation2] sm:$0xff] }
 0x482   :  { %3166 = vmatprep.subr.mxu1 %v2664_v8  ;;  %3576 = vmatprep.subr.mxu0 %v2682_v55 }
 0x483   :  { %3167 = vmatpush3.msra.mxu1 %v2648_v9  ;;  %3577 = vmatpush3.msra.mxu0 %v2682_v55  ;;  %v2707_v9 = vld [vmem:[%s5180_s4 + $0x4f0] sm:$0xff] }
 0x484   :  { %3168 = vmatprep.subr.mxu1 %v2663_v11  ;;  %3578 = vmatprep.subr.mxu0 %v2681_v13  ;;  %v2722_v11 = vld [vmem:[%s5180_s4 + $0x568] sm:$0xff] }
 0x485   :  { %3169 = vmatpush3.msra.mxu1 %v2647_v14  ;;  %3579 = vmatpush3.msra.mxu0 %v2681_v13 }
 0x486   :  { %3170 = vmatprep.subr.mxu1 %v2662_v10  ;;  %3580 = vmatprep.subr.mxu0 %v2680_v0  ;;  %v2706_v10 = vld [vmem:[%s5180_s4 + $0x4e8] sm:$0xff] }
 0x487   :  { %3171 = vmatpush3.msra.mxu1 %v2646_v15  ;;  %3581 = vmatpush3.msra.mxu0 %v2680_v0 }
 0x488   :  { %3172 = vmatprep.subr.mxu1 %v2661_v4  ;;  %3582 = vmatprep.subr.mxu0 %v2679_v18  ;;  %v2721_v4 = vld [vmem:[%s5180_s4 + $0x560] sm:$0xff] }
 0x489   :  { %3173 = vmatpush3.msra.mxu1 %v2645_v7  ;;  %3583 = vmatpush3.msra.mxu0 %v2679_v18  ;;  %v2738_v18 = vld [vmem:[%s5180_s4 + $0x5e8] sm:$0xff] }
 0x48a   :  { %3174 = vmatprep.subr.mxu1 %v2660_v19  ;;  %3584 = vmatprep.subr.mxu0 %v2678_v20 }
 0x48b   :  { %3175 = vmatpush3.msra.mxu1 %v2644_v16  ;;  %3585 = vmatpush3.msra.mxu0 %v2678_v20  ;;  %v2720_v20 = vld [vmem:[%s5180_s4 + $0x558] sm:$0xff]  ;;  %v2737_v16 = vld [vmem:[%s5180_s4 + $0x5e0] sm:$0xff] }
 0x48c   :  { %3176 = vmatprep.subr.mxu1 %v2659_v21  ;;  %3586 = vmatprep.subr.mxu0 %v2677_v22  ;;  %v2719_v21 = vld [vmem:[%s5180_s4 + $0x550] sm:$0xff] }
 0x48d   :  { %3177 = vmatpush3.msra.mxu1 %v2643_v23  ;;  %3587 = vmatpush3.msra.mxu0 %v2677_v22  ;;  %v2736_v22 = vld [vmem:[%s5180_s4 + $0x5d8] sm:$0xff]  ;;  %v2703_v23 = vld [vmem:[%s5180_s4 + $0x4d0] sm:$0xff] }
 0x48e   :  { %3178 = vmatprep.subr.mxu1 %v2658_v24  ;;  %3588 = vmatprep.subr.mxu0 %v2676_v25  ;;  %v2718_v24 = vld [vmem:[%s5180_s4 + $0x548] sm:$0xff] }
 0x48f   :  { %3179 = vmatpush3.msra.mxu1 %v2642_v26  ;;  %3589 = vmatpush3.msra.mxu0 %v2676_v25  ;;  %v2735_v25 = vld [vmem:[%s5180_s4 + $0x5d0] sm:$0xff]  ;;  %v2702_v26 = vld [vmem:[%s5180_s4 + $0x4c8] sm:$0xff] }
 0x490   :  { %3180 = vmatprep.subr.mxu1 %v2657_v27  ;;  %3590 = vmatprep.subr.mxu0 %v2675_v28  ;;  %v2717_v27 = vld [vmem:[%s5180_s4 + $0x540] sm:$0xff] }
 0x491   :  { %3181 = vmatpush3.msra.mxu1 %v2641_v29  ;;  %3591 = vmatpush3.msra.mxu0 %v2675_v28  ;;  %v2734_v28 = vld [vmem:[%s5180_s4 + $0x5c8] sm:$0xff]  ;;  %v2701_v29 = vld [vmem:[%s5180_s4 + $0x4c0] sm:$0xff] }
 0x492   :  { %3592 = vmatprep.subr.mxu0 %v2674_v30  ;;  %3214 = vmatprep.subr.mxu1 %v2724_v32  ;;  %v2700_v32 = vld [vmem:[%s5180_s4 + $0x4b8] sm:$0xff] }
 0x493   :  { %3593 = vmatpush3.msra.mxu0 %v2674_v30  ;;  %v2716_v30 = vld [vmem:[%s5180_s4 + $0x538] sm:$0xff] }
 0x494   :  { %3594 = vmatprep.subr.mxu0 %v2673_v31 }
 0x495   :  { %3595 = vmatpush3.msra.mxu0 %v2673_v31  ;;  %v2733_v31 = vld [vmem:[%s5180_s4 + $0x5c0] sm:$0xff] }
 0x496   :  { %3602 = vmatprep.subr.mxu0 %v2740_v33 }
 0x52f   :  { %v3118_v34 = vpop.f32.mrf.mxu1 }
 0x531   :  { %v3119_v35 = vpop.f32.mrf.mxu1 }
 0x532   :  { %v3560_v36 = vpop.f32.mrf.mxu0  ;;  %v3120_v37 = vadd.f32 %v3119_v35, %v3118_v34  ;;  %v2732_v34 = vld [vmem:[%s5180_s4 + $0x5b8] sm:$0xff]  ;;  %v2699_v35 = vld [vmem:[%s5180_s4 + $0x4b0] sm:$0xff] }
 0x533   :  { %v3121_v38 = vpop.f32.mrf.mxu1 }
 0x534   :  { %v1711_v39 = vpop.f32.mrf.mxu0 }
 0x535   :  { %v1712_v41 = vadd.f32 %v3120_v37, %v1711_v39  ;;  %v3122_v43 = vpop.f32.mrf.mxu1  ;;  %v2731_v37 = vld [vmem:[%s5180_s4 + $0x5b0] sm:$0xff]  ;;  %v2713_v39 = vld [vmem:[%s5180_s4 + $0x520] sm:$0xff] }
 0x536   :  { %v3123_v45 = vadd.f32 %v3122_v43, %v3121_v38  ;;  %v2698_v38 = vld [vmem:[%s5180_s4 + $0x4a8] sm:$0xff]  ;;  %v2729_v43 = vld [vmem:[%s5180_s4 + $0x5a0] sm:$0xff] }
 0x537   :  { %v1738_v44 = vadd.f32 %v2638_v40, %v1712_v41  ;;  %v3124_v46 = vpop.f32.mrf.mxu1  ;;  %v2697_v41 = vld [vmem:[%s5180_s4 + $0x4a0] sm:$0xff] }
 0x538   :  { %v1717_v48 = vadd.f32 %v3560_v36, %v3123_v45  ;;  %v2714_v36 = vld [vmem:[%s5180_s4 + $0x528] sm:$0xff]  ;;  %v2711_v45 = vld [vmem:[%s5180_s4 + $0x510] sm:$0xff] }
 0x539   :  { %vm1742_vm4 = vcmp.gt.f32.partialorder %v1738_v44, 0.0  ;;  %v1754_v47 = vmul.f32 %v2640_v42, %v1738_v44  ;;  %v3125_v49 = vpop.f32.mrf.mxu1 }
 0x53a   :  { %v3563_v50 = vpop.f32.mrf.mxu0  ;;  %v1739_v52 = vadd.f32 %v2638_v40, %v1717_v48  ;;  %v3126_v53 = vadd.f32 %v3125_v49, %v3124_v46  ;;  %v2728_v46 = vld [vmem:[%s5180_s4 + $0x598] sm:$0xff]  ;;  %v2710_v48 = vld [vmem:[%s5180_s4 + $0x508] sm:$0xff]  ;;  %v2727_v49 = vld [vmem:[%s5180_s4 + $0x590] sm:$0xff] }
 0x53b   :  { %v1758_v51 = vsel %vm1742_vm4, %v1738_v44, %v1754_v47  ;;  %v3127_v56 = vpop.f32.mrf.mxu1  ;;  %v2696_v44 = vld [vmem:[%s5180_s4 + $0x498] sm:$0xff]  ;;  %v2695_v47 = vld [vmem:[%s5180_s4 + $0x490] sm:$0xff] }
 0x53c   :  { %v4931_v54 = vadd.f32 %v1758_v51, %v4610_v59  ;;  %v1721_v57 = vpop.f32.mrf.mxu0  ;;  %vm1743_vm5 = vcmp.gt.f32.partialorder %v1739_v52, 0.0  ;;  %v1755_v58 = vmul.f32 %v2640_v42, %v1739_v52  ;;  %v2709_v51 = vld [vmem:[%s5180_s4 + $0x500] sm:$0xff] }
 0x53d   :  { %v1722_v60 = vadd.f32 %v3126_v53, %v1721_v57  ;;  %v3128_v62 = vpop.f32.mrf.mxu1  ;;  %v2693_v53 = vld [vmem:[%s5180_s4 + $0x480] sm:$0xff]  ;;  %v2323_v57 = vld [vmem:[%s5186_s9 + $0x78] sm:$0xff] }
 0x53e   :  { %1893 = vmatprep.mubr.f32.mxu1 %v4931_v54  ;;  %v1759_v63 = vsel %vm1743_vm5, %v1739_v52, %v1755_v58  ;;  %v3129_v59 = vadd.f32 %v3128_v62, %v3127_v56  ;;  %v2726_v52 = vld [vmem:[%s5180_s4 + $0x588] sm:$0xff]  ;;  %v2725_v56 = vld [vmem:[%s5180_s4 + $0x580] sm:$0xff] }
 0x53f   :  { %v1740_v1 = vadd.f32 %v2638_v40, %v1722_v60  ;;  %1894 = vmatmul.mubr.f32.vlgmr.msra.gmra.mxu1 %v4940_v2  ;;  %v4944_v3 = vadd.f32 %v1759_v63, %v4615_v5  ;;  %v2739_v5 = vld [vmem:[%s5180_s4 + $0x5f0] sm:$0xff] }
 0x540   :  { %3215 = vmatpush3.msra.mxu1 %v2708_v61  ;;  %v1727_v55 = vadd.f32 %v3563_v50, %v3129_v59  ;;  %v2694_v50 = vld [vmem:[%s5180_s4 + $0x488] sm:$0xff] }
 0x541   :  { %vm1744_vm6 = vcmp.gt.f32.partialorder %v1740_v1, 0.0  ;;  %v1756_v8 = vmul.f32 %v2640_v42, %v1740_v1  ;;  %3216 = vmatprep.subr.mxu1 %v2723_v6  ;;  %1898 = vmatprep.mubr.f32.mxu1 %v4944_v3 }
 0x542   :  { %3596 = vmatprep.mubr.f32.mxu0 %v4944_v3  ;;  %v1741_v14 = vadd.f32 %v2638_v40, %v1727_v55  ;;  %3217 = vmatpush3.msra.mxu1 %v2707_v9  ;;  %v2730_v40 = vld [vmem:[%s5180_s4 + $0x5a8] sm:$0xff]  ;;  %v2692_v9 = vld [vmem:[%s5182_s3 + $0x3] ss:$0 sm:$0xff] }
 0x543   :  { %v1760_v13 = vsel %vm1744_vm6, %v1740_v1, %v1756_v8  ;;  %1899 = vmatmul.mubr.f32.gmra.mxu1 %v4931_v54  ;;  %3597 = vmatmul.mubr.f32.vlgmr.msra.gmra.mxu0 %v4940_v2  ;;  %v2690_v1 = vld [vmem:[%s5181_s2 + $0x3] ss:$0 sm:$0xff] }
 0x544   :  { %v4963_v0 = vadd.f32 %v1760_v13, %v4619_v12  ;;  %3603 = vmatpush3.msra.mxu0 %v2740_v33  ;;  %vm1745_vm7 = vcmp.gt.f32.partialorder %v1741_v14, 0.0  ;;  %v1757_v15 = vmul.f32 %v2640_v42, %v1741_v14  ;;  %3218 = vmatprep.subr.mxu1 %v2722_v11  ;;  %v2705_v12 = vld [vmem:[%s5180_s4 + $0x4e0] sm:$0xff]  ;;  %v2715_v33 = vld [vmem:[%s5180_s4 + $0x530] sm:$0xff]  ;;  %v2712_v42 = vld [vmem:[%s5180_s4 + $0x518] sm:$0xff] }
 0x545   :  { %3604 = vmatprep.subr.mxu0 %v2739_v5  ;;  %3219 = vmatpush3.msra.mxu1 %v2706_v10 }
 0x546   :  { %1903 = vmatprep.mubr.f32.mxu1 %v4963_v0  ;;  %v1761_v7 = vsel %vm1745_vm7, %v1741_v14, %v1757_v15  ;;  %3605 = vmatpush3.msra.mxu0 %v2739_v5 }
 0x547   :  { %1904 = vmatmul.mubr.f32.gmra.mxu1 %v4940_v2  ;;  %v4977_v19 = vadd.f32 %v1761_v7, %v4633_v17  ;;  %3220 = vmatprep.subr.mxu1 %v2721_v4  ;;  %v2704_v17 = vld [vmem:[%s5180_s4 + $0x4d8] sm:$0xff] }
 0x548   :  { %3606 = vmatprep.subr.mxu0 %v2738_v18  ;;  %3221 = vmatpush3.msra.mxu1 %v2705_v12 }
 0x549   :  { %3607 = vmatpush3.msra.mxu0 %v2738_v18  ;;  %1908 = vmatprep.mubr.f32.mxu1 %v4977_v19 }
 0x54a   :  { %3599 = vmatprep.mubr.f32.mxu0 %v4977_v19  ;;  %3222 = vmatprep.subr.mxu1 %v2720_v20 }
 0x54b   :  { %1909 = vmatmul.mubr.f32.gmra.mxu1 %v4963_v0  ;;  %3600 = vmatmul.mubr.f32.gmra.mxu0 %v4940_v2 }
 0x54c   :  { %3608 = vmatprep.subr.mxu0 %v2737_v16  ;;  %3223 = vmatpush3.msra.mxu1 %v2704_v17 }
 0x54d   :  { %3609 = vmatpush3.msra.mxu0 %v2737_v16  ;;  %3224 = vmatprep.subr.mxu1 %v2719_v21 }
 0x54e   :  { %3610 = vmatprep.subr.mxu0 %v2736_v22  ;;  %3225 = vmatpush3.msra.mxu1 %v2703_v23 }
 0x54f   :  { %3611 = vmatpush3.msra.mxu0 %v2736_v22  ;;  %3226 = vmatprep.subr.mxu1 %v2718_v24  ;;  %v2322_v24 = vld [vmem:[%s5186_s9 + $0x70] sm:$0xff] }
 0x550   :  { %3612 = vmatprep.subr.mxu0 %v2735_v25  ;;  %3227 = vmatpush3.msra.mxu1 %v2702_v26 }
 0x551   :  { %3613 = vmatpush3.msra.mxu0 %v2735_v25  ;;  %3228 = vmatprep.subr.mxu1 %v2717_v27  ;;  %v2321_v27 = vld [vmem:[%s5186_s9 + $0x68] sm:$0xff] }
 0x552   :  { %3614 = vmatprep.subr.mxu0 %v2734_v28  ;;  %3229 = vmatpush3.msra.mxu1 %v2701_v29 }
 0x553   :  { %3615 = vmatpush3.msra.mxu0 %v2734_v28  ;;  %3230 = vmatprep.subr.mxu1 %v2716_v30 }
 0x554   :  { %3616 = vmatprep.subr.mxu0 %v2733_v31  ;;  %3231 = vmatpush3.msra.mxu1 %v2700_v32 }
 0x555   :  { %3617 = vmatpush3.msra.mxu0 %v2733_v31  ;;  %3232 = vmatprep.subr.mxu1 %v2715_v33  ;;  %v2320_v33 = vld [vmem:[%s5186_s9 + $0x60] sm:$0xff] }
 0x556   :  { %3618 = vmatprep.subr.mxu0 %v2732_v34  ;;  %3233 = vmatpush3.msra.mxu1 %v2699_v35  ;;  %v2318_v35 = vld [vmem:[%s5186_s9 + $0x50] sm:$0xff] }
 0x557   :  { %3619 = vmatpush3.msra.mxu0 %v2732_v34  ;;  %3234 = vmatprep.subr.mxu1 %v2714_v36  ;;  %v2319_v34 = vld [vmem:[%s5186_s9 + $0x58] sm:$0xff]  ;;  %v2316_v36 = vld [vmem:[%s5186_s9 + $0x40] sm:$0xff] }
 0x558   :  { %3620 = vmatprep.subr.mxu0 %v2731_v37  ;;  %3235 = vmatpush3.msra.mxu1 %v2698_v38  ;;  %v2314_v38 = vld [vmem:[%s5186_s9 + $0x30] sm:$0xff] }
 0x559   :  { %3621 = vmatpush3.msra.mxu0 %v2731_v37  ;;  %3236 = vmatprep.subr.mxu1 %v2713_v39  ;;  %v2315_v37 = vld [vmem:[%s5186_s9 + $0x38] sm:$0xff]  ;;  %v2313_v39 = vld [vmem:[%s5186_s9 + $0x28] sm:$0xff] }
 0x55a   :  { %3622 = vmatprep.subr.mxu0 %v2730_v40  ;;  %3237 = vmatpush3.msra.mxu1 %v2697_v41  ;;  %v2311_v41 = vld [vmem:[%s5186_s9 + $0x18] sm:$0xff] }
 0x55b   :  { %3623 = vmatpush3.msra.mxu0 %v2730_v40  ;;  %3238 = vmatprep.subr.mxu1 %v2712_v42  ;;  %v2312_v40 = vld [vmem:[%s5186_s9 + $0x20] sm:$0xff]  ;;  %v2310_v42 = vld [vmem:[%s5186_s9 + $0x10] sm:$0xff] }
 0x55c   :  { %3624 = vmatprep.subr.mxu0 %v2729_v43  ;;  %3239 = vmatpush3.msra.mxu1 %v2696_v44  ;;  %v2308_v44 = vld [vmem:[%s5186_s9] sm:$0xff] }
 0x55d   :  { %3625 = vmatpush3.msra.mxu0 %v2729_v43  ;;  %3240 = vmatprep.subr.mxu1 %v2711_v45  ;;  %v2309_v43 = vld [vmem:[%s5186_s9 + $0x8] sm:$0xff] }
 0x55e   :  { %3626 = vmatprep.subr.mxu0 %v2728_v46  ;;  %3241 = vmatpush3.msra.mxu1 %v2695_v47 }
 0x55f   :  { %3627 = vmatpush3.msra.mxu0 %v2728_v46  ;;  %3242 = vmatprep.subr.mxu1 %v2710_v48 }
 0x560   :  { %3628 = vmatprep.subr.mxu0 %v2727_v49  ;;  %3243 = vmatpush3.msra.mxu1 %v2694_v50 }
 0x561   :  { %3629 = vmatpush3.msra.mxu0 %v2727_v49  ;;  %3244 = vmatprep.subr.mxu1 %v2709_v51  ;;  %v2742_v51 = vld [vmem:[%s5183_s5 + $0x3] ss:$0 sm:$0xff] }
 0x562   :  { %3630 = vmatprep.subr.mxu0 %v2726_v52  ;;  %3245 = vmatpush3.msra.mxu1 %v2693_v53  ;;  %v2744_v53 = vld [vmem:[%s5184_s6 + $0x3] ss:$0 sm:$0xff] }
 0x563   :  { %3631 = vmatpush3.msra.mxu0 %v2726_v52  ;;  %3640 = vmatprep.subr.mxu1 %v2323_v57 }
 0x564   :  { %3632 = vmatprep.subr.mxu0 %v2725_v56 }
 0x565   :  { %3633 = vmatpush3.msra.mxu0 %v2725_v56 }
 0x5ff   :  { %v3182_v58 = vpop.f32.mrf.mxu1 }
 0x601   :  { %v3183_v60 = vpop.f32.mrf.mxu1 }
 0x602   :  { %v3184_v6 = vadd.f32 %v3183_v60, %v3182_v58 }
 0x603   :  { %v3185_v61 = vpop.f32.mrf.mxu1  ;;  %v3598_v62 = vpop.f32.mrf.mxu0 }
 0x605   :  { %v3186_v63 = vpop.f32.mrf.mxu1  ;;  %v1980_v59 = vpop.f32.mrf.mxu0 }
 0x606   :  { %v3187_v8 = vadd.f32 %v3186_v63, %v3185_v61  ;;  %v1981_v55 = vadd.f32 %v3184_v6, %v1980_v59 }
 0x607   :  { %v3188_v11 = vpop.f32.mrf.mxu1 }
 0x608   :  { %v1986_v5 = vadd.f32 %v3598_v62, %v3187_v8  ;;  %v2007_v13 = vadd.f32 %v2690_v1, %v1981_v55 }
 0x609   :  { %v3189_v14 = vpop.f32.mrf.mxu1 }
 0x60a   :  { %v2008_v10 = vadd.f32 %v2690_v1, %v1986_v5  ;;  %vm2011_vm8 = vcmp.gt.f32.partialorder %v2007_v13, 0.0  ;;  %v2023_v15 = vmul.f32 %v2692_v9, %v2007_v13  ;;  %v3190_v20 = vadd.f32 %v3189_v14, %v3188_v11 }
 0x60b   :  { %v3191_v4 = vpop.f32.mrf.mxu1  ;;  %v3601_v18 = vpop.f32.mrf.mxu0 }
 0x60c   :  { %vm2012_vm9 = vcmp.gt.f32.partialorder %v2008_v10, 0.0  ;;  %v2024_v12 = vmul.f32 %v2692_v9, %v2008_v10  ;;  %v2027_v7 = vsel %vm2011_vm8, %v2007_v13, %v2023_v15 }
 0x60d   :  { %2031 = vst [vmem:[#allocation3 + $0x8] sm:$0xff] %v2027_v7  ;;  %v3192_v16 = vpop.f32.mrf.mxu1  ;;  %v1990_v17 = vpop.f32.mrf.mxu0  ;;  %2158 = vmatprep.mubr.f32.mxu1 %v2027_v7 }
 0x60e   :  { %v2028_v21 = vsel %vm2012_vm9, %v2008_v10, %v2024_v12  ;;  %v3193_v22 = vadd.f32 %v3192_v16, %v3191_v4  ;;  %v1991_v23 = vadd.f32 %v3190_v20, %v1990_v17  ;;  %2159 = vmatmul.mubr.f32.vlgmr.msra.gmra.mxu1 %v4940_v2 }
 0x60f   :  { %2032 = vst [vmem:[#allocation3 + $0x10] sm:$0xff] %v2028_v21  ;;  %2163 = vmatprep.mubr.f32.mxu1 %v2028_v21  ;;  %3634 = vmatprep.mubr.f32.mxu0 %v2028_v21 }
 0x610   :  { %v1996_v25 = vadd.f32 %v3601_v18, %v3193_v22  ;;  %v2009_v26 = vadd.f32 %v2690_v1, %v1991_v23  ;;  %3635 = vmatmul.mubr.f32.vlgmr.msra.gmra.mxu0 %v4940_v2  ;;  %3641 = vmatpush3.msra.mxu1 %v2323_v57 }
 0x611   :  { %3642 = vmatprep.subr.mxu1 %v2322_v24 }
 0x612   :  { %v2010_v28 = vadd.f32 %v2690_v1, %v1996_v25  ;;  %vm2013_vm10 = vcmp.gt.f32.partialorder %v2009_v26, 0.0  ;;  %v2025_v29 = vmul.f32 %v2692_v9, %v2009_v26  ;;  %2164 = vmatmul.mubr.f32.gmra.mxu1 %v2027_v7 }
 0x613   :  { %3643 = vmatpush3.msra.mxu1 %v2322_v24 }
 0x614   :  { %vm2014_vm11 = vcmp.gt.f32.partialorder %v2010_v28, 0.0  ;;  %v2026_v30 = vmul.f32 %v2692_v9, %v2010_v28  ;;  %v2029_v31 = vsel %vm2013_vm10, %v2009_v26, %v2025_v29  ;;  %3644 = vmatprep.subr.mxu1 %v2321_v27 }
 0x615   :  { %2033 = vst [vmem:[#allocation3 + $0x28] sm:$0xff] %v2029_v31  ;;  %2168 = vmatprep.mubr.f32.mxu1 %v2029_v31  ;;  %3645 = vmatpush3.msra.mxu1 %v2321_v27 }
 0x616   :  { %v2030_v32 = vsel %vm2014_vm11, %v2010_v28, %v2026_v30  ;;  %2169 = vmatmul.mubr.f32.gmra.mxu1 %v4940_v2  ;;  %3646 = vmatprep.subr.mxu1 %v2320_v33 }
 0x617   :  { %2034 = vst [vmem:[#allocation3 + $0x30] sm:$0xff] %v2030_v32  ;;  %2173 = vmatprep.mubr.f32.mxu1 %v2030_v32  ;;  %3637 = vmatprep.mubr.f32.mxu0 %v2030_v32 }
 0x618   :  { %3638 = vmatmul.mubr.f32.gmra.mxu0 %v4940_v2  ;;  %3647 = vmatpush3.msra.mxu1 %v2320_v33  ;;  %v2317_v2 = vld [vmem:[%s5186_s9 + $0x48] sm:$0xff] }
 0x619   :  { %3648 = vmatprep.subr.mxu1 %v2319_v34 }
 0x61a   :  { %2174 = vmatmul.mubr.f32.gmra.mxu1 %v2029_v31 }
 0x61b   :  { %3649 = vmatpush3.msra.mxu1 %v2319_v34 }
 0x61c   :  { %3650 = vmatprep.subr.mxu1 %v2318_v35 }
 0x61d   :  { %3651 = vmatpush3.msra.mxu1 %v2318_v35 }
 0x61e   :  { %3652 = vmatprep.subr.mxu1 %v2317_v2 }
 0x61f   :  { %3653 = vmatpush3.msra.mxu1 %v2317_v2 }
 0x620   :  { %3654 = vmatprep.subr.mxu1 %v2316_v36 }
 0x621   :  { %3655 = vmatpush3.msra.mxu1 %v2316_v36 }
 0x622   :  { %3656 = vmatprep.subr.mxu1 %v2315_v37 }
 0x623   :  { %3657 = vmatpush3.msra.mxu1 %v2315_v37 }
 0x624   :  { %3658 = vmatprep.subr.mxu1 %v2314_v38 }
 0x625   :  { %3659 = vmatpush3.msra.mxu1 %v2314_v38 }
 0x626   :  { %3660 = vmatprep.subr.mxu1 %v2313_v39 }
 0x627   :  { %3661 = vmatpush3.msra.mxu1 %v2313_v39 }
 0x628   :  { %3662 = vmatprep.subr.mxu1 %v2312_v40 }
 0x629   :  { %3663 = vmatpush3.msra.mxu1 %v2312_v40 }
 0x62a   :  { %3664 = vmatprep.subr.mxu1 %v2311_v41 }
 0x62b   :  { %3665 = vmatpush3.msra.mxu1 %v2311_v41 }
 0x62c   :  { %3666 = vmatprep.subr.mxu1 %v2310_v42 }
 0x62d   :  { %3667 = vmatpush3.msra.mxu1 %v2310_v42 }
 0x62e   :  { %3668 = vmatprep.subr.mxu1 %v2309_v43 }
 0x62f   :  { %3669 = vmatpush3.msra.mxu1 %v2309_v43 }
 0x630   :  { %3670 = vmatprep.subr.mxu1 %v2308_v44 }
 0x631   :  { %3671 = vmatpush3.msra.mxu1 %v2308_v44 }
 0x6ce   :  { %v3246_v45 = vpop.f32.mrf.mxu1 }
 0x6d0   :  { %v3247_v46 = vpop.f32.mrf.mxu1  ;;  %v3636_v47 = vpop.f32.mrf.mxu0 }
 0x6d1   :  { %v3248_v48 = vadd.f32 %v3247_v46, %v3246_v45 }
 0x6d2   :  { %v3249_v49 = vpop.f32.mrf.mxu1  ;;  %v2245_v50 = vpop.f32.mrf.mxu0 }
 0x6d3   :  { %v2246_v52 = vadd.f32 %v3248_v48, %v2245_v50 }
 0x6d4   :  { %v3250_v56 = vpop.f32.mrf.mxu1 }
 0x6d5   :  { %v2272_v57 = vadd.f32 %v2742_v51, %v2246_v52  ;;  %v3251_v58 = vadd.f32 %v3250_v56, %v3249_v49 }
 0x6d6   :  { %v3252_v60 = vpop.f32.mrf.mxu1 }
 0x6d7   :  { %vm2276_vm12 = vcmp.gt.f32.partialorder %v2272_v57, 0.0  ;;  %v2288_v61 = vmul.f32 %v2744_v53, %v2272_v57  ;;  %v2251_v62 = vadd.f32 %v3636_v47, %v3251_v58 }
 0x6d8   :  { %v3253_v6 = vpop.f32.mrf.mxu1  ;;  %v3639_v63 = vpop.f32.mrf.mxu0 }
 0x6d9   :  { %v2292_v1 = vsel %vm2276_vm12, %v2272_v57, %v2288_v61  ;;  %v2273_v59 = vadd.f32 %v2742_v51, %v2251_v62  ;;  %v3254_v8 = vadd.f32 %v3253_v6, %v3252_v60 }
 0x6da   :  { %v2296_v55 = vadd.f32 %v2292_v1, %v4931_v54  ;;  %v3255_v9 = vpop.f32.mrf.mxu1  ;;  %v2255_v11 = vpop.f32.mrf.mxu0 }
 0x6db   :  { %vm2277_vm13 = vcmp.gt.f32.partialorder %v2273_v59, 0.0  ;;  %v2289_v5 = vmul.f32 %v2744_v53, %v2273_v59  ;;  %v2256_v13 = vadd.f32 %v3254_v8, %v2255_v11 }
 0x6dc   :  { %2300 = vst [vmem:[#allocation2 + $0x8] sm:$0xff] %v2296_v55  ;;  %v3256_v14 = vpop.f32.mrf.mxu1  ;;  %3672 = vmatprep.mubr.f32.mxu1 %v2296_v55 }
 0x6dd   :  { %v2293_v10 = vsel %vm2277_vm13, %v2273_v59, %v2289_v5  ;;  %v2274_v15 = vadd.f32 %v2742_v51, %v2256_v13  ;;  %v3257_v4 = vadd.f32 %v3256_v14, %v3255_v9 }
 0x6de   :  { %v2297_v18 = vadd.f32 %v2293_v10, %v4944_v3  ;;  %v2745_v3 = vld [vmem:[%s5187_s10] ss:$0 sm:$0xff] }
 0x6df   :  { %vm2278_vm14 = vcmp.gt.f32.partialorder %v2274_v15, 0.0  ;;  %v2290_v12 = vmul.f32 %v2744_v53, %v2274_v15  ;;  %v2261_v7 = vadd.f32 %v3639_v63, %v3257_v4 }
 0x6e0   :  { %2301 = vst [vmem:[#allocation2 + $0x10] sm:$0xff] %v2297_v18  ;;  %3673 = vmatmul.mubr.f32.vlgmr.msra.gmra.mxu1 %v2297_v18 }
 0x6e1   :  { %v2294_v20 = vsel %vm2278_vm14, %v2274_v15, %v2290_v12  ;;  %v2275_v54 = vadd.f32 %v2742_v51, %v2261_v7 }
 0x6e2   :  { %v2298_v16 = vadd.f32 %v2294_v20, %v4963_v0 }
 0x6e3   :  { %vm2279_vm15 = vcmp.gt.f32.partialorder %v2275_v54, 0.0  ;;  %v2291_v17 = vmul.f32 %v2744_v53, %v2275_v54 }
 0x6e4   :  { %2302 = vst [vmem:[#allocation2 + $0x28] sm:$0xff] %v2298_v16  ;;  %3675 = vmatprep.mubr.f32.mxu1 %v2298_v16 }
 0x6e5   :  { %v2295_v21 = vsel %vm2279_vm15, %v2275_v54, %v2291_v17 }
 0x6e6   :  { %v2299_v22 = vadd.f32 %v2295_v21, %v4977_v19 }
 0x6e8   :  { %2303 = vst [vmem:[#allocation2 + $0x30] sm:$0xff] %v2299_v22  ;;  %3676 = vmatmul.mubr.f32.gmra.mxu1 %v2299_v22 }
 0x7a0   :  { %v3674_v23 = vpop.f32.mrf.mxu1 }
 0x7a1   :  { %v2417_v24 = vadd.f32 %v3674_v23, %v2745_v3 }
 0x7a2   :  { %v2390_v25 = vpop.f32.mrf.mxu1 }
 0x7a3   :  { %2421 = vst [vmem:[%s5188_s11 + $0x8] sm:$0xff] %v2417_v24  ;;  %v2416_v0 = vadd.f32 %v2745_v3, %v2390_v25 }
 0x7a5   :  { %2420 = vst [vmem:[%s5188_s11] sm:$0xff] %v2416_v0 }
 0x7a8   :  { %v3677_v26 = vpop.f32.mrf.mxu1 }
 0x7a9   :  { %v2419_v19 = vadd.f32 %v3677_v26, %v2745_v3 }
 0x7aa   :  { %v2400_v27 = vpop.f32.mrf.mxu1 }
 0x7ab   :  { %2423 = vst [vmem:[%s5188_s11 + $0x18] sm:$0xff] %v2419_v19  ;;  %v2418_v28 = vadd.f32 %v2745_v3, %v2400_v27 }
 0x7ad   :  { %2422 = vst [vmem:[%s5188_s11 + $0x10] sm:$0xff] %v2418_v28 }

</bundles_post_ra>
